<compile_context>
chip_gen: v5e
topology: v5e:2x2
jax: 0.10.0
libtpu: 0.0.40
codegen_flags: <defaults>
</compile_context>

<pallas_src>
import math
import functools

import jax
import jax.numpy as jnp
from jax import lax
from jax.experimental import pallas as pl
from jax.experimental.pallas import tpu as pltpu


# ----------------------------- kernel -----------------------------

def _layernorm(x, w, b, eps=1e-5):
    mean = jnp.mean(x, axis=-1, keepdims=True)
    var = jnp.mean((x - mean) ** 2, axis=-1, keepdims=True)
    return (x - mean) * lax.rsqrt(var + eps) * w + b


def encoder_block_kernel(x_ref,
                         ln1_w_ref, ln1_b_ref,
                         wqkv_ref, bqkv_ref,
                         wo_ref, bo_ref,
                         ln2_w_ref, ln2_b_ref,
                         w1_ref, b1_ref, w2_ref, b2_ref,
                         o_ref, *, num_heads, head_dim):
    H, dh = num_heads, head_dim
    x = x_ref[0].astype(jnp.float32)                                   # (S, D)
    S, D = x.shape

    # ---------------- MSA: LN1 -> fused QKV -> attention -> out proj -> residual ----------------
    xn = _layernorm(x, ln1_w_ref[...], ln1_b_ref[...])                 # (S, D) f32
    xb = xn.astype(jnp.bfloat16)

    # One full-width projection; Wq columns already carry the 1/sqrt(dh) scale.
    qkv = jnp.dot(xb, wqkv_ref[...],
                  preferred_element_type=jnp.float32) + bqkv_ref[...]  # (S, 3D) f32
    q_all = qkv[:, :D]
    k_all = qkv[:, D:2 * D]
    v_all = qkv[:, 2 * D:]

    # Per-head attention core. The score / value matmuls are inherently dh-narrow,
    # so a static head loop costs the same MXU work as a head-batched einsum but
    # avoids replicating activations or relayouting (S,D) into (H,S,dh).
    head_outs = []
    for h in range(H):
        sl = slice(h * dh, (h + 1) * dh)
        qh = q_all[:, sl].astype(jnp.bfloat16)                         # (S, dh)
        kh = k_all[:, sl].astype(jnp.bfloat16)                         # (S, dh)
        vh = v_all[:, sl].astype(jnp.bfloat16)                         # (S, dh)
        s = lax.dot_general(qh, kh, (((1,), (1,)), ((), ())),
                            preferred_element_type=jnp.float32)        # (S, S)
        s = s - jnp.max(s, axis=-1, keepdims=True)
        p = jnp.exp(s)
        p = p * pl.reciprocal(jnp.sum(p, axis=-1, keepdims=True), approx=True)
        head_outs.append(jnp.dot(p.astype(jnp.bfloat16), vh,
                                 preferred_element_type=jnp.float32))  # (S, dh)
    ao = jnp.concatenate(head_outs, axis=-1).astype(jnp.bfloat16)      # (S, D)

    # Single full-width output projection + residual.
    y = jnp.dot(ao, wo_ref[...],
                preferred_element_type=jnp.float32) + bo_ref[...] + x  # (S, D) f32

    # ---------------- MLP: LN2 -> Linear -> GELU(erf) -> Linear -> residual ----------------
    yn = _layernorm(y, ln2_w_ref[...], ln2_b_ref[...])
    h1 = jnp.dot(yn.astype(jnp.bfloat16), w1_ref[...],
                 preferred_element_type=jnp.float32) + b1_ref[...]     # (S, M)
    g = 0.5 * h1 * (1.0 + lax.erf(h1 * (1.0 / math.sqrt(2.0))))        # exact GELU
    out = jnp.dot(g.astype(jnp.bfloat16), w2_ref[...],
                  preferred_element_type=jnp.float32) + b2_ref[...]    # (S, D)

    o_ref[0] = (out + y).astype(o_ref.dtype)


# ----------------------------- wrapper -----------------------------

def transformer_encoder_block(x, params, *, num_heads):
    """params use PyTorch layouts: wqkv (3D,D), bqkv (3D,), wo (D,D), bo (D,),
    w1 (M,D), b1 (M,), w2 (D,M), b2 (D,), ln*_w/ln*_b (D,)."""
    B, S, D = x.shape
    H = num_heads
    dh = D // H
    M = params["w1"].shape[0]
    scale = 1.0 / math.sqrt(dh)

    # ---- host-side weight rearrangement: fuse QKV, fold scale, bf16 cast ----
    wqkv, bqkv = params["wqkv"], params["bqkv"]
    wqkv_f = jnp.concatenate(
        [wqkv[:D].T * scale, wqkv[D:2 * D].T, wqkv[2 * D:].T],
        axis=1).astype(jnp.bfloat16)                                    # (D, 3D)
    bqkv_f = jnp.concatenate(
        [bqkv[:D] * scale, bqkv[D:2 * D], bqkv[2 * D:]]
    ).reshape(1, 3 * D).astype(jnp.float32)                             # (1, 3D)

    wo_t = params["wo"].T.astype(jnp.bfloat16)                          # (D, D)
    bo = params["bo"].reshape(1, D).astype(jnp.float32)

    ln1_w = params["ln1_w"].reshape(1, D).astype(jnp.float32)
    ln1_b = params["ln1_b"].reshape(1, D).astype(jnp.float32)
    ln2_w = params["ln2_w"].reshape(1, D).astype(jnp.float32)
    ln2_b = params["ln2_b"].reshape(1, D).astype(jnp.float32)

    w1_t = params["w1"].T.astype(jnp.bfloat16)                          # (D, M)
    b1 = params["b1"].reshape(1, M).astype(jnp.float32)
    w2_t = params["w2"].T.astype(jnp.bfloat16)                          # (M, D)
    b2 = params["b2"].reshape(1, D).astype(jnp.float32)

    weights = (ln1_w, ln1_b, wqkv_f, bqkv_f, wo_t, bo,
               ln2_w, ln2_b, w1_t, b1, w2_t, b2)

    # ---- VMEM budget (live-set estimate) and per-generation clamp ----
    def nbytes(a):
        return int(a.size) * a.dtype.itemsize

    weight_bytes = sum(nbytes(a) for a in weights)
    io_bytes = 2 * 2 * S * D * 4                       # double-buffered x / out blocks
    act_bytes = 4 * (S * 3 * D + H * S * S + 2 * S * M + 8 * S * D)
    vmem_need = 2 * weight_bytes + io_bytes + act_bytes + (4 << 20)

    try:
        vmem_cap = int(pltpu.get_tpu_info().vmem_capacity_bytes)
    except Exception:
        vmem_cap = 64 << 20                            # conservative (v7x-sized) fallback
    ceiling = int(vmem_cap * 0.85)                     # headroom for compiler scratch
    if vmem_need > ceiling:
        raise ValueError(
            f"encoder-block live set (~{vmem_need >> 20} MiB) exceeds the VMEM budget "
            f"(~{ceiling >> 20} MiB); add a query-tile grid axis / MLP chunking for this shape.")
    vmem_limit = int(max(32 << 20, min(vmem_need, ceiling)))

    flops = int(2 * B * S * (4 * D * D + 2 * S * D + 2 * D * M))
    transcendentals = int(B * (H * S * S + S * M + H * S + 2 * S))
    bytes_accessed = int(2 * B * S * D * 4 + weight_bytes)

    x_spec = pl.BlockSpec((1, S, D), lambda b: (b, 0, 0))

    def build_in_specs(single_buffer_weights):
        def w_spec(shape):
            n = len(shape)
            if single_buffer_weights:
                # Weights are invariant across the batch grid: single-buffer them.
                return pl.BlockSpec(shape, lambda b: (0,) * n,
                                    pipeline_mode=pl.Buffered(1))
            return pl.BlockSpec(shape, lambda b: (0,) * n)
        return [x_spec] + [w_spec(w.shape) for w in weights]

    def call(single_buffer_weights):
        return pl.pallas_call(
            functools.partial(encoder_block_kernel, num_heads=H, head_dim=dh),
            out_shape=jax.ShapeDtypeStruct((B, S, D), x.dtype),
            grid_spec=pltpu.PrefetchScalarGridSpec(
                num_scalar_prefetch=0,
                grid=(B,),
                in_specs=build_in_specs(single_buffer_weights),
                out_specs=x_spec,
            ),
            compiler_params=pltpu.CompilerParams(
                dimension_semantics=("parallel",),
                vmem_limit_bytes=vmem_limit,
            ),
            cost_estimate=pl.CostEstimate(
                flops=flops, transcendentals=transcendentals,
                bytes_accessed=bytes_accessed),
        )(x, *weights)

    try:
        return call(True)
    except Exception:
        # pipeline_mode=pl.Buffered(1) not supported by this jax build — fall back to
        # default double-buffered weight specs (correctness unaffected).
        return call(False)


# ----------------------------- reference (plain JAX, same numeric policy) -----------------------------

def reference_forward(x, params, *, num_heads):
    B, S, D = x.shape
    H = num_heads
    dh = D // H
    bf16, f32 = jnp.bfloat16, jnp.float32
    scale = 1.0 / math.sqrt(dh)

    def ln(v, w, b):
        m = jnp.mean(v, -1, keepdims=True)
        va = jnp.mean((v - m) ** 2, -1, keepdims=True)
        return (v - m) / jnp.sqrt(va + 1e-5) * w + b

    wqkv, bqkv = params["wqkv"], params["bqkv"]
    wq = (wqkv[:D].T * scale).astype(bf16)
    wk = wqkv[D:2 * D].T.astype(bf16)
    wv = wqkv[2 * D:].T.astype(bf16)
    bq = (bqkv[:D] * scale).astype(f32)
    bk = bqkv[D:2 * D].astype(f32)
    bv = bqkv[2 * D:].astype(f32)

    xn = ln(x, params["ln1_w"], params["ln1_b"])
    xb = xn.astype(bf16)
    q = jnp.einsum('bsd,dk->bsk', xb, wq, preferred_element_type=f32) + bq
    k = jnp.einsum('bsd,dk->bsk', xb, wk, preferred_element_type=f32) + bk
    v = jnp.einsum('bsd,dk->bsk', xb, wv, preferred_element_type=f32) + bv

    def to_heads(t):
        return t.reshape(B, S, H, dh).transpose(0, 2, 1, 3)

    qh, kh, vh = to_heads(q), to_heads(k), to_heads(v)
    s = jnp.einsum('bhqd,bhkd->bhqk', qh.astype(bf16), kh.astype(bf16),
                   preferred_element_type=f32)
    s = s - s.max(-1, keepdims=True)
    p = jnp.exp(s)
    p = p / p.sum(-1, keepdims=True)
    ao = jnp.einsum('bhqk,bhkd->bhqd', p.astype(bf16), vh.astype(bf16),
                    preferred_element_type=f32)
    ao = ao.transpose(0, 2, 1, 3).reshape(B, S, D)
    y = jnp.einsum('bsd,dn->bsn', ao.astype(bf16), params["wo"].T.astype(bf16),
                   preferred_element_type=f32) + params["bo"] + x

    yn = ln(y, params["ln2_w"], params["ln2_b"])
    h1 = jnp.einsum('bsd,dm->bsm', yn.astype(bf16), params["w1"].T.astype(bf16),
                    preferred_element_type=f32) + params["b1"]
    g = 0.5 * h1 * (1.0 + lax.erf(h1 * (1.0 / math.sqrt(2.0))))
    out = jnp.einsum('bsm,md->bsd', g.astype(bf16), params["w2"].T.astype(bf16),
                     preferred_element_type=f32) + params["b2"] + y
    return out


# ----------------------------- main -----------------------------

if __name__ == "__main__":
    # small but (8,128)-aligned: batch=2, seq=16, embedding_dim=128, heads=4, mlp_dim=256
    B, S, D, H, M = 2, 16, 128, 4, 256

    key = jax.random.PRNGKey(0)
    ks = jax.random.split(key, 10)

    x = jax.random.normal(ks[0], (B, S, D), dtype=jnp.float32)

    def rnd(k, shape, scale=0.02):
        return (scale * jax.random.normal(k, shape)).astype(jnp.float32)

    params = {
        # LayerNorms (PyTorch default init: weight=1, bias=0)
        "ln1_w": jnp.ones((D,), jnp.float32),
        "ln1_b": jnp.zeros((D,), jnp.float32),
        "ln2_w": jnp.ones((D,), jnp.float32),
        "ln2_b": jnp.zeros((D,), jnp.float32),
        # MHA in_proj (3D, D) and bias (3D,); out_proj (D, D) and bias (D,)
        "wqkv": rnd(ks[1], (3 * D, D)),
        "bqkv": rnd(ks[2], (3 * D,)),
        "wo":   rnd(ks[3], (D, D)),
        "bo":   rnd(ks[4], (D,)),
        # MLP: Linear(D->M) weight (M, D), Linear(M->D) weight (D, M)
        "w1":   rnd(ks[5], (M, D)),
        "b1":   rnd(ks[6], (M,)),
        "w2":   rnd(ks[7], (D, M)),
        "b2":   rnd(ks[8], (D,)),
    }

    out = transformer_encoder_block(x, params, num_heads=H)
    out = jax.block_until_ready(out)

    ref = reference_forward(x, params, num_heads=H)
    assert out.shape == (B, S, D)
    max_err = float(jnp.max(jnp.abs(out - ref)))
    assert jnp.allclose(out, ref, atol=2e-3, rtol=2e-3), f"mismatch vs reference (max err {max_err})"

    print("KERNEL_OK")
</pallas_src>

<mosaic_0001>
module attributes {stable_mosaic.version = 11 : i64} {
  func.func @encoder_block_kernel(%arg0: i32, %arg1: memref<1x16x128xf32, #tpu.memory_space<vmem>>, %arg2: memref<1x128xf32, #tpu.memory_space<vmem>>, %arg3: memref<1x128xf32, #tpu.memory_space<vmem>>, %arg4: memref<128x384xbf16, #tpu.memory_space<vmem>>, %arg5: memref<1x384xf32, #tpu.memory_space<vmem>>, %arg6: memref<128x128xbf16, #tpu.memory_space<vmem>>, %arg7: memref<1x128xf32, #tpu.memory_space<vmem>>, %arg8: memref<1x128xf32, #tpu.memory_space<vmem>>, %arg9: memref<1x128xf32, #tpu.memory_space<vmem>>, %arg10: memref<128x256xbf16, #tpu.memory_space<vmem>>, %arg11: memref<1x256xf32, #tpu.memory_space<vmem>>, %arg12: memref<256x128xbf16, #tpu.memory_space<vmem>>, %arg13: memref<1x128xf32, #tpu.memory_space<vmem>>, %arg14: memref<1x16x128xf32, #tpu.memory_space<vmem>>) attributes {dimension_semantics = [#tpu.dimension_semantics<parallel>], iteration_bounds = array<i64: 2>, scalar_prefetch = 0 : i64, scratch_operands = 0 : i64, tpu.core_type = #tpu.core_type<tc>, window_params = [{transform_indices = @transform_0, window_bounds = array<i64: 1, 16, 128>}, {pipeline_mode = #tpu.pipeline_mode<synchronous>, transform_indices = @transform_1, window_bounds = array<i64: 1, 128>}, {pipeline_mode = #tpu.pipeline_mode<synchronous>, transform_indices = @transform_2, window_bounds = array<i64: 1, 128>}, {pipeline_mode = #tpu.pipeline_mode<synchronous>, transform_indices = @transform_3, window_bounds = array<i64: 128, 384>}, {pipeline_mode = #tpu.pipeline_mode<synchronous>, transform_indices = @transform_4, window_bounds = array<i64: 1, 384>}, {pipeline_mode = #tpu.pipeline_mode<synchronous>, transform_indices = @transform_5, window_bounds = array<i64: 128, 128>}, {pipeline_mode = #tpu.pipeline_mode<synchronous>, transform_indices = @transform_6, window_bounds = array<i64: 1, 128>}, {pipeline_mode = #tpu.pipeline_mode<synchronous>, transform_indices = @transform_7, window_bounds = array<i64: 1, 128>}, {pipeline_mode = #tpu.pipeline_mode<synchronous>, transform_indices = @transform_8, window_bounds = array<i64: 1, 128>}, {pipeline_mode = #tpu.pipeline_mode<synchronous>, transform_indices = @transform_9, window_bounds = array<i64: 128, 256>}, {pipeline_mode = #tpu.pipeline_mode<synchronous>, transform_indices = @transform_10, window_bounds = array<i64: 1, 256>}, {pipeline_mode = #tpu.pipeline_mode<synchronous>, transform_indices = @transform_11, window_bounds = array<i64: 256, 128>}, {pipeline_mode = #tpu.pipeline_mode<synchronous>, transform_indices = @transform_12, window_bounds = array<i64: 1, 128>}, {transform_indices = @transform_13, window_bounds = array<i64: 1, 16, 128>}]} {
    %c0 = arith.constant 0 : index
    %c0_0 = arith.constant 0 : index
    %c0_1 = arith.constant 0 : index
    %0 = vector.load %arg1[%c0, %c0_0, %c0_1] : memref<1x16x128xf32, #tpu.memory_space<vmem>>, vector<1x16x128xf32>
    %1 = vector.shape_cast %0 : vector<1x16x128xf32> to vector<16x128xf32>
    %c0_2 = arith.constant 0 : index
    %c0_3 = arith.constant 0 : index
    %2 = vector.load %arg2[%c0_2, %c0_3] : memref<1x128xf32, #tpu.memory_space<vmem>>, vector<1x128xf32>
    %c0_4 = arith.constant 0 : index
    %c0_5 = arith.constant 0 : index
    %3 = vector.load %arg3[%c0_4, %c0_5] : memref<1x128xf32, #tpu.memory_space<vmem>>, vector<1x128xf32>
    %cst = arith.constant dense<0.000000e+00> : vector<16xf32>
    %4 = vector.multi_reduction <add>, %1, %cst [1] : vector<16x128xf32> to vector<16xf32>
    %5 = vector.shape_cast %4 : vector<16xf32> to vector<16x1xf32>
    %cst_6 = arith.constant 1.280000e+02 : f32
    %6 = vector.broadcast %cst_6 : f32 to vector<16x1xf32>
    %7 = arith.divf %5, %6 : vector<16x1xf32>
    %8 = vector.broadcast %7 : vector<16x1xf32> to vector<16x128xf32>
    %9 = arith.subf %1, %8 : vector<16x128xf32>
    %10 = arith.mulf %9, %9 : vector<16x128xf32>
    %cst_7 = arith.constant dense<0.000000e+00> : vector<16xf32>
    %11 = vector.multi_reduction <add>, %10, %cst_7 [1] : vector<16x128xf32> to vector<16xf32>
    %12 = vector.shape_cast %11 : vector<16xf32> to vector<16x1xf32>
    %cst_8 = arith.constant 1.280000e+02 : f32
    %13 = vector.broadcast %cst_8 : f32 to vector<16x1xf32>
    %14 = arith.divf %12, %13 : vector<16x1xf32>
    %15 = vector.broadcast %7 : vector<16x1xf32> to vector<16x128xf32>
    %16 = arith.subf %1, %15 : vector<16x128xf32>
    %cst_9 = arith.constant 9.99999974E-6 : f32
    %17 = vector.broadcast %cst_9 : f32 to vector<16x1xf32>
    %18 = arith.addf %14, %17 : vector<16x1xf32>
    %19 = math.rsqrt %18 : vector<16x1xf32>
    %20 = vector.broadcast %19 : vector<16x1xf32> to vector<16x128xf32>
    %21 = arith.mulf %16, %20 : vector<16x128xf32>
    %22 = vector.broadcast %2 : vector<1x128xf32> to vector<16x128xf32>
    %23 = arith.mulf %21, %22 : vector<16x128xf32>
    %24 = vector.broadcast %3 : vector<1x128xf32> to vector<16x128xf32>
    %25 = arith.addf %23, %24 : vector<16x128xf32>
    %26 = arith.truncf %25 : vector<16x128xf32> to vector<16x128xbf16>
    %c0_10 = arith.constant 0 : index
    %c0_11 = arith.constant 0 : index
    %27 = vector.load %arg4[%c0_10, %c0_11] : memref<128x384xbf16, #tpu.memory_space<vmem>>, vector<128x384xbf16>
    %cst_12 = arith.constant dense<0.000000e+00> : vector<16x384xf32>
    %28 = tpu.matmul %26, %27, %cst_12 {dimension_numbers = #tpu.dot_dimension_numbers<[1], [0], [0], [1], [0, 0, 1, 1], [], []>} : vector<16x128xbf16>, vector<128x384xbf16>, vector<16x384xf32> -> vector<16x384xf32>
    %c0_13 = arith.constant 0 : index
    %c0_14 = arith.constant 0 : index
    %29 = vector.load %arg5[%c0_13, %c0_14] : memref<1x384xf32, #tpu.memory_space<vmem>>, vector<1x384xf32>
    %30 = vector.broadcast %29 : vector<1x384xf32> to vector<16x384xf32>
    %31 = arith.addf %28, %30 : vector<16x384xf32>
    %32 = vector.extract_strided_slice %31 {offsets = [0, 0], sizes = [16, 128], strides = [1, 1]} : vector<16x384xf32> to vector<16x128xf32>
    %33 = vector.extract_strided_slice %31 {offsets = [0, 128], sizes = [16, 128], strides = [1, 1]} : vector<16x384xf32> to vector<16x128xf32>
    %34 = vector.extract_strided_slice %31 {offsets = [0, 256], sizes = [16, 128], strides = [1, 1]} : vector<16x384xf32> to vector<16x128xf32>
    %35 = vector.extract_strided_slice %32 {offsets = [0, 0], sizes = [16, 32], strides = [1, 1]} : vector<16x128xf32> to vector<16x32xf32>
    %36 = arith.truncf %35 : vector<16x32xf32> to vector<16x32xbf16>
    %37 = vector.extract_strided_slice %33 {offsets = [0, 0], sizes = [16, 32], strides = [1, 1]} : vector<16x128xf32> to vector<16x32xf32>
    %38 = arith.truncf %37 : vector<16x32xf32> to vector<16x32xbf16>
    %39 = vector.extract_strided_slice %34 {offsets = [0, 0], sizes = [16, 32], strides = [1, 1]} : vector<16x128xf32> to vector<16x32xf32>
    %40 = arith.truncf %39 : vector<16x32xf32> to vector<16x32xbf16>
    %cst_15 = arith.constant dense<0.000000e+00> : vector<16x16xf32>
    %41 = tpu.matmul %36, %38, %cst_15 {dimension_numbers = #tpu.dot_dimension_numbers<[1], [1], [0], [0], [0, 0, 1, 0], [], []>} : vector<16x32xbf16>, vector<16x32xbf16>, vector<16x16xf32> -> vector<16x16xf32>
    %cst_16 = arith.constant dense<0xFF800000> : vector<16xf32>
    %42 = vector.multi_reduction <maximumf>, %41, %cst_16 [1] : vector<16x16xf32> to vector<16xf32>
    %43 = vector.shape_cast %42 : vector<16xf32> to vector<16x1xf32>
    %44 = vector.broadcast %43 : vector<16x1xf32> to vector<16x16xf32>
    %45 = arith.subf %41, %44 : vector<16x16xf32>
    %46 = math.exp %45 : vector<16x16xf32>
    %cst_17 = arith.constant dense<0.000000e+00> : vector<16xf32>
    %47 = vector.multi_reduction <add>, %46, %cst_17 [1] : vector<16x16xf32> to vector<16xf32>
    %48 = vector.shape_cast %47 : vector<16xf32> to vector<16x1xf32>
    %49 = tpu.reciprocal %48 {approx = true} : vector<16x1xf32> -> vector<16x1xf32>
    %50 = vector.broadcast %49 : vector<16x1xf32> to vector<16x16xf32>
    %51 = arith.mulf %46, %50 : vector<16x16xf32>
    %52 = arith.truncf %51 : vector<16x16xf32> to vector<16x16xbf16>
    %cst_18 = arith.constant dense<0.000000e+00> : vector<16x32xf32>
    %53 = tpu.matmul %52, %40, %cst_18 {dimension_numbers = #tpu.dot_dimension_numbers<[1], [0], [0], [1], [0, 0, 1, 1], [], []>} : vector<16x16xbf16>, vector<16x32xbf16>, vector<16x32xf32> -> vector<16x32xf32>
    %54 = vector.extract_strided_slice %32 {offsets = [0, 32], sizes = [16, 32], strides = [1, 1]} : vector<16x128xf32> to vector<16x32xf32>
    %55 = arith.truncf %54 : vector<16x32xf32> to vector<16x32xbf16>
    %56 = vector.extract_strided_slice %33 {offsets = [0, 32], sizes = [16, 32], strides = [1, 1]} : vector<16x128xf32> to vector<16x32xf32>
    %57 = arith.truncf %56 : vector<16x32xf32> to vector<16x32xbf16>
    %58 = vector.extract_strided_slice %34 {offsets = [0, 32], sizes = [16, 32], strides = [1, 1]} : vector<16x128xf32> to vector<16x32xf32>
    %59 = arith.truncf %58 : vector<16x32xf32> to vector<16x32xbf16>
    %cst_19 = arith.constant dense<0.000000e+00> : vector<16x16xf32>
    %60 = tpu.matmul %55, %57, %cst_19 {dimension_numbers = #tpu.dot_dimension_numbers<[1], [1], [0], [0], [0, 0, 1, 0], [], []>} : vector<16x32xbf16>, vector<16x32xbf16>, vector<16x16xf32> -> vector<16x16xf32>
    %cst_20 = arith.constant dense<0xFF800000> : vector<16xf32>
    %61 = vector.multi_reduction <maximumf>, %60, %cst_20 [1] : vector<16x16xf32> to vector<16xf32>
    %62 = vector.shape_cast %61 : vector<16xf32> to vector<16x1xf32>
    %63 = vector.broadcast %62 : vector<16x1xf32> to vector<16x16xf32>
    %64 = arith.subf %60, %63 : vector<16x16xf32>
    %65 = math.exp %64 : vector<16x16xf32>
    %cst_21 = arith.constant dense<0.000000e+00> : vector<16xf32>
    %66 = vector.multi_reduction <add>, %65, %cst_21 [1] : vector<16x16xf32> to vector<16xf32>
    %67 = vector.shape_cast %66 : vector<16xf32> to vector<16x1xf32>
    %68 = tpu.reciprocal %67 {approx = true} : vector<16x1xf32> -> vector<16x1xf32>
    %69 = vector.broadcast %68 : vector<16x1xf32> to vector<16x16xf32>
    %70 = arith.mulf %65, %69 : vector<16x16xf32>
    %71 = arith.truncf %70 : vector<16x16xf32> to vector<16x16xbf16>
    %cst_22 = arith.constant dense<0.000000e+00> : vector<16x32xf32>
    %72 = tpu.matmul %71, %59, %cst_22 {dimension_numbers = #tpu.dot_dimension_numbers<[1], [0], [0], [1], [0, 0, 1, 1], [], []>} : vector<16x16xbf16>, vector<16x32xbf16>, vector<16x32xf32> -> vector<16x32xf32>
    %73 = vector.extract_strided_slice %32 {offsets = [0, 64], sizes = [16, 32], strides = [1, 1]} : vector<16x128xf32> to vector<16x32xf32>
    %74 = arith.truncf %73 : vector<16x32xf32> to vector<16x32xbf16>
    %75 = vector.extract_strided_slice %33 {offsets = [0, 64], sizes = [16, 32], strides = [1, 1]} : vector<16x128xf32> to vector<16x32xf32>
    %76 = arith.truncf %75 : vector<16x32xf32> to vector<16x32xbf16>
    %77 = vector.extract_strided_slice %34 {offsets = [0, 64], sizes = [16, 32], strides = [1, 1]} : vector<16x128xf32> to vector<16x32xf32>
    %78 = arith.truncf %77 : vector<16x32xf32> to vector<16x32xbf16>
    %cst_23 = arith.constant dense<0.000000e+00> : vector<16x16xf32>
    %79 = tpu.matmul %74, %76, %cst_23 {dimension_numbers = #tpu.dot_dimension_numbers<[1], [1], [0], [0], [0, 0, 1, 0], [], []>} : vector<16x32xbf16>, vector<16x32xbf16>, vector<16x16xf32> -> vector<16x16xf32>
    %cst_24 = arith.constant dense<0xFF800000> : vector<16xf32>
    %80 = vector.multi_reduction <maximumf>, %79, %cst_24 [1] : vector<16x16xf32> to vector<16xf32>
    %81 = vector.shape_cast %80 : vector<16xf32> to vector<16x1xf32>
    %82 = vector.broadcast %81 : vector<16x1xf32> to vector<16x16xf32>
    %83 = arith.subf %79, %82 : vector<16x16xf32>
    %84 = math.exp %83 : vector<16x16xf32>
    %cst_25 = arith.constant dense<0.000000e+00> : vector<16xf32>
    %85 = vector.multi_reduction <add>, %84, %cst_25 [1] : vector<16x16xf32> to vector<16xf32>
    %86 = vector.shape_cast %85 : vector<16xf32> to vector<16x1xf32>
    %87 = tpu.reciprocal %86 {approx = true} : vector<16x1xf32> -> vector<16x1xf32>
    %88 = vector.broadcast %87 : vector<16x1xf32> to vector<16x16xf32>
    %89 = arith.mulf %84, %88 : vector<16x16xf32>
    %90 = arith.truncf %89 : vector<16x16xf32> to vector<16x16xbf16>
    %cst_26 = arith.constant dense<0.000000e+00> : vector<16x32xf32>
    %91 = tpu.matmul %90, %78, %cst_26 {dimension_numbers = #tpu.dot_dimension_numbers<[1], [0], [0], [1], [0, 0, 1, 1], [], []>} : vector<16x16xbf16>, vector<16x32xbf16>, vector<16x32xf32> -> vector<16x32xf32>
    %92 = vector.extract_strided_slice %32 {offsets = [0, 96], sizes = [16, 32], strides = [1, 1]} : vector<16x128xf32> to vector<16x32xf32>
    %93 = arith.truncf %92 : vector<16x32xf32> to vector<16x32xbf16>
    %94 = vector.extract_strided_slice %33 {offsets = [0, 96], sizes = [16, 32], strides = [1, 1]} : vector<16x128xf32> to vector<16x32xf32>
    %95 = arith.truncf %94 : vector<16x32xf32> to vector<16x32xbf16>
    %96 = vector.extract_strided_slice %34 {offsets = [0, 96], sizes = [16, 32], strides = [1, 1]} : vector<16x128xf32> to vector<16x32xf32>
    %97 = arith.truncf %96 : vector<16x32xf32> to vector<16x32xbf16>
    %cst_27 = arith.constant dense<0.000000e+00> : vector<16x16xf32>
    %98 = tpu.matmul %93, %95, %cst_27 {dimension_numbers = #tpu.dot_dimension_numbers<[1], [1], [0], [0], [0, 0, 1, 0], [], []>} : vector<16x32xbf16>, vector<16x32xbf16>, vector<16x16xf32> -> vector<16x16xf32>
    %cst_28 = arith.constant dense<0xFF800000> : vector<16xf32>
    %99 = vector.multi_reduction <maximumf>, %98, %cst_28 [1] : vector<16x16xf32> to vector<16xf32>
    %100 = vector.shape_cast %99 : vector<16xf32> to vector<16x1xf32>
    %101 = vector.broadcast %100 : vector<16x1xf32> to vector<16x16xf32>
    %102 = arith.subf %98, %101 : vector<16x16xf32>
    %103 = math.exp %102 : vector<16x16xf32>
    %cst_29 = arith.constant dense<0.000000e+00> : vector<16xf32>
    %104 = vector.multi_reduction <add>, %103, %cst_29 [1] : vector<16x16xf32> to vector<16xf32>
    %105 = vector.shape_cast %104 : vector<16xf32> to vector<16x1xf32>
    %106 = tpu.reciprocal %105 {approx = true} : vector<16x1xf32> -> vector<16x1xf32>
    %107 = vector.broadcast %106 : vector<16x1xf32> to vector<16x16xf32>
    %108 = arith.mulf %103, %107 : vector<16x16xf32>
    %109 = arith.truncf %108 : vector<16x16xf32> to vector<16x16xbf16>
    %cst_30 = arith.constant dense<0.000000e+00> : vector<16x32xf32>
    %110 = tpu.matmul %109, %97, %cst_30 {dimension_numbers = #tpu.dot_dimension_numbers<[1], [0], [0], [1], [0, 0, 1, 1], [], []>} : vector<16x16xbf16>, vector<16x32xbf16>, vector<16x32xf32> -> vector<16x32xf32>
    %111 = tpu.concatenate %53, %72, %91, %110 in 1 : vector<16x32xf32>, vector<16x32xf32>, vector<16x32xf32>, vector<16x32xf32> -> vector<16x128xf32>
    %112 = arith.truncf %111 : vector<16x128xf32> to vector<16x128xbf16>
    %c0_31 = arith.constant 0 : index
    %c0_32 = arith.constant 0 : index
    %113 = vector.load %arg6[%c0_31, %c0_32] : memref<128x128xbf16, #tpu.memory_space<vmem>>, vector<128x128xbf16>
    %cst_33 = arith.constant dense<0.000000e+00> : vector<16x128xf32>
    %114 = tpu.matmul %112, %113, %cst_33 {dimension_numbers = #tpu.dot_dimension_numbers<[1], [0], [0], [1], [0, 0, 1, 1], [], []>} : vector<16x128xbf16>, vector<128x128xbf16>, vector<16x128xf32> -> vector<16x128xf32>
    %c0_34 = arith.constant 0 : index
    %c0_35 = arith.constant 0 : index
    %115 = vector.load %arg7[%c0_34, %c0_35] : memref<1x128xf32, #tpu.memory_space<vmem>>, vector<1x128xf32>
    %116 = vector.broadcast %115 : vector<1x128xf32> to vector<16x128xf32>
    %117 = arith.addf %114, %116 : vector<16x128xf32>
    %118 = arith.addf %117, %1 : vector<16x128xf32>
    %c0_36 = arith.constant 0 : index
    %c0_37 = arith.constant 0 : index
    %119 = vector.load %arg8[%c0_36, %c0_37] : memref<1x128xf32, #tpu.memory_space<vmem>>, vector<1x128xf32>
    %c0_38 = arith.constant 0 : index
    %c0_39 = arith.constant 0 : index
    %120 = vector.load %arg9[%c0_38, %c0_39] : memref<1x128xf32, #tpu.memory_space<vmem>>, vector<1x128xf32>
    %cst_40 = arith.constant dense<0.000000e+00> : vector<16xf32>
    %121 = vector.multi_reduction <add>, %118, %cst_40 [1] : vector<16x128xf32> to vector<16xf32>
    %122 = vector.shape_cast %121 : vector<16xf32> to vector<16x1xf32>
    %cst_41 = arith.constant 1.280000e+02 : f32
    %123 = vector.broadcast %cst_41 : f32 to vector<16x1xf32>
    %124 = arith.divf %122, %123 : vector<16x1xf32>
    %125 = vector.broadcast %124 : vector<16x1xf32> to vector<16x128xf32>
    %126 = arith.subf %118, %125 : vector<16x128xf32>
    %127 = arith.mulf %126, %126 : vector<16x128xf32>
    %cst_42 = arith.constant dense<0.000000e+00> : vector<16xf32>
    %128 = vector.multi_reduction <add>, %127, %cst_42 [1] : vector<16x128xf32> to vector<16xf32>
    %129 = vector.shape_cast %128 : vector<16xf32> to vector<16x1xf32>
    %cst_43 = arith.constant 1.280000e+02 : f32
    %130 = vector.broadcast %cst_43 : f32 to vector<16x1xf32>
    %131 = arith.divf %129, %130 : vector<16x1xf32>
    %132 = vector.broadcast %124 : vector<16x1xf32> to vector<16x128xf32>
    %133 = arith.subf %118, %132 : vector<16x128xf32>
    %cst_44 = arith.constant 9.99999974E-6 : f32
    %134 = vector.broadcast %cst_44 : f32 to vector<16x1xf32>
    %135 = arith.addf %131, %134 : vector<16x1xf32>
    %136 = math.rsqrt %135 : vector<16x1xf32>
    %137 = vector.broadcast %136 : vector<16x1xf32> to vector<16x128xf32>
    %138 = arith.mulf %133, %137 : vector<16x128xf32>
    %139 = vector.broadcast %119 : vector<1x128xf32> to vector<16x128xf32>
    %140 = arith.mulf %138, %139 : vector<16x128xf32>
    %141 = vector.broadcast %120 : vector<1x128xf32> to vector<16x128xf32>
    %142 = arith.addf %140, %141 : vector<16x128xf32>
    %143 = arith.truncf %142 : vector<16x128xf32> to vector<16x128xbf16>
    %c0_45 = arith.constant 0 : index
    %c0_46 = arith.constant 0 : index
    %144 = vector.load %arg10[%c0_45, %c0_46] : memref<128x256xbf16, #tpu.memory_space<vmem>>, vector<128x256xbf16>
    %cst_47 = arith.constant dense<0.000000e+00> : vector<16x256xf32>
    %145 = tpu.matmul %143, %144, %cst_47 {dimension_numbers = #tpu.dot_dimension_numbers<[1], [0], [0], [1], [0, 0, 1, 1], [], []>} : vector<16x128xbf16>, vector<128x256xbf16>, vector<16x256xf32> -> vector<16x256xf32>
    %c0_48 = arith.constant 0 : index
    %c0_49 = arith.constant 0 : index
    %146 = vector.load %arg11[%c0_48, %c0_49] : memref<1x256xf32, #tpu.memory_space<vmem>>, vector<1x256xf32>
    %147 = vector.broadcast %146 : vector<1x256xf32> to vector<16x256xf32>
    %148 = arith.addf %145, %147 : vector<16x256xf32>
    %cst_50 = arith.constant 5.000000e-01 : f32
    %149 = vector.broadcast %cst_50 : f32 to vector<16x256xf32>
    %150 = arith.mulf %149, %148 : vector<16x256xf32>
    %cst_51 = arith.constant 0.707106769 : f32
    %151 = vector.broadcast %cst_51 : f32 to vector<16x256xf32>
    %152 = arith.mulf %148, %151 : vector<16x256xf32>
    %153 = math.erf %152 : vector<16x256xf32>
    %cst_52 = arith.constant 1.000000e+00 : f32
    %154 = vector.broadcast %cst_52 : f32 to vector<16x256xf32>
    %155 = arith.addf %154, %153 : vector<16x256xf32>
    %156 = arith.mulf %150, %155 : vector<16x256xf32>
    %157 = arith.truncf %156 : vector<16x256xf32> to vector<16x256xbf16>
    %c0_53 = arith.constant 0 : index
    %c0_54 = arith.constant 0 : index
    %158 = vector.load %arg12[%c0_53, %c0_54] : memref<256x128xbf16, #tpu.memory_space<vmem>>, vector<256x128xbf16>
    %cst_55 = arith.constant dense<0.000000e+00> : vector<16x128xf32>
    %159 = tpu.matmul %157, %158, %cst_55 {dimension_numbers = #tpu.dot_dimension_numbers<[1], [0], [0], [1], [0, 0, 1, 1], [], []>} : vector<16x256xbf16>, vector<256x128xbf16>, vector<16x128xf32> -> vector<16x128xf32>
    %c0_56 = arith.constant 0 : index
    %c0_57 = arith.constant 0 : index
    %160 = vector.load %arg13[%c0_56, %c0_57] : memref<1x128xf32, #tpu.memory_space<vmem>>, vector<1x128xf32>
    %161 = vector.broadcast %160 : vector<1x128xf32> to vector<16x128xf32>
    %162 = arith.addf %159, %161 : vector<16x128xf32>
    %163 = arith.addf %162, %118 : vector<16x128xf32>
    %c0_58 = arith.constant 0 : index
    %c0_59 = arith.constant 0 : index
    %c0_60 = arith.constant 0 : index
    %164 = vector.load %arg14[%c0_58, %c0_59, %c0_60] : memref<1x16x128xf32, #tpu.memory_space<vmem>>, vector<1x16x128xf32>
    %165 = vector.shape_cast %164 : vector<1x16x128xf32> to vector<16x128xf32>
    %166 = vector.shape_cast %163 : vector<16x128xf32> to vector<1x16x128xf32>
    tpu.vector_store %arg14[%c0_58, %c0_59, %c0_60], %166 {strides = array<i32>} : memref<1x16x128xf32, #tpu.memory_space<vmem>>, vector<1x16x128xf32>,
    return
  }
  func.func @transform_0(%arg0: i32) -> (i32, i32, i32) {
    %c0_i32 = arith.constant 0 : i32
    %c0_i32_0 = arith.constant 0 : i32
    %c0_i32_1 = arith.constant 0 : i32
    return %arg0, %c0_i32, %c0_i32_0 : i32, i32, i32
  }
  func.func @transform_1(%arg0: i32) -> (i32, i32) {
    %c0_i32 = arith.constant 0 : i32
    %c0_i32_0 = arith.constant 0 : i32
    %c0_i32_1 = arith.constant 0 : i32
    return %c0_i32, %c0_i32_0 : i32, i32
  }
  func.func @transform_2(%arg0: i32) -> (i32, i32) {
    %c0_i32 = arith.constant 0 : i32
    %c0_i32_0 = arith.constant 0 : i32
    %c0_i32_1 = arith.constant 0 : i32
    return %c0_i32, %c0_i32_0 : i32, i32
  }
  func.func @transform_3(%arg0: i32) -> (i32, i32) {
    %c0_i32 = arith.constant 0 : i32
    %c0_i32_0 = arith.constant 0 : i32
    %c0_i32_1 = arith.constant 0 : i32
    return %c0_i32, %c0_i32_0 : i32, i32
  }
  func.func @transform_4(%arg0: i32) -> (i32, i32) {
    %c0_i32 = arith.constant 0 : i32
    %c0_i32_0 = arith.constant 0 : i32
    %c0_i32_1 = arith.constant 0 : i32
    return %c0_i32, %c0_i32_0 : i32, i32
  }
  func.func @transform_5(%arg0: i32) -> (i32, i32) {
    %c0_i32 = arith.constant 0 : i32
    %c0_i32_0 = arith.constant 0 : i32
    %c0_i32_1 = arith.constant 0 : i32
    return %c0_i32, %c0_i32_0 : i32, i32
  }
  func.func @transform_6(%arg0: i32) -> (i32, i32) {
    %c0_i32 = arith.constant 0 : i32
    %c0_i32_0 = arith.constant 0 : i32
    %c0_i32_1 = arith.constant 0 : i32
    return %c0_i32, %c0_i32_0 : i32, i32
  }
  func.func @transform_7(%arg0: i32) -> (i32, i32) {
    %c0_i32 = arith.constant 0 : i32
    %c0_i32_0 = arith.constant 0 : i32
    %c0_i32_1 = arith.constant 0 : i32
    return %c0_i32, %c0_i32_0 : i32, i32
  }
  func.func @transform_8(%arg0: i32) -> (i32, i32) {
    %c0_i32 = arith.constant 0 : i32
    %c0_i32_0 = arith.constant 0 : i32
    %c0_i32_1 = arith.constant 0 : i32
    return %c0_i32, %c0_i32_0 : i32, i32
  }
  func.func @transform_9(%arg0: i32) -> (i32, i32) {
    %c0_i32 = arith.constant 0 : i32
    %c0_i32_0 = arith.constant 0 : i32
    %c0_i32_1 = arith.constant 0 : i32
    return %c0_i32, %c0_i32_0 : i32, i32
  }
  func.func @transform_10(%arg0: i32) -> (i32, i32) {
    %c0_i32 = arith.constant 0 : i32
    %c0_i32_0 = arith.constant 0 : i32
    %c0_i32_1 = arith.constant 0 : i32
    return %c0_i32, %c0_i32_0 : i32, i32
  }
  func.func @transform_11(%arg0: i32) -> (i32, i32) {
    %c0_i32 = arith.constant 0 : i32
    %c0_i32_0 = arith.constant 0 : i32
    %c0_i32_1 = arith.constant 0 : i32
    return %c0_i32, %c0_i32_0 : i32, i32
  }
  func.func @transform_12(%arg0: i32) -> (i32, i32) {
    %c0_i32 = arith.constant 0 : i32
    %c0_i32_0 = arith.constant 0 : i32
    %c0_i32_1 = arith.constant 0 : i32
    return %c0_i32, %c0_i32_0 : i32, i32
  }
  func.func @transform_13(%arg0: i32) -> (i32, i32, i32) {
    %c0_i32 = arith.constant 0 : i32
    %c0_i32_0 = arith.constant 0 : i32
    %c0_i32_1 = arith.constant 0 : i32
    return %arg0, %c0_i32, %c0_i32_0 : i32, i32, i32
  }
}

module attributes {stable_mosaic.version = 11 : i64} {
  func.func @encoder_block_kernel(%arg0: i32, %arg1: memref<1x16x128xf32, #tpu.memory_space<vmem>>, %arg2: memref<1x128xf32, #tpu.memory_space<vmem>>, %arg3: memref<1x128xf32, #tpu.memory_space<vmem>>, %arg4: memref<128x384xbf16, #tpu.memory_space<vmem>>, %arg5: memref<1x384xf32, #tpu.memory_space<vmem>>, %arg6: memref<128x128xbf16, #tpu.memory_space<vmem>>, %arg7: memref<1x128xf32, #tpu.memory_space<vmem>>, %arg8: memref<1x128xf32, #tpu.memory_space<vmem>>, %arg9: memref<1x128xf32, #tpu.memory_space<vmem>>, %arg10: memref<128x256xbf16, #tpu.memory_space<vmem>>, %arg11: memref<1x256xf32, #tpu.memory_space<vmem>>, %arg12: memref<256x128xbf16, #tpu.memory_space<vmem>>, %arg13: memref<1x128xf32, #tpu.memory_space<vmem>>, %arg14: memref<1x16x128xf32, #tpu.memory_space<vmem>>) attributes {dimension_semantics = [#tpu.dimension_semantics<parallel>], iteration_bounds = array<i64: 2>, scalar_prefetch = 0 : i64, scratch_operands = 0 : i64, tpu.core_type = #tpu.core_type<tc>, window_params = [{transform_indices = @transform_0, window_bounds = array<i64: 1, 16, 128>}, {pipeline_mode = #tpu.pipeline_mode<synchronous>, transform_indices = @transform_1, window_bounds = array<i64: 1, 128>}, {pipeline_mode = #tpu.pipeline_mode<synchronous>, transform_indices = @transform_2, window_bounds = array<i64: 1, 128>}, {pipeline_mode = #tpu.pipeline_mode<synchronous>, transform_indices = @transform_3, window_bounds = array<i64: 128, 384>}, {pipeline_mode = #tpu.pipeline_mode<synchronous>, transform_indices = @transform_4, window_bounds = array<i64: 1, 384>}, {pipeline_mode = #tpu.pipeline_mode<synchronous>, transform_indices = @transform_5, window_bounds = array<i64: 128, 128>}, {pipeline_mode = #tpu.pipeline_mode<synchronous>, transform_indices = @transform_6, window_bounds = array<i64: 1, 128>}, {pipeline_mode = #tpu.pipeline_mode<synchronous>, transform_indices = @transform_7, window_bounds = array<i64: 1, 128>}, {pipeline_mode = #tpu.pipeline_mode<synchronous>, transform_indices = @transform_8, window_bounds = array<i64: 1, 128>}, {pipeline_mode = #tpu.pipeline_mode<synchronous>, transform_indices = @transform_9, window_bounds = array<i64: 128, 256>}, {pipeline_mode = #tpu.pipeline_mode<synchronous>, transform_indices = @transform_10, window_bounds = array<i64: 1, 256>}, {pipeline_mode = #tpu.pipeline_mode<synchronous>, transform_indices = @transform_11, window_bounds = array<i64: 256, 128>}, {pipeline_mode = #tpu.pipeline_mode<synchronous>, transform_indices = @transform_12, window_bounds = array<i64: 1, 128>}, {transform_indices = @transform_13, window_bounds = array<i64: 1, 16, 128>}]} {
    %c0 = arith.constant 0 : index
    %c0_0 = arith.constant 0 : index
    %c0_1 = arith.constant 0 : index
    %0 = vector.load %arg1[%c0, %c0_0, %c0_1] : memref<1x16x128xf32, #tpu.memory_space<vmem>>, vector<1x16x128xf32>
    %1 = vector.shape_cast %0 : vector<1x16x128xf32> to vector<16x128xf32>
    %c0_2 = arith.constant 0 : index
    %c0_3 = arith.constant 0 : index
    %2 = vector.load %arg2[%c0_2, %c0_3] : memref<1x128xf32, #tpu.memory_space<vmem>>, vector<1x128xf32>
    %c0_4 = arith.constant 0 : index
    %c0_5 = arith.constant 0 : index
    %3 = vector.load %arg3[%c0_4, %c0_5] : memref<1x128xf32, #tpu.memory_space<vmem>>, vector<1x128xf32>
    %cst = arith.constant dense<0.000000e+00> : vector<16xf32>
    %4 = vector.multi_reduction <add>, %1, %cst [1] : vector<16x128xf32> to vector<16xf32>
    %5 = vector.shape_cast %4 : vector<16xf32> to vector<16x1xf32>
    %cst_6 = arith.constant 1.280000e+02 : f32
    %6 = vector.broadcast %cst_6 : f32 to vector<16x1xf32>
    %7 = arith.divf %5, %6 : vector<16x1xf32>
    %8 = vector.broadcast %7 : vector<16x1xf32> to vector<16x128xf32>
    %9 = arith.subf %1, %8 : vector<16x128xf32>
    %10 = arith.mulf %9, %9 : vector<16x128xf32>
    %cst_7 = arith.constant dense<0.000000e+00> : vector<16xf32>
    %11 = vector.multi_reduction <add>, %10, %cst_7 [1] : vector<16x128xf32> to vector<16xf32>
    %12 = vector.shape_cast %11 : vector<16xf32> to vector<16x1xf32>
    %cst_8 = arith.constant 1.280000e+02 : f32
    %13 = vector.broadcast %cst_8 : f32 to vector<16x1xf32>
    %14 = arith.divf %12, %13 : vector<16x1xf32>
    %15 = vector.broadcast %7 : vector<16x1xf32> to vector<16x128xf32>
    %16 = arith.subf %1, %15 : vector<16x128xf32>
    %cst_9 = arith.constant 9.99999974E-6 : f32
    %17 = vector.broadcast %cst_9 : f32 to vector<16x1xf32>
    %18 = arith.addf %14, %17 : vector<16x1xf32>
    %19 = math.rsqrt %18 : vector<16x1xf32>
    %20 = vector.broadcast %19 : vector<16x1xf32> to vector<16x128xf32>
    %21 = arith.mulf %16, %20 : vector<16x128xf32>
    %22 = vector.broadcast %2 : vector<1x128xf32> to vector<16x128xf32>
    %23 = arith.mulf %21, %22 : vector<16x128xf32>
    %24 = vector.broadcast %3 : vector<1x128xf32> to vector<16x128xf32>
    %25 = arith.addf %23, %24 : vector<16x128xf32>
    %26 = arith.truncf %25 : vector<16x128xf32> to vector<16x128xbf16>
    %c0_10 = arith.constant 0 : index
    %c0_11 = arith.constant 0 : index
    %27 = vector.load %arg4[%c0_10, %c0_11] : memref<128x384xbf16, #tpu.memory_space<vmem>>, vector<128x384xbf16>
    %cst_12 = arith.constant dense<0.000000e+00> : vector<16x384xf32>
    %28 = tpu.matmul %26, %27, %cst_12 {dimension_numbers = #tpu.dot_dimension_numbers<[1], [0], [0], [1], [0, 0, 1, 1], [], []>} : vector<16x128xbf16>, vector<128x384xbf16>, vector<16x384xf32> -> vector<16x384xf32>
    %c0_13 = arith.constant 0 : index
    %c0_14 = arith.constant 0 : index
    %29 = vector.load %arg5[%c0_13, %c0_14] : memref<1x384xf32, #tpu.memory_space<vmem>>, vector<1x384xf32>
    %30 = vector.broadcast %29 : vector<1x384xf32> to vector<16x384xf32>
    %31 = arith.addf %28, %30 : vector<16x384xf32>
    %32 = vector.extract_strided_slice %31 {offsets = [0, 0], sizes = [16, 128], strides = [1, 1]} : vector<16x384xf32> to vector<16x128xf32>
    %33 = vector.extract_strided_slice %31 {offsets = [0, 128], sizes = [16, 128], strides = [1, 1]} : vector<16x384xf32> to vector<16x128xf32>
    %34 = vector.extract_strided_slice %31 {offsets = [0, 256], sizes = [16, 128], strides = [1, 1]} : vector<16x384xf32> to vector<16x128xf32>
    %35 = vector.extract_strided_slice %32 {offsets = [0, 0], sizes = [16, 32], strides = [1, 1]} : vector<16x128xf32> to vector<16x32xf32>
    %36 = arith.truncf %35 : vector<16x32xf32> to vector<16x32xbf16>
    %37 = vector.extract_strided_slice %33 {offsets = [0, 0], sizes = [16, 32], strides = [1, 1]} : vector<16x128xf32> to vector<16x32xf32>
    %38 = arith.truncf %37 : vector<16x32xf32> to vector<16x32xbf16>
    %39 = vector.extract_strided_slice %34 {offsets = [0, 0], sizes = [16, 32], strides = [1, 1]} : vector<16x128xf32> to vector<16x32xf32>
    %40 = arith.truncf %39 : vector<16x32xf32> to vector<16x32xbf16>
    %cst_15 = arith.constant dense<0.000000e+00> : vector<16x16xf32>
    %41 = tpu.matmul %36, %38, %cst_15 {dimension_numbers = #tpu.dot_dimension_numbers<[1], [1], [0], [0], [0, 0, 1, 0], [], []>} : vector<16x32xbf16>, vector<16x32xbf16>, vector<16x16xf32> -> vector<16x16xf32>
    %cst_16 = arith.constant dense<0xFF800000> : vector<16xf32>
    %42 = vector.multi_reduction <maximumf>, %41, %cst_16 [1] : vector<16x16xf32> to vector<16xf32>
    %43 = vector.shape_cast %42 : vector<16xf32> to vector<16x1xf32>
    %44 = vector.broadcast %43 : vector<16x1xf32> to vector<16x16xf32>
    %45 = arith.subf %41, %44 : vector<16x16xf32>
    %46 = math.exp %45 : vector<16x16xf32>
    %cst_17 = arith.constant dense<0.000000e+00> : vector<16xf32>
    %47 = vector.multi_reduction <add>, %46, %cst_17 [1] : vector<16x16xf32> to vector<16xf32>
    %48 = vector.shape_cast %47 : vector<16xf32> to vector<16x1xf32>
    %49 = tpu.reciprocal %48 {approx = true} : vector<16x1xf32> -> vector<16x1xf32>
    %50 = vector.broadcast %49 : vector<16x1xf32> to vector<16x16xf32>
    %51 = arith.mulf %46, %50 : vector<16x16xf32>
    %52 = arith.truncf %51 : vector<16x16xf32> to vector<16x16xbf16>
    %cst_18 = arith.constant dense<0.000000e+00> : vector<16x32xf32>
    %53 = tpu.matmul %52, %40, %cst_18 {dimension_numbers = #tpu.dot_dimension_numbers<[1], [0], [0], [1], [0, 0, 1, 1], [], []>} : vector<16x16xbf16>, vector<16x32xbf16>, vector<16x32xf32> -> vector<16x32xf32>
    %54 = vector.extract_strided_slice %32 {offsets = [0, 32], sizes = [16, 32], strides = [1, 1]} : vector<16x128xf32> to vector<16x32xf32>
    %55 = arith.truncf %54 : vector<16x32xf32> to vector<16x32xbf16>
    %56 = vector.extract_strided_slice %33 {offsets = [0, 32], sizes = [16, 32], strides = [1, 1]} : vector<16x128xf32> to vector<16x32xf32>
    %57 = arith.truncf %56 : vector<16x32xf32> to vector<16x32xbf16>
    %58 = vector.extract_strided_slice %34 {offsets = [0, 32], sizes = [16, 32], strides = [1, 1]} : vector<16x128xf32> to vector<16x32xf32>
    %59 = arith.truncf %58 : vector<16x32xf32> to vector<16x32xbf16>
    %cst_19 = arith.constant dense<0.000000e+00> : vector<16x16xf32>
    %60 = tpu.matmul %55, %57, %cst_19 {dimension_numbers = #tpu.dot_dimension_numbers<[1], [1], [0], [0], [0, 0, 1, 0], [], []>} : vector<16x32xbf16>, vector<16x32xbf16>, vector<16x16xf32> -> vector<16x16xf32>
    %cst_20 = arith.constant dense<0xFF800000> : vector<16xf32>
    %61 = vector.multi_reduction <maximumf>, %60, %cst_20 [1] : vector<16x16xf32> to vector<16xf32>
    %62 = vector.shape_cast %61 : vector<16xf32> to vector<16x1xf32>
    %63 = vector.broadcast %62 : vector<16x1xf32> to vector<16x16xf32>
    %64 = arith.subf %60, %63 : vector<16x16xf32>
    %65 = math.exp %64 : vector<16x16xf32>
    %cst_21 = arith.constant dense<0.000000e+00> : vector<16xf32>
    %66 = vector.multi_reduction <add>, %65, %cst_21 [1] : vector<16x16xf32> to vector<16xf32>
    %67 = vector.shape_cast %66 : vector<16xf32> to vector<16x1xf32>
    %68 = tpu.reciprocal %67 {approx = true} : vector<16x1xf32> -> vector<16x1xf32>
    %69 = vector.broadcast %68 : vector<16x1xf32> to vector<16x16xf32>
    %70 = arith.mulf %65, %69 : vector<16x16xf32>
    %71 = arith.truncf %70 : vector<16x16xf32> to vector<16x16xbf16>
    %cst_22 = arith.constant dense<0.000000e+00> : vector<16x32xf32>
    %72 = tpu.matmul %71, %59, %cst_22 {dimension_numbers = #tpu.dot_dimension_numbers<[1], [0], [0], [1], [0, 0, 1, 1], [], []>} : vector<16x16xbf16>, vector<16x32xbf16>, vector<16x32xf32> -> vector<16x32xf32>
    %73 = vector.extract_strided_slice %32 {offsets = [0, 64], sizes = [16, 32], strides = [1, 1]} : vector<16x128xf32> to vector<16x32xf32>
    %74 = arith.truncf %73 : vector<16x32xf32> to vector<16x32xbf16>
    %75 = vector.extract_strided_slice %33 {offsets = [0, 64], sizes = [16, 32], strides = [1, 1]} : vector<16x128xf32> to vector<16x32xf32>
    %76 = arith.truncf %75 : vector<16x32xf32> to vector<16x32xbf16>
    %77 = vector.extract_strided_slice %34 {offsets = [0, 64], sizes = [16, 32], strides = [1, 1]} : vector<16x128xf32> to vector<16x32xf32>
    %78 = arith.truncf %77 : vector<16x32xf32> to vector<16x32xbf16>
    %cst_23 = arith.constant dense<0.000000e+00> : vector<16x16xf32>
    %79 = tpu.matmul %74, %76, %cst_23 {dimension_numbers = #tpu.dot_dimension_numbers<[1], [1], [0], [0], [0, 0, 1, 0], [], []>} : vector<16x32xbf16>, vector<16x32xbf16>, vector<16x16xf32> -> vector<16x16xf32>
    %cst_24 = arith.constant dense<0xFF800000> : vector<16xf32>
    %80 = vector.multi_reduction <maximumf>, %79, %cst_24 [1] : vector<16x16xf32> to vector<16xf32>
    %81 = vector.shape_cast %80 : vector<16xf32> to vector<16x1xf32>
    %82 = vector.broadcast %81 : vector<16x1xf32> to vector<16x16xf32>
    %83 = arith.subf %79, %82 : vector<16x16xf32>
    %84 = math.exp %83 : vector<16x16xf32>
    %cst_25 = arith.constant dense<0.000000e+00> : vector<16xf32>
    %85 = vector.multi_reduction <add>, %84, %cst_25 [1] : vector<16x16xf32> to vector<16xf32>
    %86 = vector.shape_cast %85 : vector<16xf32> to vector<16x1xf32>
    %87 = tpu.reciprocal %86 {approx = true} : vector<16x1xf32> -> vector<16x1xf32>
    %88 = vector.broadcast %87 : vector<16x1xf32> to vector<16x16xf32>
    %89 = arith.mulf %84, %88 : vector<16x16xf32>
    %90 = arith.truncf %89 : vector<16x16xf32> to vector<16x16xbf16>
    %cst_26 = arith.constant dense<0.000000e+00> : vector<16x32xf32>
    %91 = tpu.matmul %90, %78, %cst_26 {dimension_numbers = #tpu.dot_dimension_numbers<[1], [0], [0], [1], [0, 0, 1, 1], [], []>} : vector<16x16xbf16>, vector<16x32xbf16>, vector<16x32xf32> -> vector<16x32xf32>
    %92 = vector.extract_strided_slice %32 {offsets = [0, 96], sizes = [16, 32], strides = [1, 1]} : vector<16x128xf32> to vector<16x32xf32>
    %93 = arith.truncf %92 : vector<16x32xf32> to vector<16x32xbf16>
    %94 = vector.extract_strided_slice %33 {offsets = [0, 96], sizes = [16, 32], strides = [1, 1]} : vector<16x128xf32> to vector<16x32xf32>
    %95 = arith.truncf %94 : vector<16x32xf32> to vector<16x32xbf16>
    %96 = vector.extract_strided_slice %34 {offsets = [0, 96], sizes = [16, 32], strides = [1, 1]} : vector<16x128xf32> to vector<16x32xf32>
    %97 = arith.truncf %96 : vector<16x32xf32> to vector<16x32xbf16>
    %cst_27 = arith.constant dense<0.000000e+00> : vector<16x16xf32>
    %98 = tpu.matmul %93, %95, %cst_27 {dimension_numbers = #tpu.dot_dimension_numbers<[1], [1], [0], [0], [0, 0, 1, 0], [], []>} : vector<16x32xbf16>, vector<16x32xbf16>, vector<16x16xf32> -> vector<16x16xf32>
    %cst_28 = arith.constant dense<0xFF800000> : vector<16xf32>
    %99 = vector.multi_reduction <maximumf>, %98, %cst_28 [1] : vector<16x16xf32> to vector<16xf32>
    %100 = vector.shape_cast %99 : vector<16xf32> to vector<16x1xf32>
    %101 = vector.broadcast %100 : vector<16x1xf32> to vector<16x16xf32>
    %102 = arith.subf %98, %101 : vector<16x16xf32>
    %103 = math.exp %102 : vector<16x16xf32>
    %cst_29 = arith.constant dense<0.000000e+00> : vector<16xf32>
    %104 = vector.multi_reduction <add>, %103, %cst_29 [1] : vector<16x16xf32> to vector<16xf32>
    %105 = vector.shape_cast %104 : vector<16xf32> to vector<16x1xf32>
    %106 = tpu.reciprocal %105 {approx = true} : vector<16x1xf32> -> vector<16x1xf32>
    %107 = vector.broadcast %106 : vector<16x1xf32> to vector<16x16xf32>
    %108 = arith.mulf %103, %107 : vector<16x16xf32>
    %109 = arith.truncf %108 : vector<16x16xf32> to vector<16x16xbf16>
    %cst_30 = arith.constant dense<0.000000e+00> : vector<16x32xf32>
    %110 = tpu.matmul %109, %97, %cst_30 {dimension_numbers = #tpu.dot_dimension_numbers<[1], [0], [0], [1], [0, 0, 1, 1], [], []>} : vector<16x16xbf16>, vector<16x32xbf16>, vector<16x32xf32> -> vector<16x32xf32>
    %111 = tpu.concatenate %53, %72, %91, %110 in 1 : vector<16x32xf32>, vector<16x32xf32>, vector<16x32xf32>, vector<16x32xf32> -> vector<16x128xf32>
    %112 = arith.truncf %111 : vector<16x128xf32> to vector<16x128xbf16>
    %c0_31 = arith.constant 0 : index
    %c0_32 = arith.constant 0 : index
    %113 = vector.load %arg6[%c0_31, %c0_32] : memref<128x128xbf16, #tpu.memory_space<vmem>>, vector<128x128xbf16>
    %cst_33 = arith.constant dense<0.000000e+00> : vector<16x128xf32>
    %114 = tpu.matmul %112, %113, %cst_33 {dimension_numbers = #tpu.dot_dimension_numbers<[1], [0], [0], [1], [0, 0, 1, 1], [], []>} : vector<16x128xbf16>, vector<128x128xbf16>, vector<16x128xf32> -> vector<16x128xf32>
    %c0_34 = arith.constant 0 : index
    %c0_35 = arith.constant 0 : index
    %115 = vector.load %arg7[%c0_34, %c0_35] : memref<1x128xf32, #tpu.memory_space<vmem>>, vector<1x128xf32>
    %116 = vector.broadcast %115 : vector<1x128xf32> to vector<16x128xf32>
    %117 = arith.addf %114, %116 : vector<16x128xf32>
    %118 = arith.addf %117, %1 : vector<16x128xf32>
    %c0_36 = arith.constant 0 : index
    %c0_37 = arith.constant 0 : index
    %119 = vector.load %arg8[%c0_36, %c0_37] : memref<1x128xf32, #tpu.memory_space<vmem>>, vector<1x128xf32>
    %c0_38 = arith.constant 0 : index
    %c0_39 = arith.constant 0 : index
    %120 = vector.load %arg9[%c0_38, %c0_39] : memref<1x128xf32, #tpu.memory_space<vmem>>, vector<1x128xf32>
    %cst_40 = arith.constant dense<0.000000e+00> : vector<16xf32>
    %121 = vector.multi_reduction <add>, %118, %cst_40 [1] : vector<16x128xf32> to vector<16xf32>
    %122 = vector.shape_cast %121 : vector<16xf32> to vector<16x1xf32>
    %cst_41 = arith.constant 1.280000e+02 : f32
    %123 = vector.broadcast %cst_41 : f32 to vector<16x1xf32>
    %124 = arith.divf %122, %123 : vector<16x1xf32>
    %125 = vector.broadcast %124 : vector<16x1xf32> to vector<16x128xf32>
    %126 = arith.subf %118, %125 : vector<16x128xf32>
    %127 = arith.mulf %126, %126 : vector<16x128xf32>
    %cst_42 = arith.constant dense<0.000000e+00> : vector<16xf32>
    %128 = vector.multi_reduction <add>, %127, %cst_42 [1] : vector<16x128xf32> to vector<16xf32>
    %129 = vector.shape_cast %128 : vector<16xf32> to vector<16x1xf32>
    %cst_43 = arith.constant 1.280000e+02 : f32
    %130 = vector.broadcast %cst_43 : f32 to vector<16x1xf32>
    %131 = arith.divf %129, %130 : vector<16x1xf32>
    %132 = vector.broadcast %124 : vector<16x1xf32> to vector<16x128xf32>
    %133 = arith.subf %118, %132 : vector<16x128xf32>
    %cst_44 = arith.constant 9.99999974E-6 : f32
    %134 = vector.broadcast %cst_44 : f32 to vector<16x1xf32>
    %135 = arith.addf %131, %134 : vector<16x1xf32>
    %136 = math.rsqrt %135 : vector<16x1xf32>
    %137 = vector.broadcast %136 : vector<16x1xf32> to vector<16x128xf32>
    %138 = arith.mulf %133, %137 : vector<16x128xf32>
    %139 = vector.broadcast %119 : vector<1x128xf32> to vector<16x128xf32>
    %140 = arith.mulf %138, %139 : vector<16x128xf32>
    %141 = vector.broadcast %120 : vector<1x128xf32> to vector<16x128xf32>
    %142 = arith.addf %140, %141 : vector<16x128xf32>
    %143 = arith.truncf %142 : vector<16x128xf32> to vector<16x128xbf16>
    %c0_45 = arith.constant 0 : index
    %c0_46 = arith.constant 0 : index
    %144 = vector.load %arg10[%c0_45, %c0_46] : memref<128x256xbf16, #tpu.memory_space<vmem>>, vector<128x256xbf16>
    %cst_47 = arith.constant dense<0.000000e+00> : vector<16x256xf32>
    %145 = tpu.matmul %143, %144, %cst_47 {dimension_numbers = #tpu.dot_dimension_numbers<[1], [0], [0], [1], [0, 0, 1, 1], [], []>} : vector<16x128xbf16>, vector<128x256xbf16>, vector<16x256xf32> -> vector<16x256xf32>
    %c0_48 = arith.constant 0 : index
    %c0_49 = arith.constant 0 : index
    %146 = vector.load %arg11[%c0_48, %c0_49] : memref<1x256xf32, #tpu.memory_space<vmem>>, vector<1x256xf32>
    %147 = vector.broadcast %146 : vector<1x256xf32> to vector<16x256xf32>
    %148 = arith.addf %145, %147 : vector<16x256xf32>
    %cst_50 = arith.constant 5.000000e-01 : f32
    %149 = vector.broadcast %cst_50 : f32 to vector<16x256xf32>
    %150 = arith.mulf %149, %148 : vector<16x256xf32>
    %cst_51 = arith.constant 0.707106769 : f32
    %151 = vector.broadcast %cst_51 : f32 to vector<16x256xf32>
    %152 = arith.mulf %148, %151 : vector<16x256xf32>
    %153 = math.erf %152 : vector<16x256xf32>
    %cst_52 = arith.constant 1.000000e+00 : f32
    %154 = vector.broadcast %cst_52 : f32 to vector<16x256xf32>
    %155 = arith.addf %154, %153 : vector<16x256xf32>
    %156 = arith.mulf %150, %155 : vector<16x256xf32>
    %157 = arith.truncf %156 : vector<16x256xf32> to vector<16x256xbf16>
    %c0_53 = arith.constant 0 : index
    %c0_54 = arith.constant 0 : index
    %158 = vector.load %arg12[%c0_53, %c0_54] : memref<256x128xbf16, #tpu.memory_space<vmem>>, vector<256x128xbf16>
    %cst_55 = arith.constant dense<0.000000e+00> : vector<16x128xf32>
    %159 = tpu.matmul %157, %158, %cst_55 {dimension_numbers = #tpu.dot_dimension_numbers<[1], [0], [0], [1], [0, 0, 1, 1], [], []>} : vector<16x256xbf16>, vector<256x128xbf16>, vector<16x128xf32> -> vector<16x128xf32>
    %c0_56 = arith.constant 0 : index
    %c0_57 = arith.constant 0 : index
    %160 = vector.load %arg13[%c0_56, %c0_57] : memref<1x128xf32, #tpu.memory_space<vmem>>, vector<1x128xf32>
    %161 = vector.broadcast %160 : vector<1x128xf32> to vector<16x128xf32>
    %162 = arith.addf %159, %161 : vector<16x128xf32>
    %163 = arith.addf %162, %118 : vector<16x128xf32>
    %c0_58 = arith.constant 0 : index
    %c0_59 = arith.constant 0 : index
    %c0_60 = arith.constant 0 : index
    %164 = vector.load %arg14[%c0_58, %c0_59, %c0_60] : memref<1x16x128xf32, #tpu.memory_space<vmem>>, vector<1x16x128xf32>
    %165 = vector.shape_cast %164 : vector<1x16x128xf32> to vector<16x128xf32>
    %166 = vector.shape_cast %163 : vector<16x128xf32> to vector<1x16x128xf32>
    tpu.vector_store %arg14[%c0_58, %c0_59, %c0_60], %166 {strides = array<i32>} : memref<1x16x128xf32, #tpu.memory_space<vmem>>, vector<1x16x128xf32>,
    return
  }
  func.func @transform_0(%arg0: i32) -> (i32, i32, i32) {
    %c0_i32 = arith.constant 0 : i32
    %c0_i32_0 = arith.constant 0 : i32
    %c0_i32_1 = arith.constant 0 : i32
    return %arg0, %c0_i32, %c0_i32_0 : i32, i32, i32
  }
  func.func @transform_1(%arg0: i32) -> (i32, i32) {
    %c0_i32 = arith.constant 0 : i32
    %c0_i32_0 = arith.constant 0 : i32
    %c0_i32_1 = arith.constant 0 : i32
    return %c0_i32, %c0_i32_0 : i32, i32
  }
  func.func @transform_2(%arg0: i32) -> (i32, i32) {
    %c0_i32 = arith.constant 0 : i32
    %c0_i32_0 = arith.constant 0 : i32
    %c0_i32_1 = arith.constant 0 : i32
    return %c0_i32, %c0_i32_0 : i32, i32
  }
  func.func @transform_3(%arg0: i32) -> (i32, i32) {
    %c0_i32 = arith.constant 0 : i32
    %c0_i32_0 = arith.constant 0 : i32
    %c0_i32_1 = arith.constant 0 : i32
    return %c0_i32, %c0_i32_0 : i32, i32
  }
  func.func @transform_4(%arg0: i32) -> (i32, i32) {
    %c0_i32 = arith.constant 0 : i32
    %c0_i32_0 = arith.constant 0 : i32
    %c0_i32_1 = arith.constant 0 : i32
    return %c0_i32, %c0_i32_0 : i32, i32
  }
  func.func @transform_5(%arg0: i32) -> (i32, i32) {
    %c0_i32 = arith.constant 0 : i32
    %c0_i32_0 = arith.constant 0 : i32
    %c0_i32_1 = arith.constant 0 : i32
    return %c0_i32, %c0_i32_0 : i32, i32
  }
  func.func @transform_6(%arg0: i32) -> (i32, i32) {
    %c0_i32 = arith.constant 0 : i32
    %c0_i32_0 = arith.constant 0 : i32
    %c0_i32_1 = arith.constant 0 : i32
    return %c0_i32, %c0_i32_0 : i32, i32
  }
  func.func @transform_7(%arg0: i32) -> (i32, i32) {
    %c0_i32 = arith.constant 0 : i32
    %c0_i32_0 = arith.constant 0 : i32
    %c0_i32_1 = arith.constant 0 : i32
    return %c0_i32, %c0_i32_0 : i32, i32
  }
  func.func @transform_8(%arg0: i32) -> (i32, i32) {
    %c0_i32 = arith.constant 0 : i32
    %c0_i32_0 = arith.constant 0 : i32
    %c0_i32_1 = arith.constant 0 : i32
    return %c0_i32, %c0_i32_0 : i32, i32
  }
  func.func @transform_9(%arg0: i32) -> (i32, i32) {
    %c0_i32 = arith.constant 0 : i32
    %c0_i32_0 = arith.constant 0 : i32
    %c0_i32_1 = arith.constant 0 : i32
    return %c0_i32, %c0_i32_0 : i32, i32
  }
  func.func @transform_10(%arg0: i32) -> (i32, i32) {
    %c0_i32 = arith.constant 0 : i32
    %c0_i32_0 = arith.constant 0 : i32
    %c0_i32_1 = arith.constant 0 : i32
    return %c0_i32, %c0_i32_0 : i32, i32
  }
  func.func @transform_11(%arg0: i32) -> (i32, i32) {
    %c0_i32 = arith.constant 0 : i32
    %c0_i32_0 = arith.constant 0 : i32
    %c0_i32_1 = arith.constant 0 : i32
    return %c0_i32, %c0_i32_0 : i32, i32
  }
  func.func @transform_12(%arg0: i32) -> (i32, i32) {
    %c0_i32 = arith.constant 0 : i32
    %c0_i32_0 = arith.constant 0 : i32
    %c0_i32_1 = arith.constant 0 : i32
    return %c0_i32, %c0_i32_0 : i32, i32
  }
  func.func @transform_13(%arg0: i32) -> (i32, i32, i32) {
    %c0_i32 = arith.constant 0 : i32
    %c0_i32_0 = arith.constant 0 : i32
    %c0_i32_1 = arith.constant 0 : i32
    return %arg0, %c0_i32, %c0_i32_0 : i32, i32, i32
  }
}

</mosaic_0001>

<bundles_post_ra>
// kernel: tpu_custom_call.1
= control target key start
LH: loop header
LB: loop body
LE: loop exit
PB: predicated region body
PF: predicated region fallthrough
CT: control target
= control target key end

     0   :  { %s3317_s0 = inlined_call_operand.hbm [shape: f32[2,16,128], index: 0, kind: input, shape index: {}]   ;;  %s3318_s1 = inlined_call_operand.hbm [shape: f32[1,128], index: 1, kind: input, shape index: {}]   ;;  %s3319_s2 = inlined_call_operand.hbm [shape: f32[1,128], index: 2, kind: input, shape index: {}]   ;;  %s3320_s3 = inlined_call_operand.hbm [shape: bf16[128,384], index: 3, kind: input, shape index: {}]   ;;  %s3321_s4 = inlined_call_operand.vmem [shape: f32[1,384], index: 4, kind: input, shape index: {}]   ;;  %s3322_s5 = inlined_call_operand.hbm [shape: bf16[128,128], index: 5, kind: input, shape index: {}]   ;;  %s3323_s6 = inlined_call_operand.hbm [shape: f32[1,128], index: 6, kind: input, shape index: {}]   ;;  %s3324_s7 = inlined_call_operand.vmem [shape: f32[1,128], index: 7, kind: input, shape index: {}]   ;;  %s3325_s8 = inlined_call_operand.vmem [shape: f32[1,128], index: 8, kind: input, shape index: {}]   ;;  %s3326_s9 = inlined_call_operand.hbm [shape: bf16[128,256], index: 9, kind: input, shape index: {}]   ;;  %s3327_s10 = inlined_call_operand.vmem [shape: f32[1,256], index: 10, kind: input, shape index: {}]   ;;  %s3328_s11 = inlined_call_operand.hbm [shape: bf16[256,128], index: 11, kind: input, shape index: {}]   ;;  %s3329_s12 = inlined_call_operand.vmem [shape: f32[1,128], index: 12, kind: input, shape index: {}]   ;;  %s3330_s13 = inlined_call_operand.hbm [shape: f32[2,16,128], index: 13, kind: output, shape index: {}]  }
   0x1   :  { %3334 = sst [smem:[#allocation23_spill]] %s3318_s1 }
   0x2   :  { %3335 = sst [smem:[#allocation24_spill]] %s3319_s2 }
   0x3   :  { %3336 = sst [smem:[#allocation25_spill]] %s3320_s3 }
   0x4   :  { %3337 = sst [smem:[#allocation26_spill]] %s3322_s5 }
   0x5   :  { %3338 = sst [smem:[#allocation27_spill]] %s3327_s10 }
   0x6   :  { %3339 = sst [smem:[#allocation28_spill]] %s3329_s12 }
   0x7   :  { %3340 = sst [smem:[#allocation29_spill]] %s3330_s13 }
   0x8   :  { %18 = vsyncpa [#allocation3], 0 }
   0x9   :  { %20 = vsyncpa [#allocation3 + $0x1], 0 }
   0xa   :  { %21 = vsyncpa [#allocation6], 0 }
   0xb   :  { %22 = vsyncpa [#allocation9], 0 }
   0xc   :  { %23 = vsyncpa [#allocation12], 0 }
   0xd   :  { %24 = vsyncpa [#allocation15], 0 }
   0xe   :  { %25 = vsyncpa [#allocation4], 0 }
   0xf   :  { %27 = vsyncpa [#allocation4 + $0x1], 0  ;;  %s2886_s25 = smov 0   ;;  %s2888_s26 = smov 0  }
  0x10   :  { %s2890_s27 = smov 0   ;;  %s2892_s28 = smov 0  }
  0x11 LB: > { %s3341_s1 = sld [smem:[#allocation23_spill]]  ;;  %s2910_s15 = sadd.s32 4294967295, %s2795_s28   ;;  %s2795_s28 = sphi %s2892_s28, %s3362_s28   ;;  %s2791_s27 = sphi %s2890_s27, %s3361_s27   ;;  %s2787_s26 = sphi %s2888_s26, %s3360_s26   ;;  %s2783_s25 = sphi %s2886_s25, %s3359_s25  }
  0x12   : > { %p1912_p0 = scmp.ge.s32.totalorder %s2795_s28, 1  ;;  %p54_p1 = scmp.eq.s32.totalorder %s2910_s15, 0 }
  0x13   : > { %p342_p2 = scmp.lt.s32.totalorder %s2795_s28, 3  ;;  %s2797_s17 = smov [#allocation5]  }
  0x14   : > { %s356_s18 = sshll.u32 %s2797_s17, 4  ;;  %s3343_s3 = sld [smem:[#allocation25_spill]]  ;;  %s357_s18 = int_to_ptr.vmem [resolvable:$true] %s356_s18 }
  0x15   : > { %p2915_p3 = pnand %p1912_p0, %p342_p2  ;;  %s2798_s23 = smov [#allocation8]  }
  0x16   : > { %s379_s24 = sshll.u32 %s2798_s23, 4  ;;  %s2799_s29 = smov 192   ;;  %s380_s24 = int_to_ptr.vmem [resolvable:$true] %s379_s24 }
  0x17   : > { %s354_s14 = sshll.u32 %s3341_s1, 4  ;;  %p2305_p5 = pneg %p2915_p3  ;;  %s355_s14 = int_to_ptr.hbm [resolvable:$true] %s354_s14 }
  0x18   : > { %s2800_s30 = smov 12   ;;  %s409_s20 = sshll.u32 %s3323_s6, 4  ;;  %s410_s20 = int_to_ptr.hbm [resolvable:$true] %s409_s20 }
  0x19   : > { %p2927_p6 = pnand %p2305_p5, %p54_p1  ;;  %s2801_s1 = smov [#allocation11]  }
  0x1a   : > { %s377_s21 = sshll.u32 %s3343_s3, 4  ;;  %s411_s3 = sshll.u32 %s2801_s1, 4  ;;  %s378_s21 = int_to_ptr.hbm [resolvable:$true] %s377_s21  ;;  %s412_s3 = int_to_ptr.vmem [resolvable:$true] %s411_s3 }
  0x1b   : > { %2308 = dma.hbm_to_vmem [thread:$0]  (!%p2927_p6), %s355_s14, 16, %s357_s18, [#allocation6]  }
  0x1c   : > { %2314 = dma.hbm_to_vmem [thread:$0]  (!%p2927_p6), %s378_s21, 3072, %s380_s24, [#allocation9], %s2799_s29, %s2799_s29, %s2800_s30  }
  0x1d   : > { %s3345_s2 = sld [smem:[#allocation24_spill]]  ;;  %s2802_s14 = smov [#allocation7]  }
  0x1e   : > { %2320 = dma.hbm_to_vmem [thread:$0]  (!%p2927_p6), %s410_s20, 16, %s412_s3, [#allocation12]  }
  0x1f   : > { %s368_s18 = sshll.u32 %s2802_s14, 4  ;;  %s3346_s5 = sld [smem:[#allocation26_spill]]  ;;  %s369_s18 = int_to_ptr.vmem [resolvable:$true] %s368_s18 }
  0x20   : > { %s2803_s1 = smov [#allocation10]   ;;  %s426_s30 = sshll.u32 %s3326_s9, 4  ;;  %s427_s30 = int_to_ptr.hbm [resolvable:$true] %s426_s30 }
  0x21   : > { %s396_s29 = sshll.u32 %s2803_s1, 4  ;;  %s2804_s3 = smov 64   ;;  %s397_s29 = int_to_ptr.vmem [resolvable:$true] %s396_s29 }
  0x22   : > { %s2805_s17 = smov 4   ;;  %s2806_s10 = smov [#allocation13]  }
  0x23   : > { %s366_s23 = sshll.u32 %s3345_s2, 4  ;;  %s428_s19 = sshll.u32 %s2806_s10, 4  ;;  %s367_s23 = int_to_ptr.hbm [resolvable:$true] %s366_s23  ;;  %s429_s19 = int_to_ptr.vmem [resolvable:$true] %s428_s19 }
  0x24   : > { %2311 = dma.hbm_to_vmem [thread:$0]  (!%p2927_p6), %s367_s23, 16, %s369_s18, [#allocation6]  }
  0x25   : > { %s394_s24 = sshll.u32 %s3346_s5, 4  ;;  %s3332_s20 = smov 128   ;;  %s395_s24 = int_to_ptr.hbm [resolvable:$true] %s394_s24 }
  0x26   : > { %2317 = dma.hbm_to_vmem [thread:$0]  (!%p2927_p6), %s395_s24, 1024, %s397_s29, [#allocation9], %s2804_s3, %s2804_s3, %s2805_s17  }
  0x27   : > { %s3333_s23 = smov 8   ;;  %s443_s21 = sshll.u32 %s3328_s11, 4  ;;  %s444_s21 = int_to_ptr.hbm [resolvable:$true] %s443_s21 }
  0x28   : > { %2323 = dma.hbm_to_vmem [thread:$0]  (!%p2927_p6), %s427_s30, 2048, %s429_s19, [#allocation12], %s3332_s20, %s3332_s20, %s3333_s23  }
  0x29   : > { %s2809_s24 = smov [#allocation14]   ;;  %s1911_s29 = sadd.s32 4294967294, %s2795_s28  }
  0x2a   : > { %s445_s1 = sshll.u32 %s2809_s24, 4  ;;  %s2965_s12 = sadd.s32 1, %s2795_s28   ;;  %s446_s1 = int_to_ptr.vmem [resolvable:$true] %s445_s1 }
  0x2b   : > { %2326 = dma.hbm_to_vmem [thread:$0]  (!%p2927_p6), %s444_s21, 2048, %s446_s1, [#allocation15], %s2804_s3, %s2804_s3, %s2805_s17  }
  0x2c   : > { %s40_s13 = sadd.s32 1, %s2791_s27  ;;  %s37_s30 = ssub.s32 %s2795_s28, %s2965_s12 }
  0x2d   : > { %p47_p7 = scmp.ne.s32.totalorder %s2791_s27, %s2787_s26  ;;  %p38_p8 = scmp.eq.s32.totalorder %s37_s30, 0 }
  0x2e   : > { %p48_p9 = scmp.eq.s32.totalorder %s2795_s28, 0  ;;  %p53_p10 = scmp.ne.s32.totalorder %s2787_s26, %s2783_s25 }
  0x2f   : > { %p329_p11 = scmp.eq.s32.totalorder %s2910_s15, 1  ;;  %p335_p0 = scmp.eq.s32.totalorder %s1911_s29, 1 }
  0x30   : > { %s2977_s10 = scalar_select %p38_p8, %s2791_s27, %s40_s13  }
  0x31   : > { %p2981_p12 = por %p54_p1, %p53_p10  ;;  %p2985_p13 = por %p329_p11, %p47_p7 }
  0x32   : > { %p49_p2 = por %p48_p9, %p47_p7  ;;  %s462_s17 = sand.u32 1, %s2791_s27  }
  0x33   : > { %p2990_p5 = por %p335_p0, %p53_p10  ;;  %p2342_p6 = scmp.lt.s32.totalorder %s2795_s28, 2 }
  0x34   : > { %s1921_s14 = sshll.u32 %s462_s17, 4  ;;  %s2207_s18 = sshll.u32 %s2795_s28, 4 }
  0x35   : > { %s471_s1 = scalar_lea.hbm %s3317_s0, %s2207_s18  ;;  %s466_s30 = scalar_lea.vmem [#allocation2], %s1921_s14 }
  0x36   : > { %s472_s13 = sshll.u32 %s471_s1, 4  ;;  %s474_s20 = sshll.u32 %s466_s30, 4  ;;  %s473_s13 = int_to_ptr.hbm [resolvable:$true] %s472_s13  ;;  %s475_s20 = int_to_ptr.vmem [resolvable:$true] %s474_s20 }
  0x37   : > { %p2999_p8 = pnand %p2342_p6, %p49_p2  ;;  %s463_s23 = scalar_lea.sflag [#allocation3], %s462_s17 }
  0x38   : > { %s2683_s2 = sshra.s32 %s473_s13, 4  ;;  %s2690_s14 = scalar_lea.hbm %s3317_s0, 32  ;;  %s2684_s2 = int_to_ptr.hbm [resolvable:$true] %s2683_s2 }
  0x39   : > { %s2685_s5 = scalar_lea.hbm %s2684_s2, 16  ;;  %p2687_p9 = pneg %p2999_p8 }
  0x3a   : > { %p2686_p7 = scmp.ne.s32.totalorder %s2684_s2, %s2685_s5  ;;  %p2691_p0 = scmp.lt.s32.totalorder %s2684_s2, %s3317_s0 }
  0x3b   : > { %p2692_p2 = scmp.lt.s32.totalorder %s2690_s14, %s2685_s5 }
  0x3c   : > { %p2688_p10 = pnand %p2687_p9, %p2686_p7 }
  0x3d   : > { %p2693_p6 = por %p2692_p2, %p2691_p0 }
  0x3e   : > { %p2689_p11 = pneg %p2688_p10 }
  0x40   : > { %p2694_p4 = pnand %p2693_p6, %p2689_p11 }
  0x42   : > { %2697 = shalt.err (!%p2694_p4)
}
  0x43   : > { %s3351_s17 = smov 8   ;;  %s3352_s30 = smov 128  }
  0x44   : > { %2330 = dma.hbm_to_vmem [thread:$0]  (!%p2999_p8), %s473_s13, 256, %s475_s20, %s463_s23, %s3352_s30, %s3352_s30, %s3351_s17  }
  0x45   : > { %486 = sbr.rel (%p2915_p3) target bundleno = 2343 (0x927), region = 72  ;;  %s3019_s18 = sand.u32 (!%p2915_p3), 1, %s2787_s26  }
  0x46   : > { %s1925_s2 = sshll.u32 (!%p2915_p3), %s3019_s18, 4  ;;  %s489_s5 = scalar_lea.sflag (!%p2915_p3), [#allocation3], %s3019_s18 }
  0x47   : > { %s492_s21 = scalar_lea.vmem (!%p2915_p3), [#allocation2], %s1925_s2 }
  0x4a   : > { %2758 = dma.done.wait (%p2981_p12), %s489_s5, 256  }
  0x4b   : > { %2760 = vsyncadd (%p2981_p12), %s489_s5, 4294967040 }
  0x4c   : > { %2762 = dma.done.wait (%p54_p1), [#allocation6], 32  }
  0x4d   : > { %2764 = vsyncadd (%p54_p1), [#allocation6], 4294967264 }
  0x4e   : > { %2766 = dma.done.wait (%p54_p1), [#allocation9], 4096  }
  0x4f   : > { %2768 = vsyncadd (%p54_p1), [#allocation9], 4294963200 }
  0x50   : > { %2770 = dma.done.wait (%p54_p1), [#allocation12], 2064  }
  0x51   : > { %2772 = vsyncadd (%p54_p1), [#allocation12], 4294965232 }
  0x52   : > { %2774 = dma.done.wait (%p54_p1), [#allocation15], 2048  }
  0x53   : > { %2776 = vsyncadd (%p54_p1), [#allocation15], 4294965248  ;;  %v3045_v0 = vld [vmem:[%s492_s21] sm:$0xff]  ;;  %v3048_v1 = vld [vmem:[%s492_s21 + $0x8] sm:$0xff]  ;;  %v2810_v2 = vmov 128.0   ;;  %vm847_vm7 = vcmask 261120  }
  0x54   : > { %576 = vadd.xlane.f32.xlu0 %v3045_v0  ;;  %2423 = vrcp.f32 %v2810_v2  ;;  %v2020_v17 = vld [vmem:[#allocation8 + $0xa8] sm:$0xf]  ;;  %v2230_v18 = vld [vmem:[#allocation8 + $0xb0] sm:$0xf0]  ;;  %v2229_v19 = vld [vmem:[#allocation8 + $0xac] sm:$0xf] }
  0x55   : > { %v2021_v20 = vor.u32 %v2230_v18, %v2020_v17  ;;  %v2022_v21 = vld [vmem:[#allocation8 + $0xb4] sm:$0xf0]  ;;  %v2028_v22 = vld [vmem:[#allocation8 + $0xb0] sm:$0xf]  ;;  %v2231_v23 = vld [vmem:[#allocation8 + $0xb8] sm:$0xf0] }
  0x56   : > { %v2025_v24 = vor.u32 %v2229_v19, %v2022_v21  ;;  %v2029_v25 = vor.u32 %v2231_v23, %v2028_v22  ;;  %v2008_v26 = vld [vmem:[#allocation8 + $0x90] sm:$0xf]  ;;  %v2227_v27 = vld [vmem:[#allocation8 + $0x98] sm:$0xf0]  ;;  %v2226_v28 = vld [vmem:[#allocation8 + $0x94] sm:$0xf] }
  0x57   : > { %802 = vmatpush.bf16.msra.mxu0 %v2021_v20  ;;  %v2009_v29 = vor.u32 %v2227_v27, %v2008_v26  ;;  %v2010_v30 = vld [vmem:[#allocation8 + $0x9c] sm:$0xf0]  ;;  %v2016_v31 = vld [vmem:[#allocation8 + $0x98] sm:$0xf]  ;;  %v2228_v32 = vld [vmem:[#allocation8 + $0xa0] sm:$0xf0] }
  0x58   : > { %816 = vmatpush.bf16.msra.mxu1 %v2025_v24  ;;  %830 = vmatpush.bf16.msra.mxu2 %v2029_v25  ;;  %v2013_v33 = vor.u32 %v2226_v28, %v2010_v30  ;;  %v2017_v34 = vor.u32 %v2228_v32, %v2016_v31  ;;  %v1996_v35 = vld [vmem:[#allocation8 + $0x78] sm:$0xf]  ;;  %v2224_v36 = vld [vmem:[#allocation8 + $0x80] sm:$0xf0]  ;;  %v2223_v37 = vld [vmem:[#allocation8 + $0x7c] sm:$0xf] }
  0x59   : > { %v1997_v38 = vor.u32 %v2224_v36, %v1996_v35  ;;  %v1998_v39 = vld [vmem:[#allocation8 + $0x84] sm:$0xf0]  ;;  %v2004_v40 = vld [vmem:[#allocation8 + $0x80] sm:$0xf]  ;;  %v2225_v41 = vld [vmem:[#allocation8 + $0x88] sm:$0xf0] }
  0x5a   : > { %v2424_v3 = vpop.eup %2423  ;;  %v2001_v42 = vor.u32 %v2223_v37, %v1998_v39  ;;  %v2005_v43 = vor.u32 %v2225_v41, %v2004_v40  ;;  %v1984_v44 = vld [vmem:[#allocation8 + $0x60] sm:$0xf]  ;;  %v2221_v45 = vld [vmem:[#allocation8 + $0x68] sm:$0xf0]  ;;  %v2220_v46 = vld [vmem:[#allocation8 + $0x64] sm:$0xf] }
  0x5b   : > { %v581_v4 = vmul.f32 128.0, %v2424_v3  ;;  %vm585_vm0 = vweird.f32 %v2424_v3  ;;  %803 = vmatpush.bf16.msra.mxu0 %v2009_v29  ;;  %v1985_v47 = vor.u32 %v2221_v45, %v1984_v44  ;;  %v1986_v48 = vld [vmem:[#allocation8 + $0x6c] sm:$0xf0]  ;;  %v1992_v49 = vld [vmem:[#allocation8 + $0x68] sm:$0xf]  ;;  %s2811_s23 = smov 96  }
  0x5c   : > { %578 = vadd.xlane.f32.xlu0 %v3048_v1  ;;  %817 = vmatpush.bf16.msra.mxu1 %v2013_v33  ;;  %v2222_v50 = vld [vmem:[#allocation8 + $0x70] sm:$0xf0]  ;;  %v1989_v51 = vor.u32 %v2220_v46, %v1986_v48  ;;  %v1972_v53 = vld [vmem:[#allocation8 + $0x48] sm:$0xf]  ;;  %v2217_v55 = vld [vmem:[#allocation8 + $0x4c] sm:$0xf] }
  0x5d   : > { %v582_v5 = vsub.f32 1.0, %v581_v4  ;;  %831 = vmatpush.bf16.msra.mxu2 %v2017_v34  ;;  %v1993_v52 = vor.u32 %v2222_v50, %v1992_v49  ;;  %v2218_v54 = vld [vmem:[#allocation8 + $0x50] sm:$0xf0]  ;;  %v1974_v57 = vld [vmem:[#allocation8 + $0x54] sm:$0xf0]  ;;  %vm868_vm8 = vcmask 130048  }
  0x5e   : > { %v1973_v56 = vor.u32 %v2218_v54, %v1972_v53  ;;  %v1980_v58 = vld [vmem:[#allocation8 + $0x50] sm:$0xf]  ;;  %v2219_v59 = vld [vmem:[#allocation8 + $0x58] sm:$0xf0]  ;;  %v1977_v60 = vor.u32 %v2217_v55, %v1974_v57  ;;  %v2214_v2 = vld [vmem:[#allocation8 + $0x34] sm:$0xf] }
  0x5f   : > { %v583_v6 = vmul.f32 %v2424_v3, %v582_v5  ;;  %804 = vmatpush.bf16.msra.mxu0 %v1997_v38  ;;  %v1981_v61 = vor.u32 %v2219_v59, %v1980_v58  ;;  %v1960_v62 = vld [vmem:[#allocation8 + $0x30] sm:$0xf]  ;;  %v2215_v63 = vld [vmem:[#allocation8 + $0x38] sm:$0xf0]  ;;  %v1962_v4 = vld [vmem:[#allocation8 + $0x3c] sm:$0xf0] }
  0x60   : > { %818 = vmatpush.bf16.msra.mxu1 %v2001_v42  ;;  %v1968_v5 = vld [vmem:[#allocation8 + $0x38] sm:$0xf]  ;;  %v1956_v17 = vld [vmem:[#allocation8 + $0x20] sm:$0xf]  ;;  %v2213_v18 = vld [vmem:[#allocation8 + $0x28] sm:$0xf0] }
  0x61   : > { %v584_v7 = vadd.f32 %v2424_v3, %v583_v6  ;;  %832 = vmatpush.bf16.msra.mxu2 %v2005_v43  ;;  %v2216_v6 = vld [vmem:[#allocation8 + $0x40] sm:$0xf0]  ;;  %v1957_v20 = vor.u32 %v2213_v18, %v1956_v17  ;;  %v1936_v21 = vld [vmem:[#allocation8] sm:$0xf]  ;;  %v2209_v22 = vld [vmem:[#allocation8 + $0x8] sm:$0xf0] }
  0x62   : > { %v2208_v23 = vld [vmem:[#allocation8 + $0x4] sm:$0xf]  ;;  %v1937_v25 = vor.u32 %v2209_v22, %v1936_v21  ;;  %v1938_v26 = vld [vmem:[#allocation8 + $0xc] sm:$0xf0]  ;;  %v1944_v27 = vld [vmem:[#allocation8 + $0x8] sm:$0xf] }
  0x63   : > { %v3051_v8 = vsel %vm585_vm0, %v2424_v3, %v584_v7  ;;  %805 = vmatpush.bf16.msra.mxu0 %v1985_v47  ;;  %v1961_v3 = vor.u32 %v2215_v63, %v1960_v62  ;;  %v1965_v7 = vor.u32 %v2214_v2, %v1962_v4  ;;  %v2210_v28 = vld [vmem:[#allocation8 + $0x10] sm:$0xf0]  ;;  %v1941_v30 = vor.u32 %v2208_v23, %v1938_v26  ;;  %v2417_v49 = vld [vmem:[#allocation5] ss:$0 sm:$0xff]  ;;  %v2418_v54 = vld [vmem:[#allocation7] ss:$0 sm:$0xff] }
  0x64   : > { %819 = vmatpush.bf16.msra.mxu1 %v1989_v51  ;;  %v1945_v31 = vor.u32 %v2210_v28, %v1944_v27  ;;  %s2812_s22 = smov 32   ;;  %s2813_s13 = smov 64   ;;  %vm1139_vm9 = vcmask 523264   ;;  %vm1142_vm10 = vcmask 785408  }
  0x65   : > { %833 = vmatpush.bf16.msra.mxu2 %v1993_v52  ;;  %s3353_s5 = sld [smem:[#allocation27_spill]] }
  0x66   : > { %s3356_s20 = sld [smem:[#allocation28_spill]] }
  0x67   : > { %806 = vmatpush.bf16.msra.mxu0 %v1973_v56  ;;  %s3357_s14 = sld [smem:[#allocation29_spill]] }
  0x68   : > { %820 = vmatpush.bf16.msra.mxu1 %v1977_v60 }
  0x69   : > { %834 = vmatpush.bf16.msra.mxu2 %v1981_v61 }
  0x6b   : > { %807 = vmatpush.bf16.msra.mxu0 %v1961_v3 }
  0x6c   : > { %821 = vmatpush.bf16.msra.mxu1 %v1965_v7 }
  0x6d   : > { %s2733_s16 = scalar_lea.hbm %s3357_s14, 32 }
  0xc7   : > { %v577_v9 = vpop.xlane.xlu0 %576 }
  0xc8   : > { %v587_v10 = vmul.f32 %v3051_v8, %v577_v9  ;;  %v1969_v9 = vor.u32 %v2216_v6, %v1968_v5 }
  0xca   : > { %v3055_v11 = vsub.f32 %v3045_v0, %v587_v10  ;;  %835 = vmatpush.bf16.msra.mxu2 %v1969_v9  ;;  %v1948_v10 = vld [vmem:[#allocation8 + $0x18] sm:$0xf] }
  0xcc   : > { %v591_v12 = vmul.f32 %v3055_v11, %v3055_v11 }
  0xce   : > { %593 = vadd.xlane.f32.xlu1 %v591_v12  ;;  %v2212_v12 = vld [vmem:[#allocation8 + $0x20] sm:$0xf0]  ;;  %836 = vmatpush.bf16.msra.mxu2 %v1957_v20 }
  0xcf   : > { %v579_v13 = vpop.xlane.xlu0 %578 }
  0xd0   : > { %v588_v14 = vmul.f32 %v3051_v8, %v579_v13  ;;  %v2211_v13 = vld [vmem:[#allocation8 + $0x1c] sm:$0xf] }
  0xd2   : > { %v3061_v15 = vsub.f32 %v3048_v1, %v588_v14  ;;  %v1949_v14 = vor.u32 %v2212_v12, %v1948_v10  ;;  %837 = vmatpush.bf16.msra.mxu2 %v1945_v31 }
  0xd4   : > { %v592_v16 = vmul.f32 %v3061_v15, %v3061_v15  ;;  %808 = vmatpush.bf16.msra.mxu0 %v1949_v14 }
  0xd6   : > { %595 = vadd.xlane.f32.xlu1 %v592_v16  ;;  %v1950_v16 = vld [vmem:[#allocation8 + $0x24] sm:$0xf0] }
  0xd7   : > { %v1953_v19 = vor.u32 %v2211_v13, %v1950_v16 }
  0xd8   : > { %809 = vmatpush.bf16.msra.mxu0 %v1937_v25 }
  0xd9   : > { %822 = vmatpush.bf16.msra.mxu1 %v1953_v19 }
  0xdd   : > { %823 = vmatpush.bf16.msra.mxu1 %v1941_v30 }
 0x141   : > { %v594_v24 = vpop.xlane.xlu1 %593 }
 0x142   : > { %v597_v29 = vmul.f32 %v594_v24, %v3051_v8 }
 0x144   : > { %v599_v32 = vadd.f32 1e-05, %v597_v29 }
 0x146   : > { %2425 = vrsqrt.f32 %v599_v32  ;;  %vm607_vm2 = vweird.f32 %v599_v32 }
 0x149   : > { %v596_v33 = vpop.xlane.xlu1 %595 }
 0x14a   : > { %v598_v34 = vmul.f32 %v596_v33, %v3051_v8 }
 0x14c   : > { %v2426_v35 = vpop.eup %2425  ;;  %v600_v36 = vadd.f32 1e-05, %v598_v34 }
 0x14d   : > { %v602_v37 = vmul.f32 %v2426_v35, %v599_v32  ;;  %vm608_vm1 = vweird.f32 %v2426_v35 }
 0x14e   : > { %2427 = vrsqrt.f32 %v600_v36  ;;  %vm609_vm3 = vmor %vm607_vm2, %vm608_vm1  ;;  %vm617_vm5 = vweird.f32 %v600_v36 }
 0x14f   : > { %v603_v38 = vmul.f32 %v2426_v35, %v602_v37 }
 0x151   : > { %v604_v39 = vmul.f32 0.5, %v603_v38 }
 0x153   : > { %v605_v40 = vsub.f32 1.5, %v604_v39 }
 0x154   : > { %v2428_v41 = vpop.eup %2427 }
 0x155   : > { %v606_v42 = vmul.f32 %v2426_v35, %v605_v40  ;;  %v612_v43 = vmul.f32 %v2428_v41, %v600_v36  ;;  %vm618_vm4 = vweird.f32 %v2428_v41 }
 0x156   : > { %vm619_vm6 = vmor %vm617_vm5, %vm618_vm4 }
 0x157   : > { %v613_v44 = vmul.f32 %v2428_v41, %v612_v43  ;;  %v610_v45 = vsel %vm609_vm3, %v2426_v35, %v606_v42 }
 0x158   : > { %v621_v48 = vmul.f32 %v610_v45, %v3055_v11  ;;  %v666_v11 = vld [vmem:[%s3321_s4] sm:$0x7] }
 0x159   : > { %v614_v46 = vmul.f32 0.5, %v613_v44  ;;  %v668_v61 = vperm.slane %v666_v11, 0  ;;  %v669_v62 = vperm.slane %v666_v11, 1  ;;  %v670_v10 = vperm.slane %v666_v11, 2 }
 0x15a   : > { %v626_v53 = vmul.f32 %v2417_v49, %v621_v48 }
 0x15b   : > { %v615_v47 = vsub.f32 1.5, %v614_v46 }
 0x15c   : > { %v631_v56 = vadd.f32 %v2418_v54, %v626_v53 }
 0x15d   : > { %v616_v50 = vmul.f32 %v2428_v41, %v615_v47 }
 0x15f   : > { %v620_v51 = vsel %vm619_vm6, %v2428_v41, %v616_v50 }
 0x160   : > { %v622_v52 = vmul.f32 %v620_v51, %v3061_v15 }
 0x162   : > { %v627_v55 = vmul.f32 %v2417_v49, %v622_v52 }
 0x164   : > { %v632_v57 = vadd.f32 %v2418_v54, %v627_v55 }
 0x166   : > { %v633_v58 = vpack.c.bf16 %v632_v57, %v631_v56 }
 0x168   : > { %810 = vmatmul.bf16.vlgmr.msra.gmra.mxu0 %v633_v58  ;;  %824 = vmatmul.bf16.vlgmr.msra.gmra.mxu1 %v633_v58 }
 0x169   : > { %838 = vmatmul.bf16.vlgmr.msra.gmra.mxu2 %v633_v58 }
 0x1e5   : > { %v811_v59 = vpop.f32.mrf.mxu0  ;;  %v825_v60 = vpop.f32.mrf.mxu1 }
 0x1e6   : > { %v812_v3 = vadd.f32 %v811_v59, %v668_v61  ;;  %v826_v4 = vadd.f32 %v825_v60, %v669_v62 }
 0x1ec   : > { %v839_v63 = vpop.f32.mrf.mxu2 }
 0x1ed   : > { %v813_v2 = vpop.f32.mrf.mxu0  ;;  %v827_v15 = vpop.f32.mrf.mxu1  ;;  %v840_v14 = vadd.f32 %v839_v63, %v670_v10 }
 0x1ee   : > { %v814_v5 = vadd.f32 %v813_v2, %v668_v61  ;;  %v828_v6 = vadd.f32 %v827_v15, %v669_v62 }
 0x1f0   : > { %v844_v7 = vpack.c.bf16 %v814_v5, %v812_v3  ;;  %v845_v9 = vpack.c.bf16 %v828_v6, %v826_v4 }
 0x1f2   : > { %910 = vrot.lane.b32.xlu0 %v844_v7, %s2811_s23  ;;  %v852_v12 = vsel %vm847_vm7, %v845_v9, 0 }
 0x1f3   : > { %861 = vmatpush.bf16.xpose.msra.mxu3 %v852_v12 }
 0x1f4   : > { %v841_v13 = vpop.f32.mrf.mxu2 }
 0x1f5   : > { %v842_v16 = vadd.f32 %v841_v13, %v670_v10 }
 0x1f7   : > { %v3074_v17 = vpack.c.bf16 %v842_v16, %v840_v14 }
 0x1fa   : > { %2030 = vmatmul.msk.bf16.vlgmr.msra.gmra.mxu3 %vm847_vm7, %v844_v7 }
 0x1fb   : > { %902 = vmatpush.bf16.msrb.mxu3 %v3074_v17 }
 0x264   : > { %v911_v34 = vpop.permute.xlu0 %910 }
 0x27d   : > { %v863_v18 = vpop.f32.mrf.mxu3 }
 0x27e   : > { %v869_v19 = vsel %vm868_vm8, %v863_v18, -inf }
 0x27f   : > { %870 = vmax.xlane.f32.xlu2 %v869_v19 }
 0x285   : > { %v865_v20 = vpop.f32.mrf.mxu3 }
 0x286   : > { %v872_v21 = vsel %vm868_vm8, %v865_v20, -inf }
 0x287   : > { %873 = vmax.xlane.f32.xlu2 %v872_v21 }
 0x29f   : > { %913 = vrot.lane.b32.xlu2 %v845_v9, %s2811_s23 }
 0x2a7   : > { %1048 = vrot.lane.b32.xlu2 %v845_v9, %s2812_s22 }
 0x2af   : > { %1046 = vrot.lane.b32.xlu2 %v844_v7, %s2812_s22 }
 0x2f2   : > { %v871_v22 = vpop.xlane.xlu2 %870 }
 0x2f3   : > { %v875_v23 = vsub.f32 %v863_v18, %v871_v22 }
 0x2f5   : > { %v877_v24 = vmul.f32 1.442695, %v875_v23 }
 0x2f7   : > { %2429 = vpow2.f32 %v877_v24 }
 0x2fa   : > { %v874_v25 = vpop.xlane.xlu2 %873 }
 0x2fb   : > { %v876_v26 = vsub.f32 %v865_v20, %v874_v25 }
 0x2fd   : > { %v2430_v27 = vpop.eup %2429  ;;  %v879_v28 = vmul.f32 1.442695, %v876_v26 }
 0x2fe   : > { %v881_v29 = vsel %vm868_vm8, %v2430_v27, 0.0 }
 0x2ff   : > { %2431 = vpow2.f32 %v879_v28  ;;  %882 = vadd.xlane.f32.xlu0 %v881_v29 }
 0x302   : > { %v914_v30 = vpop.permute.xlu2 %913 }
 0x303   : > { %v919_v31 = vsel %vm847_vm7, %v914_v30, 0 }
 0x304   : > { %928 = vmatpush.bf16.xpose.msra.mxu3 %v919_v31 }
 0x305   : > { %v2432_v32 = vpop.eup %2431 }
 0x306   : > { %v884_v33 = vsel %vm868_vm8, %v2432_v32, 0.0 }
 0x307   : > { %885 = vadd.xlane.f32.xlu1 %v884_v33 }
 0x30a   : > { %v1049_v41 = vpop.permute.xlu2 %1048 }
 0x30b   : > { %v1054_v43 = vsel %vm847_vm7, %v1049_v41, 0 }
 0x312   : > { %v1047_v47 = vpop.permute.xlu2 %1046 }
 0x313   : > { %979 = vrot.lane.b32.xlu0 %v844_v7, %s2813_s13 }
 0x320   : > { %981 = vrot.lane.b32.xlu1 %v845_v9, %s2813_s13 }
 0x372   : > { %v883_v35 = vpop.xlane.xlu0 %882 }
 0x373   : > { %2433 = vrcp.f32 %v883_v35 }
 0x379   : > { %v2434_v37 = vpop.eup %2433 }
 0x37a   : > { %v886_v36 = vpop.xlane.xlu1 %885  ;;  %v889_v39 = vmul.f32 %v2434_v37, %v2430_v27 }
 0x37b   : > { %2435 = vrcp.f32 %v886_v36 }
 0x381   : > { %v2436_v38 = vpop.eup %2435 }
 0x382   : > { %v890_v40 = vmul.f32 %v2436_v38, %v2432_v32 }
 0x384   : > { %v891_v42 = vpack.c.bf16 %v890_v40, %v889_v39 }
 0x385   : > { %v980_v46 = vpop.permute.xlu0 %979 }
 0x386   : > { %2031 = vmatmul.msk.bf16.vlgmr.msrb.gmra.mxu3 %vm868_vm8, %v891_v42 }
 0x387   : > { %1063 = vmatpush.bf16.xpose.msrb.mxu3 %v1054_v43 }
 0x392   : > { %v982_v44 = vpop.permute.xlu1 %981 }
 0x393   : > { %v987_v45 = vsel %vm847_vm7, %v982_v44, 0 }
 0x394   : > { %996 = vmatpush.bf16.xpose.msrb.mxu2 %v987_v45 }
 0x396   : > { %2032 = vmatmul.msk.bf16.vlgmr.msra.gmra.mxu3 %vm847_vm7, %v911_v34 }
 0x39b   : > { %2034 = vmatmul.msk.bf16.vlgmr.msrb.gmra.mxu2 %vm847_vm7, %v980_v46 }
 0x3a6   : > { %2036 = vmatmul.msk.bf16.vlgmr.msrb.gmra.mxu3 %vm847_vm7, %v1047_v47 }
 0x409   : > { %v3094_v48 = vpop.f32.mrf.mxu3 }
 0x411   : > { %v3096_v49 = vpop.f32.mrf.mxu3 }
 0x419   : > { %v930_v50 = vpop.f32.mrf.mxu3 }
 0x41a   : > { %v935_v51 = vsel %vm868_vm8, %v930_v50, -inf }
 0x41b   : > { %936 = vmax.xlane.f32.xlu1 %v935_v51 }
 0x41e   : > { %v998_v52 = vpop.f32.mrf.mxu2 }
 0x41f   : > { %v1003_v53 = vsel %vm868_vm8, %v998_v52, -inf }
 0x420   : > { %1004 = vmax.xlane.f32.xlu2 %v1003_v53 }
 0x421   : > { %v932_v54 = vpop.f32.mrf.mxu3 }
 0x422   : > { %v938_v55 = vsel %vm868_vm8, %v932_v54, -inf }
 0x423   : > { %939 = vmax.xlane.f32.xlu0 %v938_v55 }
 0x426   : > { %v1000_v56 = vpop.f32.mrf.mxu2 }
 0x427   : > { %v1006_v57 = vsel %vm868_vm8, %v1000_v56, -inf }
 0x428   : > { %1007 = vmax.xlane.f32.xlu1 %v1006_v57 }
 0x429   : > { %v1065_v58 = vpop.f32.mrf.mxu3 }
 0x42a   : > { %v1070_v59 = vsel %vm868_vm8, %v1065_v58, -inf }
 0x42b   : > { %1071 = vmax.xlane.f32.xlu0 %v1070_v59  ;;  %v2238_v59 = vld [vmem:[#allocation10 + $0x30] sm:$0xff] }
 0x431   : > { %v1067_v60 = vpop.f32.mrf.mxu3 }
 0x432   : > { %v1073_v11 = vsel %vm868_vm8, %v1067_v60, -inf }
 0x433   : > { %1074 = vmax.xlane.f32.xlu2 %v1073_v11  ;;  %v2237_v11 = vld [vmem:[#allocation10 + $0x28] sm:$0xff] }
 0x44b   : > { %959 = vrot.lane.b32.xlu2 %v3074_v17, %s2811_s23 }
 0x48e   : > { %v937_v61 = vpop.xlane.xlu1 %936 }
 0x48f   : > { %v941_v2 = vsub.f32 %v930_v50, %v937_v61 }
 0x491   : > { %v943_v4 = vmul.f32 1.442695, %v941_v2 }
 0x493   : > { %v1005_v62 = vpop.xlane.xlu2 %1004 }
 0x494   : > { %v1009_v63 = vsub.f32 %v998_v52, %v1005_v62 }
 0x496   : > { %v1011_v15 = vmul.f32 1.442695, %v1009_v63  ;;  %v940_v3 = vpop.xlane.xlu0 %939 }
 0x497   : > { %v942_v7 = vsub.f32 %v932_v54, %v940_v3 }
 0x498   : > { %2437 = vpow2.f32 %v1011_v15 }
 0x499   : > { %2439 = vpow2.f32 %v943_v4  ;;  %v945_v16 = vmul.f32 1.442695, %v942_v7  ;;  %v2234_v7 = vld [vmem:[#allocation10 + $0x10] sm:$0xff] }
 0x49b   : > { %v1008_v5 = vpop.xlane.xlu1 %1007 }
 0x49c   : > { %v1010_v6 = vsub.f32 %v1000_v56, %v1008_v5  ;;  %v2236_v5 = vld [vmem:[#allocation10 + $0x20] sm:$0xff] }
 0x49e   : > { %v2438_v9 = vpop.eup %2437  ;;  %v1013_v10 = vmul.f32 1.442695, %v1010_v6  ;;  %v1072_v12 = vpop.xlane.xlu0 %1071  ;;  %v2235_v6 = vld [vmem:[#allocation10 + $0x18] sm:$0xff] }
 0x49f   : > { %v1076_v13 = vsub.f32 %v1065_v58, %v1072_v12  ;;  %v1015_v14 = vsel %vm868_vm8, %v2438_v9, 0.0  ;;  %v2440_v19 = vpop.eup %2439  ;;  %v2239_v58 = vld [vmem:[#allocation10 + $0x38] sm:$0xff] }
 0x4a0   : > { %2441 = vpow2.f32 %v1013_v10  ;;  %1016 = vadd.xlane.f32.xlu1 %v1015_v14  ;;  %v947_v24 = vsel %vm868_vm8, %v2440_v19, 0.0  ;;  %1214 = vmatpush.bf16.msrb.mxu1 %v2239_v58  ;;  %v2232_v10 = vld [vmem:[#allocation10] sm:$0xff] }
 0x4a1   : > { %v1078_v18 = vmul.f32 1.442695, %v1076_v13  ;;  %2443 = vpow2.f32 %v945_v16  ;;  %v2114_v58 = vld [vmem:[#allocation13 + $0x58] sm:$0xf0] }
 0x4a3   : > { %2445 = vpow2.f32 %v1078_v18 }
 0x4a4   : > { %1215 = vmatpush.bf16.msrb.mxu1 %v2238_v59 }
 0x4a6   : > { %v2442_v20 = vpop.eup %2441  ;;  %v1075_v21 = vpop.xlane.xlu2 %1074 }
 0x4a7   : > { %v1077_v22 = vsub.f32 %v1067_v60, %v1075_v21  ;;  %v1018_v23 = vsel %vm868_vm8, %v2442_v20, 0.0  ;;  %v2444_v26 = vpop.eup %2443 }
 0x4a8   : > { %1019 = vadd.xlane.f32.xlu0 %v1018_v23  ;;  %948 = vadd.xlane.f32.xlu1 %v947_v24  ;;  %v950_v29 = vsel %vm868_vm8, %v2444_v26, 0.0 }
 0x4a9   : > { %v1080_v25 = vmul.f32 1.442695, %v1077_v22  ;;  %v2446_v27 = vpop.eup %2445  ;;  %1216 = vmatpush.bf16.msrb.mxu1 %v2237_v11  ;;  %v2249_v11 = vld [vmem:[#allocation13 + $0x44] sm:$0xf0] }
 0x4aa   : > { %v1082_v30 = vsel %vm868_vm8, %v2446_v27, 0.0 }
 0x4ab   : > { %2447 = vpow2.f32 %v1080_v25 }
 0x4ad   : > { %1217 = vmatpush.bf16.msrb.mxu1 %v2236_v5 }
 0x4ae   : > { %v960_v28 = vpop.permute.xlu2 %959 }
 0x4af   : > { %972 = vmatpush.bf16.msrb.mxu0 %v960_v28 }
 0x4b0   : > { %951 = vadd.xlane.f32.xlu0 %v950_v29  ;;  %1083 = vadd.xlane.f32.xlu1 %v1082_v30  ;;  %v2419_v30 = vld [vmem:[#allocation11] ss:$0 sm:$0xff] }
 0x4b1   : > { %v2448_v31 = vpop.eup %2447  ;;  %1218 = vmatpush.bf16.msrb.mxu1 %v2235_v6  ;;  %v2098_v6 = vld [vmem:[#allocation13 + $0x38] sm:$0xf0] }
 0x4b2   : > { %v1085_v32 = vsel %vm868_vm8, %v2448_v31, 0.0 }
 0x4b5   : > { %1219 = vmatpush.bf16.msrb.mxu1 %v2234_v7 }
 0x4b8   : > { %1086 = vadd.xlane.f32.xlu0 %v1085_v32 }
 0x4c9   : > { %1026 = vrot.lane.b32.xlu1 %v3074_v17, %s2813_s13 }
 0x4cc   : > { %1093 = vrot.lane.b32.xlu0 %v3074_v17, %s2812_s22 }
 0x513   : > { %v1017_v33 = vpop.xlane.xlu1 %1016 }
 0x51b   : > { %v1020_v34 = vpop.xlane.xlu0 %1019  ;;  %v949_v35 = vpop.xlane.xlu1 %948 }
 0x51c   : > { %2449 = vrcp.f32 %v949_v35 }
 0x522   : > { %v2450_v37 = vpop.eup %2449 }
 0x523   : > { %v952_v36 = vpop.xlane.xlu0 %951  ;;  %v955_v39 = vmul.f32 %v2450_v37, %v2440_v19  ;;  %v1084_v43 = vpop.xlane.xlu1 %1083 }
 0x524   : > { %2451 = vrcp.f32 %v952_v36 }
 0x525   : > { %2453 = vrcp.f32 %v1020_v34 }
 0x526   : > { %2455 = vrcp.f32 %v1017_v33 }
 0x52a   : > { %v2452_v38 = vpop.eup %2451 }
 0x52b   : > { %v956_v40 = vmul.f32 %v2452_v38, %v2444_v26  ;;  %v1087_v42 = vpop.xlane.xlu0 %1086  ;;  %v2454_v17 = vpop.eup %2453 }
 0x52c   : > { %2457 = vrcp.f32 %v1087_v42  ;;  %v2456_v44 = vpop.eup %2455  ;;  %v1024_v46 = vmul.f32 %v2454_v17, %v2442_v20  ;;  %v2255_v42 = vld [vmem:[#allocation13 + $0x74] sm:$0xf0] }
 0x52d   : > { %v957_v41 = vpack.c.bf16 %v956_v40, %v955_v39  ;;  %2459 = vrcp.f32 %v1084_v43  ;;  %v1023_v50 = vmul.f32 %v2456_v44, %v2438_v9  ;;  %v2233_v9 = vld [vmem:[#allocation10 + $0x8] sm:$0xff]  ;;  %v2254_v43 = vld [vmem:[#allocation13 + $0x74] sm:$0xf]  ;;  %v2130_v44 = vld [vmem:[#allocation13 + $0x78] sm:$0xf0] }
 0x52e   : > { %1220 = vmatpush.bf16.msrb.mxu1 %v2233_v9  ;;  %v2088_v9 = vld [vmem:[#allocation13 + $0x20] sm:$0xf] }
 0x52f   : > { %2033 = vmatmul.msk.bf16.vlgmr.msrb.gmra.mxu0 %vm868_vm8, %v957_v41  ;;  %v1025_v53 = vpack.c.bf16 %v1024_v46, %v1023_v50  ;;  %v2128_v41 = vld [vmem:[#allocation13 + $0x70] sm:$0xf]  ;;  %v2120_v46 = vld [vmem:[#allocation13 + $0x60] sm:$0xf]  ;;  %v2252_v50 = vld [vmem:[#allocation13 + $0x64] sm:$0xf] }
 0x530   : > { %v2129_v17 = vor.u32 %v2255_v42, %v2128_v41 }
 0x532   : > { %v2458_v45 = vpop.eup %2457  ;;  %1221 = vmatpush.bf16.msrb.mxu1 %v2232_v10  ;;  %v2245_v10 = vld [vmem:[#allocation13 + $0x24] sm:$0xf0] }
 0x533   : > { %v2460_v47 = vpop.eup %2459  ;;  %v1091_v52 = vmul.f32 %v2458_v45, %v2448_v31  ;;  %v2133_v45 = vor.u32 %v2254_v43, %v2130_v44 }
 0x534   : > { %v1090_v54 = vmul.f32 %v2460_v47, %v2446_v27  ;;  %v2253_v47 = vld [vmem:[#allocation13 + $0x64] sm:$0xf0] }
 0x535   : > { %1399 = vmatpush.bf16.msra.mxu3 %v2133_v45 }
 0x536   : > { %v1092_v56 = vpack.c.bf16 %v1091_v52, %v1090_v54  ;;  %v2122_v52 = vld [vmem:[#allocation13 + $0x68] sm:$0xf0]  ;;  %v2112_v54 = vld [vmem:[#allocation13 + $0x50] sm:$0xf] }
 0x53b   : > { %v1027_v51 = vpop.permute.xlu1 %1026 }
 0x53c   : > { %1039 = vmatpush.bf16.msra.mxu2 %v1027_v51  ;;  %v2121_v51 = vor.u32 %v2253_v47, %v2120_v46  ;;  %v2420_v47 = vld [vmem:[%s3324_s7] ss:$0 sm:$0xff] }
 0x53e   : > { %v1094_v55 = vpop.permute.xlu0 %1093 }
 0x53f   : > { %2035 = vmatmul.msk.bf16.vlgmr.msra.gmra.mxu2 %vm868_vm8, %v1025_v53  ;;  %1106 = vmatpush.bf16.msra.mxu0 %v1094_v55  ;;  %v2125_v53 = vor.u32 %v2252_v50, %v2122_v52  ;;  %v2251_v55 = vld [vmem:[#allocation13 + $0x54] sm:$0xf0] }
 0x540   : > { %1385 = vmatpush.bf16.msrb.mxu2 %v2129_v17 }
 0x541   : > { %1400 = vmatpush.bf16.msra.mxu3 %v2125_v53 }
 0x542   : > { %2037 = vmatmul.msk.bf16.vlgmr.msra.gmra.mxu0 %vm868_vm8, %v1092_v56  ;;  %v2250_v56 = vld [vmem:[#allocation13 + $0x54] sm:$0xf] }
 0x543   : > { %v2117_v59 = vor.u32 %v2250_v56, %v2114_v58 }
 0x544   : > { %1386 = vmatpush.bf16.msrb.mxu2 %v2121_v51 }
 0x545   : > { %1401 = vmatpush.bf16.msra.mxu3 %v2117_v59 }
 0x5ac   : > { %v974_v57 = vpop.f32.mrf.mxu0 }
 0x5b4   : > { %v976_v61 = vpop.f32.mrf.mxu0 }
 0x5b5   : > { %v2407_v15 = vpack.i.bf16 %v976_v61, %v974_v57  ;;  %v2113_v57 = vor.u32 %v2251_v55, %v2112_v54  ;;  %v2248_v61 = vld [vmem:[#allocation13 + $0x44] sm:$0xf]  ;;  %v2421_v54 = vld [vmem:[%s3325_s8] ss:$0 sm:$0xff] }
 0x5b7   : > { %1387 = vmatpush.bf16.msrb.mxu2 %v2113_v57 }
 0x5bf   : > { %v1108_v2 = vpop.f32.mrf.mxu0 }
 0x5c2   : > { %v1041_v60 = vpop.f32.mrf.mxu2 }
 0x5c7   : > { %v1110_v3 = vpop.f32.mrf.mxu0 }
 0x5c8   : > { %v2412_v4 = vpack.i.bf16 %v1110_v3, %v1108_v2  ;;  %v2247_v3 = vld [vmem:[#allocation13 + $0x34] sm:$0xf0] }
 0x5ca   : > { %v1043_v62 = vpop.f32.mrf.mxu2 }
 0x5cb   : > { %v2402_v63 = vpack.i.bf16 %v1043_v62, %v1041_v60  ;;  %v2104_v60 = vld [vmem:[#allocation13 + $0x40] sm:$0xf] }
 0x5cc   : > { %v2105_v62 = vor.u32 %v2249_v11, %v2104_v60 }
 0x5cd   : > { %2403 = vrot.lane.b32.xlu2 %v2402_v63, %s2813_s13  ;;  %v2106_v63 = vld [vmem:[#allocation13 + $0x48] sm:$0xf0] }
 0x5ce   : > { %v2109_v2 = vor.u32 %v2248_v61, %v2106_v63  ;;  %1388 = vmatpush.bf16.msrb.mxu2 %v2105_v62 }
 0x5d0   : > { %1402 = vmatpush.bf16.msra.mxu3 %v2109_v2 }
 0x5d5   : > { %2408 = vrot.lane.b32.xlu2 %v2407_v15, %s2812_s22  ;;  %v2096_v15 = vld [vmem:[#allocation13 + $0x30] sm:$0xf]  ;;  %s570_s22 = scalar_lea.vmem [#allocation16], %s1925_s2 }
 0x5d6   : > { %v2097_v5 = vor.u32 %v2247_v3, %v2096_v15  ;;  %s1768_s1 = sshll.u32 %s570_s22, 4  ;;  %s1769_s1 = int_to_ptr.vmem [resolvable:$true] %s1768_s1 }
 0x5d8   : > { %1389 = vmatpush.bf16.msrb.mxu2 %v2097_v5 }
 0x5dd   : > { %2413 = vrot.lane.b32.xlu2 %v2412_v4, %s2811_s23  ;;  %v2246_v4 = vld [vmem:[#allocation13 + $0x34] sm:$0xf]  ;;  %s2272_s23 = sshll.u32 %s2910_s15, 4  ;;  %s1756_s15 = scalar_lea.sflag [#allocation4], %s3019_s18 }
 0x5de   : > { %v2101_v7 = vor.u32 %v2246_v4, %v2098_v6  ;;  %s1767_s24 = scalar_lea.hbm %s3357_s14, %s2272_s23 }
 0x5df   : > { %s1770_s17 = sshll.u32 %s1767_s24, 4  ;;  %s1771_s17 = int_to_ptr.hbm [resolvable:$true] %s1770_s17 }
 0x5e0   : > { %1403 = vmatpush.bf16.msra.mxu3 %v2101_v7  ;;  %s2727_s30 = sshra.s32 %s1771_s17, 4  ;;  %s2728_s30 = int_to_ptr.hbm [resolvable:$true] %s2727_s30 }
 0x5e1   : > { %s2729_s2 = scalar_lea.hbm %s2728_s30, 16  ;;  %p2734_p12 = scmp.lt.s32.totalorder %s2728_s30, %s3357_s14 }
 0x5e2   : > { %p2730_p1 = scmp.ne.s32.totalorder %s2728_s30, %s2729_s2  ;;  %p2735_p8 = scmp.lt.s32.totalorder %s2733_s16, %s2729_s2 }
 0x5e4   : > { %p2731_p3 = pnand %p2730_p1, %p2985_p13  ;;  %p2736_p7 = por %p2735_p8, %p2734_p12 }
 0x5e6   : > { %p2732_p4 = pneg %p2731_p3 }
 0x5e8   : > { %p2737_p9 = pnand %p2736_p7, %p2732_p4 }
 0x627   : > { %v2404_v12 = vpop.permute.xlu2 %2403 }
 0x628   : > { %v2406_v20 = vunpack.i.h.bf16 %v2404_v12  ;;  %v2405_v21 = vunpack.i.l.bf16 %v2404_v12  ;;  %v2244_v12 = vld [vmem:[#allocation13 + $0x24] sm:$0xf] }
 0x62f   : > { %v2409_v13 = vpop.permute.xlu2 %2408 }
 0x630   : > { %v2411_v14 = vunpack.i.h.bf16 %v2409_v13  ;;  %v2410_v16 = vunpack.i.l.bf16 %v2409_v13  ;;  %v2089_v13 = vor.u32 %v2245_v10, %v2088_v9 }
 0x632   : > { %v1138_v18 = vsel %vm847_vm7, %v3096_v49, %v2411_v14  ;;  %v1137_v19 = vsel %vm847_vm7, %v3094_v48, %v2410_v16  ;;  %v2090_v14 = vld [vmem:[#allocation13 + $0x28] sm:$0xf0]  ;;  %1390 = vmatpush.bf16.msrb.mxu2 %v2089_v13 }
 0x633   : > { %v1140_v25 = vsel %vm1139_vm9, %v1137_v19, %v2405_v21  ;;  %v1141_v26 = vsel %vm1139_vm9, %v1138_v18, %v2406_v20  ;;  %v2093_v16 = vor.u32 %v2244_v12, %v2090_v14  ;;  %v2080_v18 = vld [vmem:[#allocation13 + $0x10] sm:$0xf]  ;;  %v2243_v19 = vld [vmem:[#allocation13 + $0x14] sm:$0xf0]  ;;  %v2242_v20 = vld [vmem:[#allocation13 + $0x14] sm:$0xf] }
 0x634   : > { %v2081_v21 = vor.u32 %v2243_v19, %v2080_v18 }
 0x635   : > { %1404 = vmatpush.bf16.msra.mxu3 %v2093_v16 }
 0x636   : > { %1391 = vmatpush.bf16.msrb.mxu2 %v2081_v21 }
 0x637   : > { %v2414_v22 = vpop.permute.xlu2 %2413 }
 0x638   : > { %v2416_v23 = vunpack.i.h.bf16 %v2414_v22  ;;  %v2415_v24 = vunpack.i.l.bf16 %v2414_v22  ;;  %v2082_v22 = vld [vmem:[#allocation13 + $0x18] sm:$0xf0] }
 0x63a   : > { %v1143_v27 = vsel %vm1142_vm10, %v1140_v25, %v2415_v24  ;;  %v1144_v28 = vsel %vm1142_vm10, %v1141_v26, %v2416_v23  ;;  %v2072_v23 = vld [vmem:[#allocation13] sm:$0xf]  ;;  %v2241_v24 = vld [vmem:[#allocation13 + $0x4] sm:$0xf0]  ;;  %v2085_v26 = vor.u32 %v2242_v20, %v2082_v22 }
 0x63b   : > { %v1145_v29 = vpack.c.bf16 %v1144_v28, %v1143_v27  ;;  %v2240_v27 = vld [vmem:[#allocation13 + $0x4] sm:$0xf]  ;;  %v2074_v28 = vld [vmem:[#allocation13 + $0x8] sm:$0xf0] }
 0x63c   : > { %1405 = vmatpush.bf16.msra.mxu3 %v2085_v26 }
 0x63d   : > { %1222 = vmatmul.bf16.vlgmr.msrb.gmra.mxu1 %v1145_v29 }
 0x6ba   : > { %v1223_v31 = vpop.f32.mrf.mxu1 }
 0x6bb   : > { %v1224_v32 = vadd.f32 %v2419_v30, %v1223_v31  ;;  %v2077_v31 = vor.u32 %v2240_v27, %v2074_v28 }
 0x6bd   : > { %v3127_v49 = vadd.f32 %v1224_v32, %v3045_v0  ;;  %1406 = vmatpush.bf16.msra.mxu3 %v2077_v31 }
 0x6bf   : > { %1232 = vadd.xlane.f32.xlu0 %v3127_v49 }
 0x6c2   : > { %v1225_v48 = vpop.f32.mrf.mxu1 }
 0x6c3   : > { %v1226_v33 = vadd.f32 %v2419_v30, %v1225_v48  ;;  %v2073_v30 = vor.u32 %v2241_v24, %v2072_v23  ;;  %v2263_v24 = vld [vmem:[#allocation14 + $0x38] sm:$0xff] }
 0x6c4   : > { %1723 = vmatpush.bf16.msrb.mxu0 %v2263_v24 }
 0x6c5   : > { %v3131_v34 = vadd.f32 %v1226_v33, %v3048_v1  ;;  %1392 = vmatpush.bf16.msrb.mxu2 %v2073_v30 }
 0x6c7   : > { %1234 = vadd.xlane.f32.xlu1 %v3131_v34 }
 0x732   : > { %v1233_v35 = vpop.xlane.xlu0 %1232 }
 0x733   : > { %v1236_v36 = vmul.f32 %v1233_v35, %v3051_v8 }
 0x735   : > { %v3136_v37 = vsub.f32 %v3127_v49, %v1236_v36 }
 0x737   : > { %v1240_v38 = vmul.f32 %v3136_v37, %v3136_v37 }
 0x739   : > { %1242 = vadd.xlane.f32.xlu2 %v1240_v38 }
 0x73a   : > { %v1235_v0 = vpop.xlane.xlu1 %1234 }
 0x73b   : > { %v1237_v39 = vmul.f32 %v1235_v0, %v3051_v8 }
 0x73d   : > { %v3142_v40 = vsub.f32 %v3131_v34, %v1237_v39 }
 0x73f   : > { %v1241_v1 = vmul.f32 %v3142_v40, %v3142_v40 }
 0x741   : > { %1244 = vadd.xlane.f32.xlu0 %v1241_v1 }
 0x7ac   : > { %v1243_v25 = vpop.xlane.xlu2 %1242 }
 0x7ad   : > { %v1246_v29 = vmul.f32 %v1243_v25, %v3051_v8  ;;  %v2271_v25 = vld [vmem:[#allocation14 + $0x78] sm:$0xff] }
 0x7ae   : > { %1737 = vmatpush.bf16.msra.mxu1 %v2271_v25 }
 0x7af   : > { %v1248_v32 = vadd.f32 1e-05, %v1246_v29 }
 0x7b1   : > { %2461 = vrsqrt.f32 %v1248_v32  ;;  %vm1256_vm12 = vweird.f32 %v1248_v32 }
 0x7b4   : > { %v1245_v48 = vpop.xlane.xlu0 %1244 }
 0x7b5   : > { %v1247_v33 = vmul.f32 %v1245_v48, %v3051_v8  ;;  %v2262_v48 = vld [vmem:[#allocation14 + $0x30] sm:$0xff] }
 0x7b6   : > { %1724 = vmatpush.bf16.msrb.mxu0 %v2262_v48 }
 0x7b7   : > { %v2462_v35 = vpop.eup %2461  ;;  %v1249_v36 = vadd.f32 1e-05, %v1247_v33  ;;  %v2270_v33 = vld [vmem:[#allocation14 + $0x70] sm:$0xff] }
 0x7b8   : > { %v1251_v38 = vmul.f32 %v2462_v35, %v1248_v32  ;;  %vm1257_vm11 = vweird.f32 %v2462_v35  ;;  %1738 = vmatpush.bf16.msra.mxu1 %v2270_v33 }
 0x7b9   : > { %2463 = vrsqrt.f32 %v1249_v36  ;;  %vm1258_vm13 = vmor %vm1256_vm12, %vm1257_vm11  ;;  %vm1266_vm15 = vweird.f32 %v1249_v36 }
 0x7ba   : > { %v1252_v0 = vmul.f32 %v2462_v35, %v1251_v38 }
 0x7bc   : > { %v1253_v39 = vmul.f32 0.5, %v1252_v0 }
 0x7be   : > { %v1254_v1 = vsub.f32 1.5, %v1253_v39 }
 0x7bf   : > { %v2464_v41 = vpop.eup %2463 }
 0x7c0   : > { %v1255_v42 = vmul.f32 %v2462_v35, %v1254_v1  ;;  %v1261_v43 = vmul.f32 %v2464_v41, %v1249_v36  ;;  %vm1267_vm14 = vweird.f32 %v2464_v41 }
 0x7c1   : > { %vm1268_vm0 = vmor %vm1266_vm15, %vm1267_vm14 }
 0x7c2   : > { %v1262_v17 = vmul.f32 %v2464_v41, %v1261_v43  ;;  %v1259_v44 = vsel %vm1258_vm13, %v2462_v35, %v1255_v42 }
 0x7c3   : > { %v1270_v8 = vmul.f32 %v1259_v44, %v3136_v37  ;;  %v1299_v37 = vld [vmem:[%s3353_s5] sm:$0x3] }
 0x7c4   : > { %v1263_v45 = vmul.f32 0.5, %v1262_v17  ;;  %v1301_v59 = vperm.slane %v1299_v37, 0  ;;  %v1302_v60 = vperm.slane %v1299_v37, 1 }
 0x7c5   : > { %v1275_v53 = vmul.f32 %v2420_v47, %v1270_v8 }
 0x7c6   : > { %v1264_v46 = vsub.f32 1.5, %v1263_v45 }
 0x7c7   : > { %v1280_v56 = vadd.f32 %v2421_v54, %v1275_v53 }
 0x7c8   : > { %v1265_v50 = vmul.f32 %v2464_v41, %v1264_v46 }
 0x7ca   : > { %v1269_v51 = vsel %vm1268_vm0, %v2464_v41, %v1265_v50  ;;  %v2269_v50 = vld [vmem:[#allocation14 + $0x68] sm:$0xff] }
 0x7cb   : > { %v1271_v52 = vmul.f32 %v1269_v51, %v3142_v40  ;;  %1739 = vmatpush.bf16.msra.mxu1 %v2269_v50 }
 0x7cd   : > { %v1276_v55 = vmul.f32 %v2420_v47, %v1271_v52  ;;  %v2261_v47 = vld [vmem:[#allocation14 + $0x28] sm:$0xff] }
 0x7ce   : > { %1725 = vmatpush.bf16.msrb.mxu0 %v2261_v47 }
 0x7cf   : > { %v1281_v57 = vadd.f32 %v2421_v54, %v1276_v55 }
 0x7d1   : > { %v1282_v58 = vpack.c.bf16 %v1281_v57, %v1280_v56 }
 0x7d3   : > { %1393 = vmatmul.bf16.vlgmr.msrb.gmra.mxu2 %v1282_v58  ;;  %1407 = vmatmul.bf16.vlgmr.msra.gmra.mxu3 %v1282_v58 }
 0x856   : > { %v1394_v11 = vpop.f32.mrf.mxu2  ;;  %v1408_v61 = vpop.f32.mrf.mxu3 }
 0x857   : > { %v3159_v40 = vadd.f32 %v1394_v11, %v1301_v59  ;;  %v3161_v62 = vadd.f32 %v1408_v61, %v1302_v60  ;;  %v2260_v11 = vld [vmem:[#allocation14 + $0x20] sm:$0xff] }
 0x858   : > { %v2268_v61 = vld [vmem:[#allocation14 + $0x60] sm:$0xff]  ;;  %1726 = vmatpush.bf16.msrb.mxu0 %v2260_v11 }
 0x859   : > { %v3164_v63 = vmul.f32 0.70710677, %v3159_v40  ;;  %v3167_v2 = vmul.f32 0.70710677, %v3161_v62  ;;  %1740 = vmatpush.bf16.msra.mxu1 %v2268_v61 }
 0x85b   : > { %v1421_v15 = vmul.f32 %v3164_v63, %v3164_v63  ;;  %v1461_v3 = vmul.f32 %v3167_v2, %v3167_v2 }
 0x85d   : > { %v3173_v4 = vmin.f32 %v1421_v15, 16.0  ;;  %v3175_v5 = vmin.f32 %v1461_v3, 16.0 }
 0x85e   : > { %v1396_v6 = vpop.f32.mrf.mxu2  ;;  %v1410_v7 = vpop.f32.mrf.mxu3 }
 0x85f   : > { %v1423_v9 = vmul.f32 2.1237322e-06, %v3173_v4  ;;  %v1434_v10 = vmul.f32 3.8918573e-05, %v3173_v4  ;;  %v3179_v12 = vadd.f32 %v1396_v6, %v1301_v59  ;;  %v1474_v13 = vmul.f32 3.8918573e-05, %v3175_v5 }
 0x860   : > { %v3182_v14 = vadd.f32 %v1410_v7, %v1302_v60  ;;  %v1463_v22 = vmul.f32 2.1237322e-06, %v3175_v5 }
 0x861   : > { %v1424_v16 = vadd.f32 0.00028619796, %v1423_v9  ;;  %v1435_v18 = vadd.f32 0.001143296, %v1434_v10  ;;  %v1475_v19 = vadd.f32 0.001143296, %v1474_v13 }
 0x862   : > { %v3185_v20 = vmul.f32 0.70710677, %v3179_v12  ;;  %v3190_v23 = vmul.f32 0.70710677, %v3182_v14  ;;  %v1464_v36 = vadd.f32 0.00028619796, %v1463_v22 }
 0x863   : > { %v1436_v21 = vmul.f32 %v1435_v18, %v3173_v4  ;;  %v1476_v26 = vmul.f32 %v1475_v19, %v3175_v5  ;;  %v1425_v28 = vmul.f32 %v1424_v16, %v3173_v4  ;;  %v2259_v13 = vld [vmem:[#allocation14 + $0x18] sm:$0xff] }
 0x864   : > { %v1501_v27 = vmul.f32 %v3185_v20, %v3185_v20  ;;  %v1541_v30 = vmul.f32 %v3190_v23, %v3190_v23  ;;  %v1465_v46 = vmul.f32 %v1464_v36, %v3175_v5  ;;  %1727 = vmatpush.bf16.msrb.mxu0 %v2259_v13 }
 0x865   : > { %v1437_v29 = vadd.f32 0.014752088, %v1436_v21  ;;  %v1477_v31 = vadd.f32 0.014752088, %v1476_v26  ;;  %v1426_v41 = vadd.f32 0.0036580483, %v1425_v28 }
 0x866   : > { %v3198_v32 = vmin.f32 %v1501_v27, 16.0  ;;  %v3201_v38 = vmin.f32 %v1541_v30, 16.0  ;;  %v1466_v59 = vadd.f32 0.0036580483, %v1465_v46  ;;  %v2267_v21 = vld [vmem:[#allocation14 + $0x58] sm:$0xff]  ;;  %v2258_v27 = vld [vmem:[#allocation14 + $0x10] sm:$0xff] }
 0x867   : > { %v1438_v35 = vmul.f32 %v1437_v29, %v3173_v4  ;;  %v1478_v0 = vmul.f32 %v1477_v31, %v3175_v5  ;;  %v1427_v55 = vmul.f32 %v1426_v41, %v3173_v4  ;;  %1741 = vmatpush.bf16.msra.mxu1 %v2267_v21  ;;  %v2266_v28 = vld [vmem:[#allocation14 + $0x50] sm:$0xff]  ;;  %v2265_v41 = vld [vmem:[#allocation14 + $0x48] sm:$0xff] }
 0x868   : > { %v1503_v39 = vmul.f32 2.1237322e-06, %v3198_v32  ;;  %v1514_v1 = vmul.f32 3.8918573e-05, %v3198_v32  ;;  %v1543_v8 = vmul.f32 2.1237322e-06, %v3201_v38  ;;  %v1467_v24 = vmul.f32 %v1466_v59, %v3175_v5  ;;  %1728 = vmatpush.bf16.msrb.mxu0 %v2258_v27 }
 0x869   : > { %v1439_v42 = vadd.f32 0.112945676, %v1438_v35  ;;  %v1479_v43 = vadd.f32 0.112945676, %v1478_v0  ;;  %v1554_v54 = vmul.f32 3.8918573e-05, %v3201_v38 }
 0x86a   : > { %v1504_v17 = vadd.f32 0.00028619796, %v1503_v39  ;;  %v1515_v44 = vadd.f32 0.001143296, %v1514_v1  ;;  %v1544_v6 = vadd.f32 0.00028619796, %v1543_v8 }
 0x86b   : > { %v1440_v45 = vmul.f32 %v1439_v42, %v3173_v4  ;;  %v1480_v51 = vmul.f32 %v1479_v43, %v3175_v5  ;;  %v1555_v7 = vadd.f32 0.001143296, %v1554_v54  ;;  %v1428_v9 = vadd.f32 0.05243302, %v1427_v55  ;;  %1742 = vmatpush.bf16.msra.mxu1 %v2266_v28  ;;  %v2257_v1 = vld [vmem:[#allocation14 + $0x8] sm:$0xff]  ;;  %v2256_v54 = vld [vmem:[#allocation14] sm:$0xff] }
 0x86c   : > { %v1505_v52 = vmul.f32 %v1504_v17, %v3198_v32  ;;  %v1516_v53 = vmul.f32 %v1515_v44, %v3198_v32  ;;  %v1545_v25 = vmul.f32 %v1544_v6, %v3201_v38  ;;  %v1468_v48 = vadd.f32 0.05243302, %v1467_v24  ;;  %1729 = vmatpush.bf16.msrb.mxu0 %v2257_v1  ;;  %v2264_v55 = vld [vmem:[#allocation14 + $0x40] sm:$0xff] }
 0x86d   : > { %v1441_v56 = vadd.f32 0.4994258, %v1440_v45  ;;  %v1481_v57 = vadd.f32 0.4994258, %v1480_v51  ;;  %v1556_v19 = vmul.f32 %v1555_v7, %v3201_v38  ;;  %v1429_v26 = vmul.f32 %v1428_v9, %v3173_v4 }
 0x86e   : > { %v1517_v58 = vadd.f32 0.014752088, %v1516_v53  ;;  %v1506_v60 = vadd.f32 0.0036580483, %v1505_v52  ;;  %v1546_v35 = vadd.f32 0.0036580483, %v1545_v25  ;;  %v1469_v47 = vmul.f32 %v1468_v48, %v3175_v5 }
 0x86f   : > { %v1442_v37 = vmul.f32 %v1441_v56, %v3173_v4  ;;  %v1482_v15 = vmul.f32 %v1481_v57, %v3175_v5  ;;  %v1557_v30 = vadd.f32 0.014752088, %v1556_v19  ;;  %v1430_v39 = vadd.f32 0.18741608, %v1429_v26  ;;  %1743 = vmatpush.bf16.msra.mxu1 %v2265_v41 }
 0x870   : > { %v1518_v3 = vmul.f32 %v1517_v58, %v3198_v32  ;;  %v1507_v22 = vmul.f32 %v1506_v60, %v3198_v32  ;;  %v1547_v51 = vmul.f32 %v1546_v35, %v3201_v38  ;;  %v1470_v11 = vadd.f32 0.18741608, %v1469_v47  ;;  %1730 = vmatpush.bf16.msrb.mxu0 %v2256_v54 }
 0x871   : > { %v3217_v10 = vadd.f32 1.0, %v1442_v37  ;;  %v3219_v16 = vadd.f32 1.0, %v1482_v15  ;;  %v1558_v36 = vmul.f32 %v1557_v30, %v3201_v38  ;;  %v1431_v52 = vmul.f32 %v1430_v39, %v3173_v4 }
 0x872   : > { %v1519_v18 = vadd.f32 0.112945676, %v1518_v3  ;;  %v1508_v31 = vadd.f32 0.05243302, %v1507_v22  ;;  %v1548_v61 = vadd.f32 0.05243302, %v1547_v51 }
 0x873   : > { %2465 = vrcp.f32 %v3217_v10  ;;  %v1559_v46 = vadd.f32 0.112945676, %v1558_v36  ;;  %v1455_v60 = vand.u32 2147483648, %v3217_v10  ;;  %v1432_v15 = vadd.f32 1.1283791, %v1431_v52  ;;  %1744 = vmatpush.bf16.msra.mxu1 %v2264_v55 }
 0x874   : > { %2467 = vrcp.f32 %v3219_v16  ;;  %v1520_v29 = vmul.f32 %v1519_v18, %v3198_v32  ;;  %v1509_v45 = vmul.f32 %v1508_v31, %v3198_v32  ;;  %vm1449_vm2 = vweird.f32 %v3217_v10 }
 0x875   : > { %v1560_v53 = vmul.f32 %v1559_v46, %v3201_v38  ;;  %v1453_v4 = vand.u32 2147483647, %v3217_v10  ;;  %v1456_v19 = vor.u32 1.1754944e-38, %v1455_v60  ;;  %v1549_v21 = vmul.f32 %v1548_v61, %v3201_v38 }
 0x876   : > { %v1521_v33 = vadd.f32 0.4994258, %v1520_v29  ;;  %v1510_v58 = vadd.f32 0.18741608, %v1509_v45  ;;  %v1433_v22 = vmul.f32 %v1432_v15, %v3164_v63  ;;  %v1495_v27 = vand.u32 2147483648, %v3219_v16 }
 0x877   : > { %v1561_v37 = vadd.f32 0.4994258, %v1560_v53  ;;  %vm1454_vm4 = vcmp.eq.f32.partialorder %v1453_v4, 8.507059e+37  ;;  %vm1489_vm6 = vweird.f32 %v3219_v16  ;;  %v1550_v31 = vadd.f32 0.18741608, %v1549_v21 }
 0x878   : > { %v1522_v17 = vmul.f32 %v1521_v33, %v3198_v32  ;;  %v1511_v9 = vmul.f32 %v1510_v58, %v3198_v32  ;;  %v1493_v32 = vand.u32 2147483647, %v3219_v16 }
 0x879   : > { %v2466_v0 = vpop.eup %2465  ;;  %v1562_v3 = vmul.f32 %v1561_v37, %v3201_v38 }
 0x87a   : > { %v3230_v42 = vpop.eup %2467  ;;  %v1445_v43 = vmul.f32 %v2466_v0, %v3217_v10  ;;  %v1523_v50 = vadd.f32 1.0, %v1522_v17  ;;  %vm1450_vm1 = vweird.f32 %v2466_v0  ;;  %v1471_v10 = vmul.f32 %v1470_v11, %v3175_v5 }
 0x87b   : > { %v1485_v44 = vmul.f32 %v3230_v42, %v3219_v16  ;;  %vm1451_vm3 = vmor %vm1449_vm2, %vm1450_vm1  ;;  %v3247_v13 = vadd.f32 1.0, %v1562_v3  ;;  %vm1490_vm5 = vweird.f32 %v3230_v42  ;;  %v1512_v28 = vadd.f32 1.1283791, %v1511_v9 }
 0x87c   : > { %v1446_v8 = vsub.f32 1.0, %v1445_v43  ;;  %2469 = vrcp.f32 %v1523_v50  ;;  %v1533_v63 = vand.u32 2147483647, %v1523_v50  ;;  %v1535_v30 = vand.u32 2147483648, %v1523_v50  ;;  %vm3258_vm7 = vmor %vm1489_vm6, %vm1490_vm5 }
 0x87d   : > { %v1486_v57 = vsub.f32 1.0, %v1485_v44  ;;  %2471 = vrcp.f32 %v3247_v13  ;;  %v1472_v35 = vadd.f32 1.1283791, %v1471_v10  ;;  %vm1494_vm9 = vcmp.eq.f32.partialorder %v1493_v32, 8.507059e+37 }
 0x87e   : > { %v1447_v56 = vmul.f32 %v2466_v0, %v1446_v8  ;;  %vm1529_vm10 = vweird.f32 %v1523_v50  ;;  %v1513_v1 = vmul.f32 %v1512_v28, %v3185_v20  ;;  %vm1534_vm12 = vcmp.eq.f32.partialorder %v1533_v63, 8.507059e+37 }
 0x87f   : > { %v1487_v6 = vmul.f32 %v3230_v42, %v1486_v57  ;;  %v1536_v41 = vor.u32 1.1754944e-38, %v1535_v30  ;;  %v1551_v43 = vmul.f32 %v1550_v31, %v3201_v38  ;;  %v1473_v8 = vmul.f32 %v1472_v35, %v3167_v2 }
 0x880   : > { %v1448_v59 = vadd.f32 %v2466_v0, %v1447_v56  ;;  %v1573_v53 = vand.u32 2147483647, %v3247_v13  ;;  %v1575_v20 = vand.u32 2147483648, %v3247_v13  ;;  %v1413_v38 = vmul.f32 0.5, %v3159_v40 }
 0x881   : > { %v1488_v26 = vadd.f32 %v3230_v42, %v1487_v6  ;;  %v1415_v57 = vmul.f32 0.5, %v3179_v12  ;;  %vm1569_vm14 = vweird.f32 %v3247_v13  ;;  %v1414_v12 = vmul.f32 0.5, %v3161_v62 }
 0x882   : > { %v1452_v7 = vsel %vm1451_vm3, %v2466_v0, %v1448_v59  ;;  %v2470_v18 = vpop.eup %2469  ;;  %v1496_v0 = vor.u32 1.1754944e-38, %v1495_v27  ;;  %v1576_v60 = vor.u32 1.1754944e-38, %v1575_v20  ;;  %vm1574_vm0 = vcmp.eq.f32.partialorder %v1573_v53, 8.507059e+37 }
 0x883   : > { %v1525_v24 = vmul.f32 %v2470_v18, %v1523_v50  ;;  %v1457_v25 = vsel %vm1454_vm4, %v1456_v19, %v1452_v7  ;;  %vm1530_vm8 = vweird.f32 %v2470_v18  ;;  %v1492_v36 = vsel %vm3258_vm7, %v3230_v42, %v1488_v26  ;;  %v2472_v16 = vpop.eup %2471 }
 0x884   : > { %v1458_v5 = vmul.f32 %v1457_v25, %v1433_v22  ;;  %vm1531_vm11 = vmor %vm1529_vm10, %vm1530_vm8  ;;  %v1497_v44 = vsel %vm1494_vm9, %v1496_v0, %v1492_v36  ;;  %v1565_v46 = vmul.f32 %v2472_v16, %v3247_v13  ;;  %v1552_v50 = vadd.f32 1.1283791, %v1551_v43  ;;  %v2422_v22 = vld [vmem:[%s3356_s20] ss:$0 sm:$0xff] }
 0x885   : > { %v1526_v29 = vsub.f32 1.0, %v1525_v24  ;;  %v1498_v52 = vmul.f32 %v1497_v44, %v1473_v8  ;;  %vm1570_vm13 = vweird.f32 %v2472_v16  ;;  %v1416_v9 = vmul.f32 0.5, %v3182_v14 }
 0x886   : > { %v2134_v17 = vclamps-f32 %v1458_v5, 1.0  ;;  %v1566_v51 = vsub.f32 1.0, %v1565_v46  ;;  %v1553_v59 = vmul.f32 %v1552_v50, %v3190_v23  ;;  %vm1571_vm15 = vmor %vm1569_vm14, %vm1570_vm13 }
 0x887   : > { %v1527_v33 = vmul.f32 %v2470_v18, %v1526_v29  ;;  %v2135_v2 = vclamps-f32 %v1498_v52, 1.0 }
 0x888   : > { %v1581_v54 = vadd.f32 1.0, %v2134_v17  ;;  %v1567_v56 = vmul.f32 %v2472_v16, %v1566_v51 }
 0x889   : > { %v1528_v39 = vadd.f32 %v2470_v18, %v1527_v33  ;;  %v1582_v7 = vadd.f32 1.0, %v2135_v2 }
 0x88a   : > { %v1568_v37 = vadd.f32 %v2472_v16, %v1567_v56  ;;  %v1585_v11 = vmul.f32 %v1581_v54, %v1413_v38 }
 0x88b   : > { %v1532_v45 = vsel %vm1531_vm11, %v2470_v18, %v1528_v39  ;;  %v1586_v23 = vmul.f32 %v1582_v7, %v1414_v12 }
 0x88c   : > { %v1537_v42 = vsel %vm1534_vm12, %v1536_v41, %v1532_v45  ;;  %v1572_v15 = vsel %vm1571_vm15, %v2472_v16, %v1568_v37 }
 0x88d   : > { %v1538_v47 = vmul.f32 %v1537_v42, %v1513_v1  ;;  %v1577_v4 = vsel %vm1574_vm0, %v1576_v60, %v1572_v15 }
 0x88e   : > { %v1578_v6 = vmul.f32 %v1577_v4, %v1553_v59 }
 0x88f   : > { %v2136_v55 = vclamps-f32 %v1538_v47, 1.0 }
 0x890   : > { %v2137_v40 = vclamps-f32 %v1578_v6, 1.0 }
 0x891   : > { %v1583_v58 = vadd.f32 1.0, %v2136_v55 }
 0x892   : > { %v1584_v13 = vadd.f32 1.0, %v2137_v40 }
 0x893   : > { %v1587_v61 = vmul.f32 %v1583_v58, %v1415_v57 }
 0x894   : > { %v1588_v18 = vmul.f32 %v1584_v13, %v1416_v9 }
 0x895   : > { %v1589_v3 = vpack.c.bf16 %v1587_v61, %v1585_v11 }
 0x896   : > { %v1590_v19 = vpack.c.bf16 %v1588_v18, %v1586_v23 }
 0x897   : > { %1731 = vmatmul.bf16.vlgmr.msrb.gmra.mxu0 %v1589_v3 }
 0x898   : > { %1745 = vmatmul.bf16.vlgmr.msra.gmra.mxu1 %v1590_v19 }
 0x914   : > { %v1732_v21 = vpop.f32.mrf.mxu0 }
 0x915   : > { %v1733_v10 = vadd.f32 %v2422_v22, %v1732_v21  ;;  %v1746_v24 = vpop.f32.mrf.mxu1 }
 0x917   : > { %v1747_v25 = vadd.f32 %v1746_v24, %v1733_v10 }
 0x919   : > { %v1751_v62 = vadd.f32 %v1747_v25, %v3127_v49 }
 0x91b   : > { %1753 = vst [vmem:[%s570_s22] sm:$0xff] %v1751_v62 }
 0x91c   : > { %v1734_v26 = vpop.f32.mrf.mxu0 }
 0x91d   : > { %v1735_v14 = vadd.f32 %v2422_v22, %v1734_v26  ;;  %v1748_v32 = vpop.f32.mrf.mxu1 }
 0x91f   : > { %v1749_v27 = vadd.f32 %v1748_v32, %v1735_v14 }
 0x921   : > { %v1752_v28 = vadd.f32 %v1749_v27, %v3131_v34 }
 0x923   : > { %1754 = vst [vmem:[%s570_s22 + $0x8] sm:$0xff] %v1752_v28 }
 0x924   : > { %2740 = shalt.err (!%p2737_p9)
}
 0x925   : > { %s2814_s18 = smov 128   ;;  %s2815_s22 = smov 8  }
 0x926   : > { %2303 = dma.vmem_to_hbm [thread:$0]  (%p2985_p13), %s1769_s1, 256, %s1771_s17, %s1756_s15, %s2814_s18, %s2814_s18, %s2815_s22  }
 0x927 PF: > { %s1785_s13 = sand.u32 1, %s2783_s25   ;;  %p3358_p10 = scmp.ge.s32.totalorder %s2795_s28, 2 }
 0x928   : > { %s1786_s29 = scalar_lea.sflag [#allocation4], %s1785_s13 }
 0x929   : > { %p2332_p11 = pnand %p3358_p10, %p2990_p5 }
 0x92b   : > { %p2333_p0 = pneg %p2332_p11 }
 0x92d   : > { %2778 = dma.done.wait (%p2333_p0), %s1786_s29, 256  }
 0x92e   : > { %2780 = vsyncadd (%p2333_p0), %s1786_s29, 4294967040  ;;  %p30_p2 = scmp.ge.s32.totalorder %s2965_s12, 4   ;;  %s3359_s25 = smov %s2787_s26 }
 0x92f   : > { %s3360_s26 = smov %s2791_s27  ;;  %s3361_s27 = smov %s2977_s10 }
 0x930   : > { %s3362_s28 = smov %s2965_s12  ;;  %32 = sbr.rel (!%p30_p2) target bundleno = 17 (0x11), region = 145 }
 0x935   :  { %1792 = vsyncpa [#allocation3], 1 }
 0x936   :  { %1794 = vsyncpa [#allocation3 + $0x1], 1 }
 0x937   :  { %1795 = vsyncpa [#allocation6], 1 }
 0x938   :  { %1796 = vsyncpa [#allocation9], 1 }
 0x939   :  { %1797 = vsyncpa [#allocation12], 1 }
 0x93a   :  { %1798 = vsyncpa [#allocation15], 1 }
 0x93b   :  { %1799 = vsyncpa [#allocation4], 1 }
 0x93c   :  { %1801 = vsyncpa [#allocation4 + $0x1], 1 }

// kernel: tpu_custom_call.1
= control target key start
LH: loop header
LB: loop body
LE: loop exit
PB: predicated region body
PF: predicated region fallthrough
CT: control target
= control target key end

     0   :  { %s3317_s0 = inlined_call_operand.hbm [shape: f32[2,16,128], index: 0, kind: input, shape index: {}]   ;;  %s3318_s1 = inlined_call_operand.hbm [shape: f32[1,128], index: 1, kind: input, shape index: {}]   ;;  %s3319_s2 = inlined_call_operand.hbm [shape: f32[1,128], index: 2, kind: input, shape index: {}]   ;;  %s3320_s3 = inlined_call_operand.hbm [shape: bf16[128,384], index: 3, kind: input, shape index: {}]   ;;  %s3321_s4 = inlined_call_operand.vmem [shape: f32[1,384], index: 4, kind: input, shape index: {}]   ;;  %s3322_s5 = inlined_call_operand.hbm [shape: bf16[128,128], index: 5, kind: input, shape index: {}]   ;;  %s3323_s6 = inlined_call_operand.hbm [shape: f32[1,128], index: 6, kind: input, shape index: {}]   ;;  %s3324_s7 = inlined_call_operand.vmem [shape: f32[1,128], index: 7, kind: input, shape index: {}]   ;;  %s3325_s8 = inlined_call_operand.vmem [shape: f32[1,128], index: 8, kind: input, shape index: {}]   ;;  %s3326_s9 = inlined_call_operand.hbm [shape: bf16[128,256], index: 9, kind: input, shape index: {}]   ;;  %s3327_s10 = inlined_call_operand.vmem [shape: f32[1,256], index: 10, kind: input, shape index: {}]   ;;  %s3328_s11 = inlined_call_operand.hbm [shape: bf16[256,128], index: 11, kind: input, shape index: {}]   ;;  %s3329_s12 = inlined_call_operand.vmem [shape: f32[1,128], index: 12, kind: input, shape index: {}]   ;;  %s3330_s13 = inlined_call_operand.hbm [shape: f32[2,16,128], index: 13, kind: output, shape index: {}]  }
   0x1   :  { %3334 = sst [smem:[#allocation23_spill]] %s3318_s1 }
   0x2   :  { %3335 = sst [smem:[#allocation24_spill]] %s3319_s2 }
   0x3   :  { %3336 = sst [smem:[#allocation25_spill]] %s3320_s3 }
   0x4   :  { %3337 = sst [smem:[#allocation26_spill]] %s3322_s5 }
   0x5   :  { %3338 = sst [smem:[#allocation27_spill]] %s3327_s10 }
   0x6   :  { %3339 = sst [smem:[#allocation28_spill]] %s3329_s12 }
   0x7   :  { %3340 = sst [smem:[#allocation29_spill]] %s3330_s13 }
   0x8   :  { %18 = vsyncpa [#allocation3], 0 }
   0x9   :  { %20 = vsyncpa [#allocation3 + $0x1], 0 }
   0xa   :  { %21 = vsyncpa [#allocation6], 0 }
   0xb   :  { %22 = vsyncpa [#allocation9], 0 }
   0xc   :  { %23 = vsyncpa [#allocation12], 0 }
   0xd   :  { %24 = vsyncpa [#allocation15], 0 }
   0xe   :  { %25 = vsyncpa [#allocation4], 0 }
   0xf   :  { %27 = vsyncpa [#allocation4 + $0x1], 0  ;;  %s2886_s25 = smov 0   ;;  %s2888_s26 = smov 0  }
  0x10   :  { %s2890_s27 = smov 0   ;;  %s2892_s28 = smov 0  }
  0x11 LB: > { %s3341_s1 = sld [smem:[#allocation23_spill]]  ;;  %s2910_s15 = sadd.s32 4294967295, %s2795_s28   ;;  %s2795_s28 = sphi %s2892_s28, %s3362_s28   ;;  %s2791_s27 = sphi %s2890_s27, %s3361_s27   ;;  %s2787_s26 = sphi %s2888_s26, %s3360_s26   ;;  %s2783_s25 = sphi %s2886_s25, %s3359_s25  }
  0x12   : > { %p1912_p0 = scmp.ge.s32.totalorder %s2795_s28, 1  ;;  %p54_p1 = scmp.eq.s32.totalorder %s2910_s15, 0 }
  0x13   : > { %p342_p2 = scmp.lt.s32.totalorder %s2795_s28, 3  ;;  %s2797_s17 = smov [#allocation5]  }
  0x14   : > { %s356_s18 = sshll.u32 %s2797_s17, 4  ;;  %s3343_s3 = sld [smem:[#allocation25_spill]]  ;;  %s357_s18 = int_to_ptr.vmem [resolvable:$true] %s356_s18 }
  0x15   : > { %p2915_p3 = pnand %p1912_p0, %p342_p2  ;;  %s2798_s23 = smov [#allocation8]  }
  0x16   : > { %s379_s24 = sshll.u32 %s2798_s23, 4  ;;  %s2799_s29 = smov 192   ;;  %s380_s24 = int_to_ptr.vmem [resolvable:$true] %s379_s24 }
  0x17   : > { %s354_s14 = sshll.u32 %s3341_s1, 4  ;;  %p2305_p5 = pneg %p2915_p3  ;;  %s355_s14 = int_to_ptr.hbm [resolvable:$true] %s354_s14 }
  0x18   : > { %s2800_s30 = smov 12   ;;  %s409_s20 = sshll.u32 %s3323_s6, 4  ;;  %s410_s20 = int_to_ptr.hbm [resolvable:$true] %s409_s20 }
  0x19   : > { %p2927_p6 = pnand %p2305_p5, %p54_p1  ;;  %s2801_s1 = smov [#allocation11]  }
  0x1a   : > { %s377_s21 = sshll.u32 %s3343_s3, 4  ;;  %s411_s3 = sshll.u32 %s2801_s1, 4  ;;  %s378_s21 = int_to_ptr.hbm [resolvable:$true] %s377_s21  ;;  %s412_s3 = int_to_ptr.vmem [resolvable:$true] %s411_s3 }
  0x1b   : > { %2308 = dma.hbm_to_vmem [thread:$0]  (!%p2927_p6), %s355_s14, 16, %s357_s18, [#allocation6]  }
  0x1c   : > { %2314 = dma.hbm_to_vmem [thread:$0]  (!%p2927_p6), %s378_s21, 3072, %s380_s24, [#allocation9], %s2799_s29, %s2799_s29, %s2800_s30  }
  0x1d   : > { %s3345_s2 = sld [smem:[#allocation24_spill]]  ;;  %s2802_s14 = smov [#allocation7]  }
  0x1e   : > { %2320 = dma.hbm_to_vmem [thread:$0]  (!%p2927_p6), %s410_s20, 16, %s412_s3, [#allocation12]  }
  0x1f   : > { %s368_s18 = sshll.u32 %s2802_s14, 4  ;;  %s3346_s5 = sld [smem:[#allocation26_spill]]  ;;  %s369_s18 = int_to_ptr.vmem [resolvable:$true] %s368_s18 }
  0x20   : > { %s2803_s1 = smov [#allocation10]   ;;  %s426_s30 = sshll.u32 %s3326_s9, 4  ;;  %s427_s30 = int_to_ptr.hbm [resolvable:$true] %s426_s30 }
  0x21   : > { %s396_s29 = sshll.u32 %s2803_s1, 4  ;;  %s2804_s3 = smov 64   ;;  %s397_s29 = int_to_ptr.vmem [resolvable:$true] %s396_s29 }
  0x22   : > { %s2805_s17 = smov 4   ;;  %s2806_s10 = smov [#allocation13]  }
  0x23   : > { %s366_s23 = sshll.u32 %s3345_s2, 4  ;;  %s428_s19 = sshll.u32 %s2806_s10, 4  ;;  %s367_s23 = int_to_ptr.hbm [resolvable:$true] %s366_s23  ;;  %s429_s19 = int_to_ptr.vmem [resolvable:$true] %s428_s19 }
  0x24   : > { %2311 = dma.hbm_to_vmem [thread:$0]  (!%p2927_p6), %s367_s23, 16, %s369_s18, [#allocation6]  }
  0x25   : > { %s394_s24 = sshll.u32 %s3346_s5, 4  ;;  %s3332_s20 = smov 128   ;;  %s395_s24 = int_to_ptr.hbm [resolvable:$true] %s394_s24 }
  0x26   : > { %2317 = dma.hbm_to_vmem [thread:$0]  (!%p2927_p6), %s395_s24, 1024, %s397_s29, [#allocation9], %s2804_s3, %s2804_s3, %s2805_s17  }
  0x27   : > { %s3333_s23 = smov 8   ;;  %s443_s21 = sshll.u32 %s3328_s11, 4  ;;  %s444_s21 = int_to_ptr.hbm [resolvable:$true] %s443_s21 }
  0x28   : > { %2323 = dma.hbm_to_vmem [thread:$0]  (!%p2927_p6), %s427_s30, 2048, %s429_s19, [#allocation12], %s3332_s20, %s3332_s20, %s3333_s23  }
  0x29   : > { %s2809_s24 = smov [#allocation14]   ;;  %s1911_s29 = sadd.s32 4294967294, %s2795_s28  }
  0x2a   : > { %s445_s1 = sshll.u32 %s2809_s24, 4  ;;  %s2965_s12 = sadd.s32 1, %s2795_s28   ;;  %s446_s1 = int_to_ptr.vmem [resolvable:$true] %s445_s1 }
  0x2b   : > { %2326 = dma.hbm_to_vmem [thread:$0]  (!%p2927_p6), %s444_s21, 2048, %s446_s1, [#allocation15], %s2804_s3, %s2804_s3, %s2805_s17  }
  0x2c   : > { %s40_s13 = sadd.s32 1, %s2791_s27  ;;  %s37_s30 = ssub.s32 %s2795_s28, %s2965_s12 }
  0x2d   : > { %p47_p7 = scmp.ne.s32.totalorder %s2791_s27, %s2787_s26  ;;  %p38_p8 = scmp.eq.s32.totalorder %s37_s30, 0 }
  0x2e   : > { %p48_p9 = scmp.eq.s32.totalorder %s2795_s28, 0  ;;  %p53_p10 = scmp.ne.s32.totalorder %s2787_s26, %s2783_s25 }
  0x2f   : > { %p329_p11 = scmp.eq.s32.totalorder %s2910_s15, 1  ;;  %p335_p0 = scmp.eq.s32.totalorder %s1911_s29, 1 }
  0x30   : > { %s2977_s10 = scalar_select %p38_p8, %s2791_s27, %s40_s13  }
  0x31   : > { %p2981_p12 = por %p54_p1, %p53_p10  ;;  %p2985_p13 = por %p329_p11, %p47_p7 }
  0x32   : > { %p49_p2 = por %p48_p9, %p47_p7  ;;  %s462_s17 = sand.u32 1, %s2791_s27  }
  0x33   : > { %p2990_p5 = por %p335_p0, %p53_p10  ;;  %p2342_p6 = scmp.lt.s32.totalorder %s2795_s28, 2 }
  0x34   : > { %s1921_s14 = sshll.u32 %s462_s17, 4  ;;  %s2207_s18 = sshll.u32 %s2795_s28, 4 }
  0x35   : > { %s471_s1 = scalar_lea.hbm %s3317_s0, %s2207_s18  ;;  %s466_s30 = scalar_lea.vmem [#allocation2], %s1921_s14 }
  0x36   : > { %s472_s13 = sshll.u32 %s471_s1, 4  ;;  %s474_s20 = sshll.u32 %s466_s30, 4  ;;  %s473_s13 = int_to_ptr.hbm [resolvable:$true] %s472_s13  ;;  %s475_s20 = int_to_ptr.vmem [resolvable:$true] %s474_s20 }
  0x37   : > { %p2999_p8 = pnand %p2342_p6, %p49_p2  ;;  %s463_s23 = scalar_lea.sflag [#allocation3], %s462_s17 }
  0x38   : > { %s2683_s2 = sshra.s32 %s473_s13, 4  ;;  %s2690_s14 = scalar_lea.hbm %s3317_s0, 32  ;;  %s2684_s2 = int_to_ptr.hbm [resolvable:$true] %s2683_s2 }
  0x39   : > { %s2685_s5 = scalar_lea.hbm %s2684_s2, 16  ;;  %p2687_p9 = pneg %p2999_p8 }
  0x3a   : > { %p2686_p7 = scmp.ne.s32.totalorder %s2684_s2, %s2685_s5  ;;  %p2691_p0 = scmp.lt.s32.totalorder %s2684_s2, %s3317_s0 }
  0x3b   : > { %p2692_p2 = scmp.lt.s32.totalorder %s2690_s14, %s2685_s5 }
  0x3c   : > { %p2688_p10 = pnand %p2687_p9, %p2686_p7 }
  0x3d   : > { %p2693_p6 = por %p2692_p2, %p2691_p0 }
  0x3e   : > { %p2689_p11 = pneg %p2688_p10 }
  0x40   : > { %p2694_p4 = pnand %p2693_p6, %p2689_p11 }
  0x42   : > { %2697 = shalt.err (!%p2694_p4)
}
  0x43   : > { %s3351_s17 = smov 8   ;;  %s3352_s30 = smov 128  }
  0x44   : > { %2330 = dma.hbm_to_vmem [thread:$0]  (!%p2999_p8), %s473_s13, 256, %s475_s20, %s463_s23, %s3352_s30, %s3352_s30, %s3351_s17  }
  0x45   : > { %486 = sbr.rel (%p2915_p3) target bundleno = 2343 (0x927), region = 72  ;;  %s3019_s18 = sand.u32 (!%p2915_p3), 1, %s2787_s26  }
  0x46   : > { %s1925_s2 = sshll.u32 (!%p2915_p3), %s3019_s18, 4  ;;  %s489_s5 = scalar_lea.sflag (!%p2915_p3), [#allocation3], %s3019_s18 }
  0x47   : > { %s492_s21 = scalar_lea.vmem (!%p2915_p3), [#allocation2], %s1925_s2 }
  0x4a   : > { %2758 = dma.done.wait (%p2981_p12), %s489_s5, 256  }
  0x4b   : > { %2760 = vsyncadd (%p2981_p12), %s489_s5, 4294967040 }
  0x4c   : > { %2762 = dma.done.wait (%p54_p1), [#allocation6], 32  }
  0x4d   : > { %2764 = vsyncadd (%p54_p1), [#allocation6], 4294967264 }
  0x4e   : > { %2766 = dma.done.wait (%p54_p1), [#allocation9], 4096  }
  0x4f   : > { %2768 = vsyncadd (%p54_p1), [#allocation9], 4294963200 }
  0x50   : > { %2770 = dma.done.wait (%p54_p1), [#allocation12], 2064  }
  0x51   : > { %2772 = vsyncadd (%p54_p1), [#allocation12], 4294965232 }
  0x52   : > { %2774 = dma.done.wait (%p54_p1), [#allocation15], 2048  }
  0x53   : > { %2776 = vsyncadd (%p54_p1), [#allocation15], 4294965248  ;;  %v3045_v0 = vld [vmem:[%s492_s21] sm:$0xff]  ;;  %v3048_v1 = vld [vmem:[%s492_s21 + $0x8] sm:$0xff]  ;;  %v2810_v2 = vmov 128.0   ;;  %vm847_vm7 = vcmask 261120  }
  0x54   : > { %576 = vadd.xlane.f32.xlu0 %v3045_v0  ;;  %2423 = vrcp.f32 %v2810_v2  ;;  %v2020_v17 = vld [vmem:[#allocation8 + $0xa8] sm:$0xf]  ;;  %v2230_v18 = vld [vmem:[#allocation8 + $0xb0] sm:$0xf0]  ;;  %v2229_v19 = vld [vmem:[#allocation8 + $0xac] sm:$0xf] }
  0x55   : > { %v2021_v20 = vor.u32 %v2230_v18, %v2020_v17  ;;  %v2022_v21 = vld [vmem:[#allocation8 + $0xb4] sm:$0xf0]  ;;  %v2028_v22 = vld [vmem:[#allocation8 + $0xb0] sm:$0xf]  ;;  %v2231_v23 = vld [vmem:[#allocation8 + $0xb8] sm:$0xf0] }
  0x56   : > { %v2025_v24 = vor.u32 %v2229_v19, %v2022_v21  ;;  %v2029_v25 = vor.u32 %v2231_v23, %v2028_v22  ;;  %v2008_v26 = vld [vmem:[#allocation8 + $0x90] sm:$0xf]  ;;  %v2227_v27 = vld [vmem:[#allocation8 + $0x98] sm:$0xf0]  ;;  %v2226_v28 = vld [vmem:[#allocation8 + $0x94] sm:$0xf] }
  0x57   : > { %802 = vmatpush.bf16.msra.mxu0 %v2021_v20  ;;  %v2009_v29 = vor.u32 %v2227_v27, %v2008_v26  ;;  %v2010_v30 = vld [vmem:[#allocation8 + $0x9c] sm:$0xf0]  ;;  %v2016_v31 = vld [vmem:[#allocation8 + $0x98] sm:$0xf]  ;;  %v2228_v32 = vld [vmem:[#allocation8 + $0xa0] sm:$0xf0] }
  0x58   : > { %816 = vmatpush.bf16.msra.mxu1 %v2025_v24  ;;  %830 = vmatpush.bf16.msra.mxu2 %v2029_v25  ;;  %v2013_v33 = vor.u32 %v2226_v28, %v2010_v30  ;;  %v2017_v34 = vor.u32 %v2228_v32, %v2016_v31  ;;  %v1996_v35 = vld [vmem:[#allocation8 + $0x78] sm:$0xf]  ;;  %v2224_v36 = vld [vmem:[#allocation8 + $0x80] sm:$0xf0]  ;;  %v2223_v37 = vld [vmem:[#allocation8 + $0x7c] sm:$0xf] }
  0x59   : > { %v1997_v38 = vor.u32 %v2224_v36, %v1996_v35  ;;  %v1998_v39 = vld [vmem:[#allocation8 + $0x84] sm:$0xf0]  ;;  %v2004_v40 = vld [vmem:[#allocation8 + $0x80] sm:$0xf]  ;;  %v2225_v41 = vld [vmem:[#allocation8 + $0x88] sm:$0xf0] }
  0x5a   : > { %v2424_v3 = vpop.eup %2423  ;;  %v2001_v42 = vor.u32 %v2223_v37, %v1998_v39  ;;  %v2005_v43 = vor.u32 %v2225_v41, %v2004_v40  ;;  %v1984_v44 = vld [vmem:[#allocation8 + $0x60] sm:$0xf]  ;;  %v2221_v45 = vld [vmem:[#allocation8 + $0x68] sm:$0xf0]  ;;  %v2220_v46 = vld [vmem:[#allocation8 + $0x64] sm:$0xf] }
  0x5b   : > { %v581_v4 = vmul.f32 128.0, %v2424_v3  ;;  %vm585_vm0 = vweird.f32 %v2424_v3  ;;  %803 = vmatpush.bf16.msra.mxu0 %v2009_v29  ;;  %v1985_v47 = vor.u32 %v2221_v45, %v1984_v44  ;;  %v1986_v48 = vld [vmem:[#allocation8 + $0x6c] sm:$0xf0]  ;;  %v1992_v49 = vld [vmem:[#allocation8 + $0x68] sm:$0xf]  ;;  %s2811_s23 = smov 96  }
  0x5c   : > { %578 = vadd.xlane.f32.xlu0 %v3048_v1  ;;  %817 = vmatpush.bf16.msra.mxu1 %v2013_v33  ;;  %v2222_v50 = vld [vmem:[#allocation8 + $0x70] sm:$0xf0]  ;;  %v1989_v51 = vor.u32 %v2220_v46, %v1986_v48  ;;  %v1972_v53 = vld [vmem:[#allocation8 + $0x48] sm:$0xf]  ;;  %v2217_v55 = vld [vmem:[#allocation8 + $0x4c] sm:$0xf] }
  0x5d   : > { %v582_v5 = vsub.f32 1.0, %v581_v4  ;;  %831 = vmatpush.bf16.msra.mxu2 %v2017_v34  ;;  %v1993_v52 = vor.u32 %v2222_v50, %v1992_v49  ;;  %v2218_v54 = vld [vmem:[#allocation8 + $0x50] sm:$0xf0]  ;;  %v1974_v57 = vld [vmem:[#allocation8 + $0x54] sm:$0xf0]  ;;  %vm868_vm8 = vcmask 130048  }
  0x5e   : > { %v1973_v56 = vor.u32 %v2218_v54, %v1972_v53  ;;  %v1980_v58 = vld [vmem:[#allocation8 + $0x50] sm:$0xf]  ;;  %v2219_v59 = vld [vmem:[#allocation8 + $0x58] sm:$0xf0]  ;;  %v1977_v60 = vor.u32 %v2217_v55, %v1974_v57  ;;  %v2214_v2 = vld [vmem:[#allocation8 + $0x34] sm:$0xf] }
  0x5f   : > { %v583_v6 = vmul.f32 %v2424_v3, %v582_v5  ;;  %804 = vmatpush.bf16.msra.mxu0 %v1997_v38  ;;  %v1981_v61 = vor.u32 %v2219_v59, %v1980_v58  ;;  %v1960_v62 = vld [vmem:[#allocation8 + $0x30] sm:$0xf]  ;;  %v2215_v63 = vld [vmem:[#allocation8 + $0x38] sm:$0xf0]  ;;  %v1962_v4 = vld [vmem:[#allocation8 + $0x3c] sm:$0xf0] }
  0x60   : > { %818 = vmatpush.bf16.msra.mxu1 %v2001_v42  ;;  %v1968_v5 = vld [vmem:[#allocation8 + $0x38] sm:$0xf]  ;;  %v1956_v17 = vld [vmem:[#allocation8 + $0x20] sm:$0xf]  ;;  %v2213_v18 = vld [vmem:[#allocation8 + $0x28] sm:$0xf0] }
  0x61   : > { %v584_v7 = vadd.f32 %v2424_v3, %v583_v6  ;;  %832 = vmatpush.bf16.msra.mxu2 %v2005_v43  ;;  %v2216_v6 = vld [vmem:[#allocation8 + $0x40] sm:$0xf0]  ;;  %v1957_v20 = vor.u32 %v2213_v18, %v1956_v17  ;;  %v1936_v21 = vld [vmem:[#allocation8] sm:$0xf]  ;;  %v2209_v22 = vld [vmem:[#allocation8 + $0x8] sm:$0xf0] }
  0x62   : > { %v2208_v23 = vld [vmem:[#allocation8 + $0x4] sm:$0xf]  ;;  %v1937_v25 = vor.u32 %v2209_v22, %v1936_v21  ;;  %v1938_v26 = vld [vmem:[#allocation8 + $0xc] sm:$0xf0]  ;;  %v1944_v27 = vld [vmem:[#allocation8 + $0x8] sm:$0xf] }
  0x63   : > { %v3051_v8 = vsel %vm585_vm0, %v2424_v3, %v584_v7  ;;  %805 = vmatpush.bf16.msra.mxu0 %v1985_v47  ;;  %v1961_v3 = vor.u32 %v2215_v63, %v1960_v62  ;;  %v1965_v7 = vor.u32 %v2214_v2, %v1962_v4  ;;  %v2210_v28 = vld [vmem:[#allocation8 + $0x10] sm:$0xf0]  ;;  %v1941_v30 = vor.u32 %v2208_v23, %v1938_v26  ;;  %v2417_v49 = vld [vmem:[#allocation5] ss:$0 sm:$0xff]  ;;  %v2418_v54 = vld [vmem:[#allocation7] ss:$0 sm:$0xff] }
  0x64   : > { %819 = vmatpush.bf16.msra.mxu1 %v1989_v51  ;;  %v1945_v31 = vor.u32 %v2210_v28, %v1944_v27  ;;  %s2812_s22 = smov 32   ;;  %s2813_s13 = smov 64   ;;  %vm1139_vm9 = vcmask 523264   ;;  %vm1142_vm10 = vcmask 785408  }
  0x65   : > { %833 = vmatpush.bf16.msra.mxu2 %v1993_v52  ;;  %s3353_s5 = sld [smem:[#allocation27_spill]] }
  0x66   : > { %s3356_s20 = sld [smem:[#allocation28_spill]] }
  0x67   : > { %806 = vmatpush.bf16.msra.mxu0 %v1973_v56  ;;  %s3357_s14 = sld [smem:[#allocation29_spill]] }
  0x68   : > { %820 = vmatpush.bf16.msra.mxu1 %v1977_v60 }
  0x69   : > { %834 = vmatpush.bf16.msra.mxu2 %v1981_v61 }
  0x6b   : > { %807 = vmatpush.bf16.msra.mxu0 %v1961_v3 }
  0x6c   : > { %821 = vmatpush.bf16.msra.mxu1 %v1965_v7 }
  0x6d   : > { %s2733_s16 = scalar_lea.hbm %s3357_s14, 32 }
  0xc7   : > { %v577_v9 = vpop.xlane.xlu0 %576 }
  0xc8   : > { %v587_v10 = vmul.f32 %v3051_v8, %v577_v9  ;;  %v1969_v9 = vor.u32 %v2216_v6, %v1968_v5 }
  0xca   : > { %v3055_v11 = vsub.f32 %v3045_v0, %v587_v10  ;;  %835 = vmatpush.bf16.msra.mxu2 %v1969_v9  ;;  %v1948_v10 = vld [vmem:[#allocation8 + $0x18] sm:$0xf] }
  0xcc   : > { %v591_v12 = vmul.f32 %v3055_v11, %v3055_v11 }
  0xce   : > { %593 = vadd.xlane.f32.xlu1 %v591_v12  ;;  %v2212_v12 = vld [vmem:[#allocation8 + $0x20] sm:$0xf0]  ;;  %836 = vmatpush.bf16.msra.mxu2 %v1957_v20 }
  0xcf   : > { %v579_v13 = vpop.xlane.xlu0 %578 }
  0xd0   : > { %v588_v14 = vmul.f32 %v3051_v8, %v579_v13  ;;  %v2211_v13 = vld [vmem:[#allocation8 + $0x1c] sm:$0xf] }
  0xd2   : > { %v3061_v15 = vsub.f32 %v3048_v1, %v588_v14  ;;  %v1949_v14 = vor.u32 %v2212_v12, %v1948_v10  ;;  %837 = vmatpush.bf16.msra.mxu2 %v1945_v31 }
  0xd4   : > { %v592_v16 = vmul.f32 %v3061_v15, %v3061_v15  ;;  %808 = vmatpush.bf16.msra.mxu0 %v1949_v14 }
  0xd6   : > { %595 = vadd.xlane.f32.xlu1 %v592_v16  ;;  %v1950_v16 = vld [vmem:[#allocation8 + $0x24] sm:$0xf0] }
  0xd7   : > { %v1953_v19 = vor.u32 %v2211_v13, %v1950_v16 }
  0xd8   : > { %809 = vmatpush.bf16.msra.mxu0 %v1937_v25 }
  0xd9   : > { %822 = vmatpush.bf16.msra.mxu1 %v1953_v19 }
  0xdd   : > { %823 = vmatpush.bf16.msra.mxu1 %v1941_v30 }
 0x141   : > { %v594_v24 = vpop.xlane.xlu1 %593 }
 0x142   : > { %v597_v29 = vmul.f32 %v594_v24, %v3051_v8 }
 0x144   : > { %v599_v32 = vadd.f32 1e-05, %v597_v29 }
 0x146   : > { %2425 = vrsqrt.f32 %v599_v32  ;;  %vm607_vm2 = vweird.f32 %v599_v32 }
 0x149   : > { %v596_v33 = vpop.xlane.xlu1 %595 }
 0x14a   : > { %v598_v34 = vmul.f32 %v596_v33, %v3051_v8 }
 0x14c   : > { %v2426_v35 = vpop.eup %2425  ;;  %v600_v36 = vadd.f32 1e-05, %v598_v34 }
 0x14d   : > { %v602_v37 = vmul.f32 %v2426_v35, %v599_v32  ;;  %vm608_vm1 = vweird.f32 %v2426_v35 }
 0x14e   : > { %2427 = vrsqrt.f32 %v600_v36  ;;  %vm609_vm3 = vmor %vm607_vm2, %vm608_vm1  ;;  %vm617_vm5 = vweird.f32 %v600_v36 }
 0x14f   : > { %v603_v38 = vmul.f32 %v2426_v35, %v602_v37 }
 0x151   : > { %v604_v39 = vmul.f32 0.5, %v603_v38 }
 0x153   : > { %v605_v40 = vsub.f32 1.5, %v604_v39 }
 0x154   : > { %v2428_v41 = vpop.eup %2427 }
 0x155   : > { %v606_v42 = vmul.f32 %v2426_v35, %v605_v40  ;;  %v612_v43 = vmul.f32 %v2428_v41, %v600_v36  ;;  %vm618_vm4 = vweird.f32 %v2428_v41 }
 0x156   : > { %vm619_vm6 = vmor %vm617_vm5, %vm618_vm4 }
 0x157   : > { %v613_v44 = vmul.f32 %v2428_v41, %v612_v43  ;;  %v610_v45 = vsel %vm609_vm3, %v2426_v35, %v606_v42 }
 0x158   : > { %v621_v48 = vmul.f32 %v610_v45, %v3055_v11  ;;  %v666_v11 = vld [vmem:[%s3321_s4] sm:$0x7] }
 0x159   : > { %v614_v46 = vmul.f32 0.5, %v613_v44  ;;  %v668_v61 = vperm.slane %v666_v11, 0  ;;  %v669_v62 = vperm.slane %v666_v11, 1  ;;  %v670_v10 = vperm.slane %v666_v11, 2 }
 0x15a   : > { %v626_v53 = vmul.f32 %v2417_v49, %v621_v48 }
 0x15b   : > { %v615_v47 = vsub.f32 1.5, %v614_v46 }
 0x15c   : > { %v631_v56 = vadd.f32 %v2418_v54, %v626_v53 }
 0x15d   : > { %v616_v50 = vmul.f32 %v2428_v41, %v615_v47 }
 0x15f   : > { %v620_v51 = vsel %vm619_vm6, %v2428_v41, %v616_v50 }
 0x160   : > { %v622_v52 = vmul.f32 %v620_v51, %v3061_v15 }
 0x162   : > { %v627_v55 = vmul.f32 %v2417_v49, %v622_v52 }
 0x164   : > { %v632_v57 = vadd.f32 %v2418_v54, %v627_v55 }
 0x166   : > { %v633_v58 = vpack.c.bf16 %v632_v57, %v631_v56 }
 0x168   : > { %810 = vmatmul.bf16.vlgmr.msra.gmra.mxu0 %v633_v58  ;;  %824 = vmatmul.bf16.vlgmr.msra.gmra.mxu1 %v633_v58 }
 0x169   : > { %838 = vmatmul.bf16.vlgmr.msra.gmra.mxu2 %v633_v58 }
 0x1e5   : > { %v811_v59 = vpop.f32.mrf.mxu0  ;;  %v825_v60 = vpop.f32.mrf.mxu1 }
 0x1e6   : > { %v812_v3 = vadd.f32 %v811_v59, %v668_v61  ;;  %v826_v4 = vadd.f32 %v825_v60, %v669_v62 }
 0x1ec   : > { %v839_v63 = vpop.f32.mrf.mxu2 }
 0x1ed   : > { %v813_v2 = vpop.f32.mrf.mxu0  ;;  %v827_v15 = vpop.f32.mrf.mxu1  ;;  %v840_v14 = vadd.f32 %v839_v63, %v670_v10 }
 0x1ee   : > { %v814_v5 = vadd.f32 %v813_v2, %v668_v61  ;;  %v828_v6 = vadd.f32 %v827_v15, %v669_v62 }
 0x1f0   : > { %v844_v7 = vpack.c.bf16 %v814_v5, %v812_v3  ;;  %v845_v9 = vpack.c.bf16 %v828_v6, %v826_v4 }
 0x1f2   : > { %910 = vrot.lane.b32.xlu0 %v844_v7, %s2811_s23  ;;  %v852_v12 = vsel %vm847_vm7, %v845_v9, 0 }
 0x1f3   : > { %861 = vmatpush.bf16.xpose.msra.mxu3 %v852_v12 }
 0x1f4   : > { %v841_v13 = vpop.f32.mrf.mxu2 }
 0x1f5   : > { %v842_v16 = vadd.f32 %v841_v13, %v670_v10 }
 0x1f7   : > { %v3074_v17 = vpack.c.bf16 %v842_v16, %v840_v14 }
 0x1fa   : > { %2030 = vmatmul.msk.bf16.vlgmr.msra.gmra.mxu3 %vm847_vm7, %v844_v7 }
 0x1fb   : > { %902 = vmatpush.bf16.msrb.mxu3 %v3074_v17 }
 0x264   : > { %v911_v34 = vpop.permute.xlu0 %910 }
 0x27d   : > { %v863_v18 = vpop.f32.mrf.mxu3 }
 0x27e   : > { %v869_v19 = vsel %vm868_vm8, %v863_v18, -inf }
 0x27f   : > { %870 = vmax.xlane.f32.xlu2 %v869_v19 }
 0x285   : > { %v865_v20 = vpop.f32.mrf.mxu3 }
 0x286   : > { %v872_v21 = vsel %vm868_vm8, %v865_v20, -inf }
 0x287   : > { %873 = vmax.xlane.f32.xlu2 %v872_v21 }
 0x29f   : > { %913 = vrot.lane.b32.xlu2 %v845_v9, %s2811_s23 }
 0x2a7   : > { %1048 = vrot.lane.b32.xlu2 %v845_v9, %s2812_s22 }
 0x2af   : > { %1046 = vrot.lane.b32.xlu2 %v844_v7, %s2812_s22 }
 0x2f2   : > { %v871_v22 = vpop.xlane.xlu2 %870 }
 0x2f3   : > { %v875_v23 = vsub.f32 %v863_v18, %v871_v22 }
 0x2f5   : > { %v877_v24 = vmul.f32 1.442695, %v875_v23 }
 0x2f7   : > { %2429 = vpow2.f32 %v877_v24 }
 0x2fa   : > { %v874_v25 = vpop.xlane.xlu2 %873 }
 0x2fb   : > { %v876_v26 = vsub.f32 %v865_v20, %v874_v25 }
 0x2fd   : > { %v2430_v27 = vpop.eup %2429  ;;  %v879_v28 = vmul.f32 1.442695, %v876_v26 }
 0x2fe   : > { %v881_v29 = vsel %vm868_vm8, %v2430_v27, 0.0 }
 0x2ff   : > { %2431 = vpow2.f32 %v879_v28  ;;  %882 = vadd.xlane.f32.xlu0 %v881_v29 }
 0x302   : > { %v914_v30 = vpop.permute.xlu2 %913 }
 0x303   : > { %v919_v31 = vsel %vm847_vm7, %v914_v30, 0 }
 0x304   : > { %928 = vmatpush.bf16.xpose.msra.mxu3 %v919_v31 }
 0x305   : > { %v2432_v32 = vpop.eup %2431 }
 0x306   : > { %v884_v33 = vsel %vm868_vm8, %v2432_v32, 0.0 }
 0x307   : > { %885 = vadd.xlane.f32.xlu1 %v884_v33 }
 0x30a   : > { %v1049_v41 = vpop.permute.xlu2 %1048 }
 0x30b   : > { %v1054_v43 = vsel %vm847_vm7, %v1049_v41, 0 }
 0x312   : > { %v1047_v47 = vpop.permute.xlu2 %1046 }
 0x313   : > { %979 = vrot.lane.b32.xlu0 %v844_v7, %s2813_s13 }
 0x320   : > { %981 = vrot.lane.b32.xlu1 %v845_v9, %s2813_s13 }
 0x372   : > { %v883_v35 = vpop.xlane.xlu0 %882 }
 0x373   : > { %2433 = vrcp.f32 %v883_v35 }
 0x379   : > { %v2434_v37 = vpop.eup %2433 }
 0x37a   : > { %v886_v36 = vpop.xlane.xlu1 %885  ;;  %v889_v39 = vmul.f32 %v2434_v37, %v2430_v27 }
 0x37b   : > { %2435 = vrcp.f32 %v886_v36 }
 0x381   : > { %v2436_v38 = vpop.eup %2435 }
 0x382   : > { %v890_v40 = vmul.f32 %v2436_v38, %v2432_v32 }
 0x384   : > { %v891_v42 = vpack.c.bf16 %v890_v40, %v889_v39 }
 0x385   : > { %v980_v46 = vpop.permute.xlu0 %979 }
 0x386   : > { %2031 = vmatmul.msk.bf16.vlgmr.msrb.gmra.mxu3 %vm868_vm8, %v891_v42 }
 0x387   : > { %1063 = vmatpush.bf16.xpose.msrb.mxu3 %v1054_v43 }
 0x392   : > { %v982_v44 = vpop.permute.xlu1 %981 }
 0x393   : > { %v987_v45 = vsel %vm847_vm7, %v982_v44, 0 }
 0x394   : > { %996 = vmatpush.bf16.xpose.msrb.mxu2 %v987_v45 }
 0x396   : > { %2032 = vmatmul.msk.bf16.vlgmr.msra.gmra.mxu3 %vm847_vm7, %v911_v34 }
 0x39b   : > { %2034 = vmatmul.msk.bf16.vlgmr.msrb.gmra.mxu2 %vm847_vm7, %v980_v46 }
 0x3a6   : > { %2036 = vmatmul.msk.bf16.vlgmr.msrb.gmra.mxu3 %vm847_vm7, %v1047_v47 }
 0x409   : > { %v3094_v48 = vpop.f32.mrf.mxu3 }
 0x411   : > { %v3096_v49 = vpop.f32.mrf.mxu3 }
 0x419   : > { %v930_v50 = vpop.f32.mrf.mxu3 }
 0x41a   : > { %v935_v51 = vsel %vm868_vm8, %v930_v50, -inf }
 0x41b   : > { %936 = vmax.xlane.f32.xlu1 %v935_v51 }
 0x41e   : > { %v998_v52 = vpop.f32.mrf.mxu2 }
 0x41f   : > { %v1003_v53 = vsel %vm868_vm8, %v998_v52, -inf }
 0x420   : > { %1004 = vmax.xlane.f32.xlu2 %v1003_v53 }
 0x421   : > { %v932_v54 = vpop.f32.mrf.mxu3 }
 0x422   : > { %v938_v55 = vsel %vm868_vm8, %v932_v54, -inf }
 0x423   : > { %939 = vmax.xlane.f32.xlu0 %v938_v55 }
 0x426   : > { %v1000_v56 = vpop.f32.mrf.mxu2 }
 0x427   : > { %v1006_v57 = vsel %vm868_vm8, %v1000_v56, -inf }
 0x428   : > { %1007 = vmax.xlane.f32.xlu1 %v1006_v57 }
 0x429   : > { %v1065_v58 = vpop.f32.mrf.mxu3 }
 0x42a   : > { %v1070_v59 = vsel %vm868_vm8, %v1065_v58, -inf }
 0x42b   : > { %1071 = vmax.xlane.f32.xlu0 %v1070_v59  ;;  %v2238_v59 = vld [vmem:[#allocation10 + $0x30] sm:$0xff] }
 0x431   : > { %v1067_v60 = vpop.f32.mrf.mxu3 }
 0x432   : > { %v1073_v11 = vsel %vm868_vm8, %v1067_v60, -inf }
 0x433   : > { %1074 = vmax.xlane.f32.xlu2 %v1073_v11  ;;  %v2237_v11 = vld [vmem:[#allocation10 + $0x28] sm:$0xff] }
 0x44b   : > { %959 = vrot.lane.b32.xlu2 %v3074_v17, %s2811_s23 }
 0x48e   : > { %v937_v61 = vpop.xlane.xlu1 %936 }
 0x48f   : > { %v941_v2 = vsub.f32 %v930_v50, %v937_v61 }
 0x491   : > { %v943_v4 = vmul.f32 1.442695, %v941_v2 }
 0x493   : > { %v1005_v62 = vpop.xlane.xlu2 %1004 }
 0x494   : > { %v1009_v63 = vsub.f32 %v998_v52, %v1005_v62 }
 0x496   : > { %v1011_v15 = vmul.f32 1.442695, %v1009_v63  ;;  %v940_v3 = vpop.xlane.xlu0 %939 }
 0x497   : > { %v942_v7 = vsub.f32 %v932_v54, %v940_v3 }
 0x498   : > { %2437 = vpow2.f32 %v1011_v15 }
 0x499   : > { %2439 = vpow2.f32 %v943_v4  ;;  %v945_v16 = vmul.f32 1.442695, %v942_v7  ;;  %v2234_v7 = vld [vmem:[#allocation10 + $0x10] sm:$0xff] }
 0x49b   : > { %v1008_v5 = vpop.xlane.xlu1 %1007 }
 0x49c   : > { %v1010_v6 = vsub.f32 %v1000_v56, %v1008_v5  ;;  %v2236_v5 = vld [vmem:[#allocation10 + $0x20] sm:$0xff] }
 0x49e   : > { %v2438_v9 = vpop.eup %2437  ;;  %v1013_v10 = vmul.f32 1.442695, %v1010_v6  ;;  %v1072_v12 = vpop.xlane.xlu0 %1071  ;;  %v2235_v6 = vld [vmem:[#allocation10 + $0x18] sm:$0xff] }
 0x49f   : > { %v1076_v13 = vsub.f32 %v1065_v58, %v1072_v12  ;;  %v1015_v14 = vsel %vm868_vm8, %v2438_v9, 0.0  ;;  %v2440_v19 = vpop.eup %2439  ;;  %v2239_v58 = vld [vmem:[#allocation10 + $0x38] sm:$0xff] }
 0x4a0   : > { %2441 = vpow2.f32 %v1013_v10  ;;  %1016 = vadd.xlane.f32.xlu1 %v1015_v14  ;;  %v947_v24 = vsel %vm868_vm8, %v2440_v19, 0.0  ;;  %1214 = vmatpush.bf16.msrb.mxu1 %v2239_v58  ;;  %v2232_v10 = vld [vmem:[#allocation10] sm:$0xff] }
 0x4a1   : > { %v1078_v18 = vmul.f32 1.442695, %v1076_v13  ;;  %2443 = vpow2.f32 %v945_v16  ;;  %v2114_v58 = vld [vmem:[#allocation13 + $0x58] sm:$0xf0] }
 0x4a3   : > { %2445 = vpow2.f32 %v1078_v18 }
 0x4a4   : > { %1215 = vmatpush.bf16.msrb.mxu1 %v2238_v59 }
 0x4a6   : > { %v2442_v20 = vpop.eup %2441  ;;  %v1075_v21 = vpop.xlane.xlu2 %1074 }
 0x4a7   : > { %v1077_v22 = vsub.f32 %v1067_v60, %v1075_v21  ;;  %v1018_v23 = vsel %vm868_vm8, %v2442_v20, 0.0  ;;  %v2444_v26 = vpop.eup %2443 }
 0x4a8   : > { %1019 = vadd.xlane.f32.xlu0 %v1018_v23  ;;  %948 = vadd.xlane.f32.xlu1 %v947_v24  ;;  %v950_v29 = vsel %vm868_vm8, %v2444_v26, 0.0 }
 0x4a9   : > { %v1080_v25 = vmul.f32 1.442695, %v1077_v22  ;;  %v2446_v27 = vpop.eup %2445  ;;  %1216 = vmatpush.bf16.msrb.mxu1 %v2237_v11  ;;  %v2249_v11 = vld [vmem:[#allocation13 + $0x44] sm:$0xf0] }
 0x4aa   : > { %v1082_v30 = vsel %vm868_vm8, %v2446_v27, 0.0 }
 0x4ab   : > { %2447 = vpow2.f32 %v1080_v25 }
 0x4ad   : > { %1217 = vmatpush.bf16.msrb.mxu1 %v2236_v5 }
 0x4ae   : > { %v960_v28 = vpop.permute.xlu2 %959 }
 0x4af   : > { %972 = vmatpush.bf16.msrb.mxu0 %v960_v28 }
 0x4b0   : > { %951 = vadd.xlane.f32.xlu0 %v950_v29  ;;  %1083 = vadd.xlane.f32.xlu1 %v1082_v30  ;;  %v2419_v30 = vld [vmem:[#allocation11] ss:$0 sm:$0xff] }
 0x4b1   : > { %v2448_v31 = vpop.eup %2447  ;;  %1218 = vmatpush.bf16.msrb.mxu1 %v2235_v6  ;;  %v2098_v6 = vld [vmem:[#allocation13 + $0x38] sm:$0xf0] }
 0x4b2   : > { %v1085_v32 = vsel %vm868_vm8, %v2448_v31, 0.0 }
 0x4b5   : > { %1219 = vmatpush.bf16.msrb.mxu1 %v2234_v7 }
 0x4b8   : > { %1086 = vadd.xlane.f32.xlu0 %v1085_v32 }
 0x4c9   : > { %1026 = vrot.lane.b32.xlu1 %v3074_v17, %s2813_s13 }
 0x4cc   : > { %1093 = vrot.lane.b32.xlu0 %v3074_v17, %s2812_s22 }
 0x513   : > { %v1017_v33 = vpop.xlane.xlu1 %1016 }
 0x51b   : > { %v1020_v34 = vpop.xlane.xlu0 %1019  ;;  %v949_v35 = vpop.xlane.xlu1 %948 }
 0x51c   : > { %2449 = vrcp.f32 %v949_v35 }
 0x522   : > { %v2450_v37 = vpop.eup %2449 }
 0x523   : > { %v952_v36 = vpop.xlane.xlu0 %951  ;;  %v955_v39 = vmul.f32 %v2450_v37, %v2440_v19  ;;  %v1084_v43 = vpop.xlane.xlu1 %1083 }
 0x524   : > { %2451 = vrcp.f32 %v952_v36 }
 0x525   : > { %2453 = vrcp.f32 %v1020_v34 }
 0x526   : > { %2455 = vrcp.f32 %v1017_v33 }
 0x52a   : > { %v2452_v38 = vpop.eup %2451 }
 0x52b   : > { %v956_v40 = vmul.f32 %v2452_v38, %v2444_v26  ;;  %v1087_v42 = vpop.xlane.xlu0 %1086  ;;  %v2454_v17 = vpop.eup %2453 }
 0x52c   : > { %2457 = vrcp.f32 %v1087_v42  ;;  %v2456_v44 = vpop.eup %2455  ;;  %v1024_v46 = vmul.f32 %v2454_v17, %v2442_v20  ;;  %v2255_v42 = vld [vmem:[#allocation13 + $0x74] sm:$0xf0] }
 0x52d   : > { %v957_v41 = vpack.c.bf16 %v956_v40, %v955_v39  ;;  %2459 = vrcp.f32 %v1084_v43  ;;  %v1023_v50 = vmul.f32 %v2456_v44, %v2438_v9  ;;  %v2233_v9 = vld [vmem:[#allocation10 + $0x8] sm:$0xff]  ;;  %v2254_v43 = vld [vmem:[#allocation13 + $0x74] sm:$0xf]  ;;  %v2130_v44 = vld [vmem:[#allocation13 + $0x78] sm:$0xf0] }
 0x52e   : > { %1220 = vmatpush.bf16.msrb.mxu1 %v2233_v9  ;;  %v2088_v9 = vld [vmem:[#allocation13 + $0x20] sm:$0xf] }
 0x52f   : > { %2033 = vmatmul.msk.bf16.vlgmr.msrb.gmra.mxu0 %vm868_vm8, %v957_v41  ;;  %v1025_v53 = vpack.c.bf16 %v1024_v46, %v1023_v50  ;;  %v2128_v41 = vld [vmem:[#allocation13 + $0x70] sm:$0xf]  ;;  %v2120_v46 = vld [vmem:[#allocation13 + $0x60] sm:$0xf]  ;;  %v2252_v50 = vld [vmem:[#allocation13 + $0x64] sm:$0xf] }
 0x530   : > { %v2129_v17 = vor.u32 %v2255_v42, %v2128_v41 }
 0x532   : > { %v2458_v45 = vpop.eup %2457  ;;  %1221 = vmatpush.bf16.msrb.mxu1 %v2232_v10  ;;  %v2245_v10 = vld [vmem:[#allocation13 + $0x24] sm:$0xf0] }
 0x533   : > { %v2460_v47 = vpop.eup %2459  ;;  %v1091_v52 = vmul.f32 %v2458_v45, %v2448_v31  ;;  %v2133_v45 = vor.u32 %v2254_v43, %v2130_v44 }
 0x534   : > { %v1090_v54 = vmul.f32 %v2460_v47, %v2446_v27  ;;  %v2253_v47 = vld [vmem:[#allocation13 + $0x64] sm:$0xf0] }
 0x535   : > { %1399 = vmatpush.bf16.msra.mxu3 %v2133_v45 }
 0x536   : > { %v1092_v56 = vpack.c.bf16 %v1091_v52, %v1090_v54  ;;  %v2122_v52 = vld [vmem:[#allocation13 + $0x68] sm:$0xf0]  ;;  %v2112_v54 = vld [vmem:[#allocation13 + $0x50] sm:$0xf] }
 0x53b   : > { %v1027_v51 = vpop.permute.xlu1 %1026 }
 0x53c   : > { %1039 = vmatpush.bf16.msra.mxu2 %v1027_v51  ;;  %v2121_v51 = vor.u32 %v2253_v47, %v2120_v46  ;;  %v2420_v47 = vld [vmem:[%s3324_s7] ss:$0 sm:$0xff] }
 0x53e   : > { %v1094_v55 = vpop.permute.xlu0 %1093 }
 0x53f   : > { %2035 = vmatmul.msk.bf16.vlgmr.msra.gmra.mxu2 %vm868_vm8, %v1025_v53  ;;  %1106 = vmatpush.bf16.msra.mxu0 %v1094_v55  ;;  %v2125_v53 = vor.u32 %v2252_v50, %v2122_v52  ;;  %v2251_v55 = vld [vmem:[#allocation13 + $0x54] sm:$0xf0] }
 0x540   : > { %1385 = vmatpush.bf16.msrb.mxu2 %v2129_v17 }
 0x541   : > { %1400 = vmatpush.bf16.msra.mxu3 %v2125_v53 }
 0x542   : > { %2037 = vmatmul.msk.bf16.vlgmr.msra.gmra.mxu0 %vm868_vm8, %v1092_v56  ;;  %v2250_v56 = vld [vmem:[#allocation13 + $0x54] sm:$0xf] }
 0x543   : > { %v2117_v59 = vor.u32 %v2250_v56, %v2114_v58 }
 0x544   : > { %1386 = vmatpush.bf16.msrb.mxu2 %v2121_v51 }
 0x545   : > { %1401 = vmatpush.bf16.msra.mxu3 %v2117_v59 }
 0x5ac   : > { %v974_v57 = vpop.f32.mrf.mxu0 }
 0x5b4   : > { %v976_v61 = vpop.f32.mrf.mxu0 }
 0x5b5   : > { %v2407_v15 = vpack.i.bf16 %v976_v61, %v974_v57  ;;  %v2113_v57 = vor.u32 %v2251_v55, %v2112_v54  ;;  %v2248_v61 = vld [vmem:[#allocation13 + $0x44] sm:$0xf]  ;;  %v2421_v54 = vld [vmem:[%s3325_s8] ss:$0 sm:$0xff] }
 0x5b7   : > { %1387 = vmatpush.bf16.msrb.mxu2 %v2113_v57 }
 0x5bf   : > { %v1108_v2 = vpop.f32.mrf.mxu0 }
 0x5c2   : > { %v1041_v60 = vpop.f32.mrf.mxu2 }
 0x5c7   : > { %v1110_v3 = vpop.f32.mrf.mxu0 }
 0x5c8   : > { %v2412_v4 = vpack.i.bf16 %v1110_v3, %v1108_v2  ;;  %v2247_v3 = vld [vmem:[#allocation13 + $0x34] sm:$0xf0] }
 0x5ca   : > { %v1043_v62 = vpop.f32.mrf.mxu2 }
 0x5cb   : > { %v2402_v63 = vpack.i.bf16 %v1043_v62, %v1041_v60  ;;  %v2104_v60 = vld [vmem:[#allocation13 + $0x40] sm:$0xf] }
 0x5cc   : > { %v2105_v62 = vor.u32 %v2249_v11, %v2104_v60 }
 0x5cd   : > { %2403 = vrot.lane.b32.xlu2 %v2402_v63, %s2813_s13  ;;  %v2106_v63 = vld [vmem:[#allocation13 + $0x48] sm:$0xf0] }
 0x5ce   : > { %v2109_v2 = vor.u32 %v2248_v61, %v2106_v63  ;;  %1388 = vmatpush.bf16.msrb.mxu2 %v2105_v62 }
 0x5d0   : > { %1402 = vmatpush.bf16.msra.mxu3 %v2109_v2 }
 0x5d5   : > { %2408 = vrot.lane.b32.xlu2 %v2407_v15, %s2812_s22  ;;  %v2096_v15 = vld [vmem:[#allocation13 + $0x30] sm:$0xf]  ;;  %s570_s22 = scalar_lea.vmem [#allocation16], %s1925_s2 }
 0x5d6   : > { %v2097_v5 = vor.u32 %v2247_v3, %v2096_v15  ;;  %s1768_s1 = sshll.u32 %s570_s22, 4  ;;  %s1769_s1 = int_to_ptr.vmem [resolvable:$true] %s1768_s1 }
 0x5d8   : > { %1389 = vmatpush.bf16.msrb.mxu2 %v2097_v5 }
 0x5dd   : > { %2413 = vrot.lane.b32.xlu2 %v2412_v4, %s2811_s23  ;;  %v2246_v4 = vld [vmem:[#allocation13 + $0x34] sm:$0xf]  ;;  %s2272_s23 = sshll.u32 %s2910_s15, 4  ;;  %s1756_s15 = scalar_lea.sflag [#allocation4], %s3019_s18 }
 0x5de   : > { %v2101_v7 = vor.u32 %v2246_v4, %v2098_v6  ;;  %s1767_s24 = scalar_lea.hbm %s3357_s14, %s2272_s23 }
 0x5df   : > { %s1770_s17 = sshll.u32 %s1767_s24, 4  ;;  %s1771_s17 = int_to_ptr.hbm [resolvable:$true] %s1770_s17 }
 0x5e0   : > { %1403 = vmatpush.bf16.msra.mxu3 %v2101_v7  ;;  %s2727_s30 = sshra.s32 %s1771_s17, 4  ;;  %s2728_s30 = int_to_ptr.hbm [resolvable:$true] %s2727_s30 }
 0x5e1   : > { %s2729_s2 = scalar_lea.hbm %s2728_s30, 16  ;;  %p2734_p12 = scmp.lt.s32.totalorder %s2728_s30, %s3357_s14 }
 0x5e2   : > { %p2730_p1 = scmp.ne.s32.totalorder %s2728_s30, %s2729_s2  ;;  %p2735_p8 = scmp.lt.s32.totalorder %s2733_s16, %s2729_s2 }
 0x5e4   : > { %p2731_p3 = pnand %p2730_p1, %p2985_p13  ;;  %p2736_p7 = por %p2735_p8, %p2734_p12 }
 0x5e6   : > { %p2732_p4 = pneg %p2731_p3 }
 0x5e8   : > { %p2737_p9 = pnand %p2736_p7, %p2732_p4 }
 0x627   : > { %v2404_v12 = vpop.permute.xlu2 %2403 }
 0x628   : > { %v2406_v20 = vunpack.i.h.bf16 %v2404_v12  ;;  %v2405_v21 = vunpack.i.l.bf16 %v2404_v12  ;;  %v2244_v12 = vld [vmem:[#allocation13 + $0x24] sm:$0xf] }
 0x62f   : > { %v2409_v13 = vpop.permute.xlu2 %2408 }
 0x630   : > { %v2411_v14 = vunpack.i.h.bf16 %v2409_v13  ;;  %v2410_v16 = vunpack.i.l.bf16 %v2409_v13  ;;  %v2089_v13 = vor.u32 %v2245_v10, %v2088_v9 }
 0x632   : > { %v1138_v18 = vsel %vm847_vm7, %v3096_v49, %v2411_v14  ;;  %v1137_v19 = vsel %vm847_vm7, %v3094_v48, %v2410_v16  ;;  %v2090_v14 = vld [vmem:[#allocation13 + $0x28] sm:$0xf0]  ;;  %1390 = vmatpush.bf16.msrb.mxu2 %v2089_v13 }
 0x633   : > { %v1140_v25 = vsel %vm1139_vm9, %v1137_v19, %v2405_v21  ;;  %v1141_v26 = vsel %vm1139_vm9, %v1138_v18, %v2406_v20  ;;  %v2093_v16 = vor.u32 %v2244_v12, %v2090_v14  ;;  %v2080_v18 = vld [vmem:[#allocation13 + $0x10] sm:$0xf]  ;;  %v2243_v19 = vld [vmem:[#allocation13 + $0x14] sm:$0xf0]  ;;  %v2242_v20 = vld [vmem:[#allocation13 + $0x14] sm:$0xf] }
 0x634   : > { %v2081_v21 = vor.u32 %v2243_v19, %v2080_v18 }
 0x635   : > { %1404 = vmatpush.bf16.msra.mxu3 %v2093_v16 }
 0x636   : > { %1391 = vmatpush.bf16.msrb.mxu2 %v2081_v21 }
 0x637   : > { %v2414_v22 = vpop.permute.xlu2 %2413 }
 0x638   : > { %v2416_v23 = vunpack.i.h.bf16 %v2414_v22  ;;  %v2415_v24 = vunpack.i.l.bf16 %v2414_v22  ;;  %v2082_v22 = vld [vmem:[#allocation13 + $0x18] sm:$0xf0] }
 0x63a   : > { %v1143_v27 = vsel %vm1142_vm10, %v1140_v25, %v2415_v24  ;;  %v1144_v28 = vsel %vm1142_vm10, %v1141_v26, %v2416_v23  ;;  %v2072_v23 = vld [vmem:[#allocation13] sm:$0xf]  ;;  %v2241_v24 = vld [vmem:[#allocation13 + $0x4] sm:$0xf0]  ;;  %v2085_v26 = vor.u32 %v2242_v20, %v2082_v22 }
 0x63b   : > { %v1145_v29 = vpack.c.bf16 %v1144_v28, %v1143_v27  ;;  %v2240_v27 = vld [vmem:[#allocation13 + $0x4] sm:$0xf]  ;;  %v2074_v28 = vld [vmem:[#allocation13 + $0x8] sm:$0xf0] }
 0x63c   : > { %1405 = vmatpush.bf16.msra.mxu3 %v2085_v26 }
 0x63d   : > { %1222 = vmatmul.bf16.vlgmr.msrb.gmra.mxu1 %v1145_v29 }
 0x6ba   : > { %v1223_v31 = vpop.f32.mrf.mxu1 }
 0x6bb   : > { %v1224_v32 = vadd.f32 %v2419_v30, %v1223_v31  ;;  %v2077_v31 = vor.u32 %v2240_v27, %v2074_v28 }
 0x6bd   : > { %v3127_v49 = vadd.f32 %v1224_v32, %v3045_v0  ;;  %1406 = vmatpush.bf16.msra.mxu3 %v2077_v31 }
 0x6bf   : > { %1232 = vadd.xlane.f32.xlu0 %v3127_v49 }
 0x6c2   : > { %v1225_v48 = vpop.f32.mrf.mxu1 }
 0x6c3   : > { %v1226_v33 = vadd.f32 %v2419_v30, %v1225_v48  ;;  %v2073_v30 = vor.u32 %v2241_v24, %v2072_v23  ;;  %v2263_v24 = vld [vmem:[#allocation14 + $0x38] sm:$0xff] }
 0x6c4   : > { %1723 = vmatpush.bf16.msrb.mxu0 %v2263_v24 }
 0x6c5   : > { %v3131_v34 = vadd.f32 %v1226_v33, %v3048_v1  ;;  %1392 = vmatpush.bf16.msrb.mxu2 %v2073_v30 }
 0x6c7   : > { %1234 = vadd.xlane.f32.xlu1 %v3131_v34 }
 0x732   : > { %v1233_v35 = vpop.xlane.xlu0 %1232 }
 0x733   : > { %v1236_v36 = vmul.f32 %v1233_v35, %v3051_v8 }
 0x735   : > { %v3136_v37 = vsub.f32 %v3127_v49, %v1236_v36 }
 0x737   : > { %v1240_v38 = vmul.f32 %v3136_v37, %v3136_v37 }
 0x739   : > { %1242 = vadd.xlane.f32.xlu2 %v1240_v38 }
 0x73a   : > { %v1235_v0 = vpop.xlane.xlu1 %1234 }
 0x73b   : > { %v1237_v39 = vmul.f32 %v1235_v0, %v3051_v8 }
 0x73d   : > { %v3142_v40 = vsub.f32 %v3131_v34, %v1237_v39 }
 0x73f   : > { %v1241_v1 = vmul.f32 %v3142_v40, %v3142_v40 }
 0x741   : > { %1244 = vadd.xlane.f32.xlu0 %v1241_v1 }
 0x7ac   : > { %v1243_v25 = vpop.xlane.xlu2 %1242 }
 0x7ad   : > { %v1246_v29 = vmul.f32 %v1243_v25, %v3051_v8  ;;  %v2271_v25 = vld [vmem:[#allocation14 + $0x78] sm:$0xff] }
 0x7ae   : > { %1737 = vmatpush.bf16.msra.mxu1 %v2271_v25 }
 0x7af   : > { %v1248_v32 = vadd.f32 1e-05, %v1246_v29 }
 0x7b1   : > { %2461 = vrsqrt.f32 %v1248_v32  ;;  %vm1256_vm12 = vweird.f32 %v1248_v32 }
 0x7b4   : > { %v1245_v48 = vpop.xlane.xlu0 %1244 }
 0x7b5   : > { %v1247_v33 = vmul.f32 %v1245_v48, %v3051_v8  ;;  %v2262_v48 = vld [vmem:[#allocation14 + $0x30] sm:$0xff] }
 0x7b6   : > { %1724 = vmatpush.bf16.msrb.mxu0 %v2262_v48 }
 0x7b7   : > { %v2462_v35 = vpop.eup %2461  ;;  %v1249_v36 = vadd.f32 1e-05, %v1247_v33  ;;  %v2270_v33 = vld [vmem:[#allocation14 + $0x70] sm:$0xff] }
 0x7b8   : > { %v1251_v38 = vmul.f32 %v2462_v35, %v1248_v32  ;;  %vm1257_vm11 = vweird.f32 %v2462_v35  ;;  %1738 = vmatpush.bf16.msra.mxu1 %v2270_v33 }
 0x7b9   : > { %2463 = vrsqrt.f32 %v1249_v36  ;;  %vm1258_vm13 = vmor %vm1256_vm12, %vm1257_vm11  ;;  %vm1266_vm15 = vweird.f32 %v1249_v36 }
 0x7ba   : > { %v1252_v0 = vmul.f32 %v2462_v35, %v1251_v38 }
 0x7bc   : > { %v1253_v39 = vmul.f32 0.5, %v1252_v0 }
 0x7be   : > { %v1254_v1 = vsub.f32 1.5, %v1253_v39 }
 0x7bf   : > { %v2464_v41 = vpop.eup %2463 }
 0x7c0   : > { %v1255_v42 = vmul.f32 %v2462_v35, %v1254_v1  ;;  %v1261_v43 = vmul.f32 %v2464_v41, %v1249_v36  ;;  %vm1267_vm14 = vweird.f32 %v2464_v41 }
 0x7c1   : > { %vm1268_vm0 = vmor %vm1266_vm15, %vm1267_vm14 }
 0x7c2   : > { %v1262_v17 = vmul.f32 %v2464_v41, %v1261_v43  ;;  %v1259_v44 = vsel %vm1258_vm13, %v2462_v35, %v1255_v42 }
 0x7c3   : > { %v1270_v8 = vmul.f32 %v1259_v44, %v3136_v37  ;;  %v1299_v37 = vld [vmem:[%s3353_s5] sm:$0x3] }
 0x7c4   : > { %v1263_v45 = vmul.f32 0.5, %v1262_v17  ;;  %v1301_v59 = vperm.slane %v1299_v37, 0  ;;  %v1302_v60 = vperm.slane %v1299_v37, 1 }
 0x7c5   : > { %v1275_v53 = vmul.f32 %v2420_v47, %v1270_v8 }
 0x7c6   : > { %v1264_v46 = vsub.f32 1.5, %v1263_v45 }
 0x7c7   : > { %v1280_v56 = vadd.f32 %v2421_v54, %v1275_v53 }
 0x7c8   : > { %v1265_v50 = vmul.f32 %v2464_v41, %v1264_v46 }
 0x7ca   : > { %v1269_v51 = vsel %vm1268_vm0, %v2464_v41, %v1265_v50  ;;  %v2269_v50 = vld [vmem:[#allocation14 + $0x68] sm:$0xff] }
 0x7cb   : > { %v1271_v52 = vmul.f32 %v1269_v51, %v3142_v40  ;;  %1739 = vmatpush.bf16.msra.mxu1 %v2269_v50 }
 0x7cd   : > { %v1276_v55 = vmul.f32 %v2420_v47, %v1271_v52  ;;  %v2261_v47 = vld [vmem:[#allocation14 + $0x28] sm:$0xff] }
 0x7ce   : > { %1725 = vmatpush.bf16.msrb.mxu0 %v2261_v47 }
 0x7cf   : > { %v1281_v57 = vadd.f32 %v2421_v54, %v1276_v55 }
 0x7d1   : > { %v1282_v58 = vpack.c.bf16 %v1281_v57, %v1280_v56 }
 0x7d3   : > { %1393 = vmatmul.bf16.vlgmr.msrb.gmra.mxu2 %v1282_v58  ;;  %1407 = vmatmul.bf16.vlgmr.msra.gmra.mxu3 %v1282_v58 }
 0x856   : > { %v1394_v11 = vpop.f32.mrf.mxu2  ;;  %v1408_v61 = vpop.f32.mrf.mxu3 }
 0x857   : > { %v3159_v40 = vadd.f32 %v1394_v11, %v1301_v59  ;;  %v3161_v62 = vadd.f32 %v1408_v61, %v1302_v60  ;;  %v2260_v11 = vld [vmem:[#allocation14 + $0x20] sm:$0xff] }
 0x858   : > { %v2268_v61 = vld [vmem:[#allocation14 + $0x60] sm:$0xff]  ;;  %1726 = vmatpush.bf16.msrb.mxu0 %v2260_v11 }
 0x859   : > { %v3164_v63 = vmul.f32 0.70710677, %v3159_v40  ;;  %v3167_v2 = vmul.f32 0.70710677, %v3161_v62  ;;  %1740 = vmatpush.bf16.msra.mxu1 %v2268_v61 }
 0x85b   : > { %v1421_v15 = vmul.f32 %v3164_v63, %v3164_v63  ;;  %v1461_v3 = vmul.f32 %v3167_v2, %v3167_v2 }
 0x85d   : > { %v3173_v4 = vmin.f32 %v1421_v15, 16.0  ;;  %v3175_v5 = vmin.f32 %v1461_v3, 16.0 }
 0x85e   : > { %v1396_v6 = vpop.f32.mrf.mxu2  ;;  %v1410_v7 = vpop.f32.mrf.mxu3 }
 0x85f   : > { %v1423_v9 = vmul.f32 2.1237322e-06, %v3173_v4  ;;  %v1434_v10 = vmul.f32 3.8918573e-05, %v3173_v4  ;;  %v3179_v12 = vadd.f32 %v1396_v6, %v1301_v59  ;;  %v1474_v13 = vmul.f32 3.8918573e-05, %v3175_v5 }
 0x860   : > { %v3182_v14 = vadd.f32 %v1410_v7, %v1302_v60  ;;  %v1463_v22 = vmul.f32 2.1237322e-06, %v3175_v5 }
 0x861   : > { %v1424_v16 = vadd.f32 0.00028619796, %v1423_v9  ;;  %v1435_v18 = vadd.f32 0.001143296, %v1434_v10  ;;  %v1475_v19 = vadd.f32 0.001143296, %v1474_v13 }
 0x862   : > { %v3185_v20 = vmul.f32 0.70710677, %v3179_v12  ;;  %v3190_v23 = vmul.f32 0.70710677, %v3182_v14  ;;  %v1464_v36 = vadd.f32 0.00028619796, %v1463_v22 }
 0x863   : > { %v1436_v21 = vmul.f32 %v1435_v18, %v3173_v4  ;;  %v1476_v26 = vmul.f32 %v1475_v19, %v3175_v5  ;;  %v1425_v28 = vmul.f32 %v1424_v16, %v3173_v4  ;;  %v2259_v13 = vld [vmem:[#allocation14 + $0x18] sm:$0xff] }
 0x864   : > { %v1501_v27 = vmul.f32 %v3185_v20, %v3185_v20  ;;  %v1541_v30 = vmul.f32 %v3190_v23, %v3190_v23  ;;  %v1465_v46 = vmul.f32 %v1464_v36, %v3175_v5  ;;  %1727 = vmatpush.bf16.msrb.mxu0 %v2259_v13 }
 0x865   : > { %v1437_v29 = vadd.f32 0.014752088, %v1436_v21  ;;  %v1477_v31 = vadd.f32 0.014752088, %v1476_v26  ;;  %v1426_v41 = vadd.f32 0.0036580483, %v1425_v28 }
 0x866   : > { %v3198_v32 = vmin.f32 %v1501_v27, 16.0  ;;  %v3201_v38 = vmin.f32 %v1541_v30, 16.0  ;;  %v1466_v59 = vadd.f32 0.0036580483, %v1465_v46  ;;  %v2267_v21 = vld [vmem:[#allocation14 + $0x58] sm:$0xff]  ;;  %v2258_v27 = vld [vmem:[#allocation14 + $0x10] sm:$0xff] }
 0x867   : > { %v1438_v35 = vmul.f32 %v1437_v29, %v3173_v4  ;;  %v1478_v0 = vmul.f32 %v1477_v31, %v3175_v5  ;;  %v1427_v55 = vmul.f32 %v1426_v41, %v3173_v4  ;;  %1741 = vmatpush.bf16.msra.mxu1 %v2267_v21  ;;  %v2266_v28 = vld [vmem:[#allocation14 + $0x50] sm:$0xff]  ;;  %v2265_v41 = vld [vmem:[#allocation14 + $0x48] sm:$0xff] }
 0x868   : > { %v1503_v39 = vmul.f32 2.1237322e-06, %v3198_v32  ;;  %v1514_v1 = vmul.f32 3.8918573e-05, %v3198_v32  ;;  %v1543_v8 = vmul.f32 2.1237322e-06, %v3201_v38  ;;  %v1467_v24 = vmul.f32 %v1466_v59, %v3175_v5  ;;  %1728 = vmatpush.bf16.msrb.mxu0 %v2258_v27 }
 0x869   : > { %v1439_v42 = vadd.f32 0.112945676, %v1438_v35  ;;  %v1479_v43 = vadd.f32 0.112945676, %v1478_v0  ;;  %v1554_v54 = vmul.f32 3.8918573e-05, %v3201_v38 }
 0x86a   : > { %v1504_v17 = vadd.f32 0.00028619796, %v1503_v39  ;;  %v1515_v44 = vadd.f32 0.001143296, %v1514_v1  ;;  %v1544_v6 = vadd.f32 0.00028619796, %v1543_v8 }
 0x86b   : > { %v1440_v45 = vmul.f32 %v1439_v42, %v3173_v4  ;;  %v1480_v51 = vmul.f32 %v1479_v43, %v3175_v5  ;;  %v1555_v7 = vadd.f32 0.001143296, %v1554_v54  ;;  %v1428_v9 = vadd.f32 0.05243302, %v1427_v55  ;;  %1742 = vmatpush.bf16.msra.mxu1 %v2266_v28  ;;  %v2257_v1 = vld [vmem:[#allocation14 + $0x8] sm:$0xff]  ;;  %v2256_v54 = vld [vmem:[#allocation14] sm:$0xff] }
 0x86c   : > { %v1505_v52 = vmul.f32 %v1504_v17, %v3198_v32  ;;  %v1516_v53 = vmul.f32 %v1515_v44, %v3198_v32  ;;  %v1545_v25 = vmul.f32 %v1544_v6, %v3201_v38  ;;  %v1468_v48 = vadd.f32 0.05243302, %v1467_v24  ;;  %1729 = vmatpush.bf16.msrb.mxu0 %v2257_v1  ;;  %v2264_v55 = vld [vmem:[#allocation14 + $0x40] sm:$0xff] }
 0x86d   : > { %v1441_v56 = vadd.f32 0.4994258, %v1440_v45  ;;  %v1481_v57 = vadd.f32 0.4994258, %v1480_v51  ;;  %v1556_v19 = vmul.f32 %v1555_v7, %v3201_v38  ;;  %v1429_v26 = vmul.f32 %v1428_v9, %v3173_v4 }
 0x86e   : > { %v1517_v58 = vadd.f32 0.014752088, %v1516_v53  ;;  %v1506_v60 = vadd.f32 0.0036580483, %v1505_v52  ;;  %v1546_v35 = vadd.f32 0.0036580483, %v1545_v25  ;;  %v1469_v47 = vmul.f32 %v1468_v48, %v3175_v5 }
 0x86f   : > { %v1442_v37 = vmul.f32 %v1441_v56, %v3173_v4  ;;  %v1482_v15 = vmul.f32 %v1481_v57, %v3175_v5  ;;  %v1557_v30 = vadd.f32 0.014752088, %v1556_v19  ;;  %v1430_v39 = vadd.f32 0.18741608, %v1429_v26  ;;  %1743 = vmatpush.bf16.msra.mxu1 %v2265_v41 }
 0x870   : > { %v1518_v3 = vmul.f32 %v1517_v58, %v3198_v32  ;;  %v1507_v22 = vmul.f32 %v1506_v60, %v3198_v32  ;;  %v1547_v51 = vmul.f32 %v1546_v35, %v3201_v38  ;;  %v1470_v11 = vadd.f32 0.18741608, %v1469_v47  ;;  %1730 = vmatpush.bf16.msrb.mxu0 %v2256_v54 }
 0x871   : > { %v3217_v10 = vadd.f32 1.0, %v1442_v37  ;;  %v3219_v16 = vadd.f32 1.0, %v1482_v15  ;;  %v1558_v36 = vmul.f32 %v1557_v30, %v3201_v38  ;;  %v1431_v52 = vmul.f32 %v1430_v39, %v3173_v4 }
 0x872   : > { %v1519_v18 = vadd.f32 0.112945676, %v1518_v3  ;;  %v1508_v31 = vadd.f32 0.05243302, %v1507_v22  ;;  %v1548_v61 = vadd.f32 0.05243302, %v1547_v51 }
 0x873   : > { %2465 = vrcp.f32 %v3217_v10  ;;  %v1559_v46 = vadd.f32 0.112945676, %v1558_v36  ;;  %v1455_v60 = vand.u32 2147483648, %v3217_v10  ;;  %v1432_v15 = vadd.f32 1.1283791, %v1431_v52  ;;  %1744 = vmatpush.bf16.msra.mxu1 %v2264_v55 }
 0x874   : > { %2467 = vrcp.f32 %v3219_v16  ;;  %v1520_v29 = vmul.f32 %v1519_v18, %v3198_v32  ;;  %v1509_v45 = vmul.f32 %v1508_v31, %v3198_v32  ;;  %vm1449_vm2 = vweird.f32 %v3217_v10 }
 0x875   : > { %v1560_v53 = vmul.f32 %v1559_v46, %v3201_v38  ;;  %v1453_v4 = vand.u32 2147483647, %v3217_v10  ;;  %v1456_v19 = vor.u32 1.1754944e-38, %v1455_v60  ;;  %v1549_v21 = vmul.f32 %v1548_v61, %v3201_v38 }
 0x876   : > { %v1521_v33 = vadd.f32 0.4994258, %v1520_v29  ;;  %v1510_v58 = vadd.f32 0.18741608, %v1509_v45  ;;  %v1433_v22 = vmul.f32 %v1432_v15, %v3164_v63  ;;  %v1495_v27 = vand.u32 2147483648, %v3219_v16 }
 0x877   : > { %v1561_v37 = vadd.f32 0.4994258, %v1560_v53  ;;  %vm1454_vm4 = vcmp.eq.f32.partialorder %v1453_v4, 8.507059e+37  ;;  %vm1489_vm6 = vweird.f32 %v3219_v16  ;;  %v1550_v31 = vadd.f32 0.18741608, %v1549_v21 }
 0x878   : > { %v1522_v17 = vmul.f32 %v1521_v33, %v3198_v32  ;;  %v1511_v9 = vmul.f32 %v1510_v58, %v3198_v32  ;;  %v1493_v32 = vand.u32 2147483647, %v3219_v16 }
 0x879   : > { %v2466_v0 = vpop.eup %2465  ;;  %v1562_v3 = vmul.f32 %v1561_v37, %v3201_v38 }
 0x87a   : > { %v3230_v42 = vpop.eup %2467  ;;  %v1445_v43 = vmul.f32 %v2466_v0, %v3217_v10  ;;  %v1523_v50 = vadd.f32 1.0, %v1522_v17  ;;  %vm1450_vm1 = vweird.f32 %v2466_v0  ;;  %v1471_v10 = vmul.f32 %v1470_v11, %v3175_v5 }
 0x87b   : > { %v1485_v44 = vmul.f32 %v3230_v42, %v3219_v16  ;;  %vm1451_vm3 = vmor %vm1449_vm2, %vm1450_vm1  ;;  %v3247_v13 = vadd.f32 1.0, %v1562_v3  ;;  %vm1490_vm5 = vweird.f32 %v3230_v42  ;;  %v1512_v28 = vadd.f32 1.1283791, %v1511_v9 }
 0x87c   : > { %v1446_v8 = vsub.f32 1.0, %v1445_v43  ;;  %2469 = vrcp.f32 %v1523_v50  ;;  %v1533_v63 = vand.u32 2147483647, %v1523_v50  ;;  %v1535_v30 = vand.u32 2147483648, %v1523_v50  ;;  %vm3258_vm7 = vmor %vm1489_vm6, %vm1490_vm5 }
 0x87d   : > { %v1486_v57 = vsub.f32 1.0, %v1485_v44  ;;  %2471 = vrcp.f32 %v3247_v13  ;;  %v1472_v35 = vadd.f32 1.1283791, %v1471_v10  ;;  %vm1494_vm9 = vcmp.eq.f32.partialorder %v1493_v32, 8.507059e+37 }
 0x87e   : > { %v1447_v56 = vmul.f32 %v2466_v0, %v1446_v8  ;;  %vm1529_vm10 = vweird.f32 %v1523_v50  ;;  %v1513_v1 = vmul.f32 %v1512_v28, %v3185_v20  ;;  %vm1534_vm12 = vcmp.eq.f32.partialorder %v1533_v63, 8.507059e+37 }
 0x87f   : > { %v1487_v6 = vmul.f32 %v3230_v42, %v1486_v57  ;;  %v1536_v41 = vor.u32 1.1754944e-38, %v1535_v30  ;;  %v1551_v43 = vmul.f32 %v1550_v31, %v3201_v38  ;;  %v1473_v8 = vmul.f32 %v1472_v35, %v3167_v2 }
 0x880   : > { %v1448_v59 = vadd.f32 %v2466_v0, %v1447_v56  ;;  %v1573_v53 = vand.u32 2147483647, %v3247_v13  ;;  %v1575_v20 = vand.u32 2147483648, %v3247_v13  ;;  %v1413_v38 = vmul.f32 0.5, %v3159_v40 }
 0x881   : > { %v1488_v26 = vadd.f32 %v3230_v42, %v1487_v6  ;;  %v1415_v57 = vmul.f32 0.5, %v3179_v12  ;;  %vm1569_vm14 = vweird.f32 %v3247_v13  ;;  %v1414_v12 = vmul.f32 0.5, %v3161_v62 }
 0x882   : > { %v1452_v7 = vsel %vm1451_vm3, %v2466_v0, %v1448_v59  ;;  %v2470_v18 = vpop.eup %2469  ;;  %v1496_v0 = vor.u32 1.1754944e-38, %v1495_v27  ;;  %v1576_v60 = vor.u32 1.1754944e-38, %v1575_v20  ;;  %vm1574_vm0 = vcmp.eq.f32.partialorder %v1573_v53, 8.507059e+37 }
 0x883   : > { %v1525_v24 = vmul.f32 %v2470_v18, %v1523_v50  ;;  %v1457_v25 = vsel %vm1454_vm4, %v1456_v19, %v1452_v7  ;;  %vm1530_vm8 = vweird.f32 %v2470_v18  ;;  %v1492_v36 = vsel %vm3258_vm7, %v3230_v42, %v1488_v26  ;;  %v2472_v16 = vpop.eup %2471 }
 0x884   : > { %v1458_v5 = vmul.f32 %v1457_v25, %v1433_v22  ;;  %vm1531_vm11 = vmor %vm1529_vm10, %vm1530_vm8  ;;  %v1497_v44 = vsel %vm1494_vm9, %v1496_v0, %v1492_v36  ;;  %v1565_v46 = vmul.f32 %v2472_v16, %v3247_v13  ;;  %v1552_v50 = vadd.f32 1.1283791, %v1551_v43  ;;  %v2422_v22 = vld [vmem:[%s3356_s20] ss:$0 sm:$0xff] }
 0x885   : > { %v1526_v29 = vsub.f32 1.0, %v1525_v24  ;;  %v1498_v52 = vmul.f32 %v1497_v44, %v1473_v8  ;;  %vm1570_vm13 = vweird.f32 %v2472_v16  ;;  %v1416_v9 = vmul.f32 0.5, %v3182_v14 }
 0x886   : > { %v2134_v17 = vclamps-f32 %v1458_v5, 1.0  ;;  %v1566_v51 = vsub.f32 1.0, %v1565_v46  ;;  %v1553_v59 = vmul.f32 %v1552_v50, %v3190_v23  ;;  %vm1571_vm15 = vmor %vm1569_vm14, %vm1570_vm13 }
 0x887   : > { %v1527_v33 = vmul.f32 %v2470_v18, %v1526_v29  ;;  %v2135_v2 = vclamps-f32 %v1498_v52, 1.0 }
 0x888   : > { %v1581_v54 = vadd.f32 1.0, %v2134_v17  ;;  %v1567_v56 = vmul.f32 %v2472_v16, %v1566_v51 }
 0x889   : > { %v1528_v39 = vadd.f32 %v2470_v18, %v1527_v33  ;;  %v1582_v7 = vadd.f32 1.0, %v2135_v2 }
 0x88a   : > { %v1568_v37 = vadd.f32 %v2472_v16, %v1567_v56  ;;  %v1585_v11 = vmul.f32 %v1581_v54, %v1413_v38 }
 0x88b   : > { %v1532_v45 = vsel %vm1531_vm11, %v2470_v18, %v1528_v39  ;;  %v1586_v23 = vmul.f32 %v1582_v7, %v1414_v12 }
 0x88c   : > { %v1537_v42 = vsel %vm1534_vm12, %v1536_v41, %v1532_v45  ;;  %v1572_v15 = vsel %vm1571_vm15, %v2472_v16, %v1568_v37 }
 0x88d   : > { %v1538_v47 = vmul.f32 %v1537_v42, %v1513_v1  ;;  %v1577_v4 = vsel %vm1574_vm0, %v1576_v60, %v1572_v15 }
 0x88e   : > { %v1578_v6 = vmul.f32 %v1577_v4, %v1553_v59 }
 0x88f   : > { %v2136_v55 = vclamps-f32 %v1538_v47, 1.0 }
 0x890   : > { %v2137_v40 = vclamps-f32 %v1578_v6, 1.0 }
 0x891   : > { %v1583_v58 = vadd.f32 1.0, %v2136_v55 }
 0x892   : > { %v1584_v13 = vadd.f32 1.0, %v2137_v40 }
 0x893   : > { %v1587_v61 = vmul.f32 %v1583_v58, %v1415_v57 }
 0x894   : > { %v1588_v18 = vmul.f32 %v1584_v13, %v1416_v9 }
 0x895   : > { %v1589_v3 = vpack.c.bf16 %v1587_v61, %v1585_v11 }
 0x896   : > { %v1590_v19 = vpack.c.bf16 %v1588_v18, %v1586_v23 }
 0x897   : > { %1731 = vmatmul.bf16.vlgmr.msrb.gmra.mxu0 %v1589_v3 }
 0x898   : > { %1745 = vmatmul.bf16.vlgmr.msra.gmra.mxu1 %v1590_v19 }
 0x914   : > { %v1732_v21 = vpop.f32.mrf.mxu0 }
 0x915   : > { %v1733_v10 = vadd.f32 %v2422_v22, %v1732_v21  ;;  %v1746_v24 = vpop.f32.mrf.mxu1 }
 0x917   : > { %v1747_v25 = vadd.f32 %v1746_v24, %v1733_v10 }
 0x919   : > { %v1751_v62 = vadd.f32 %v1747_v25, %v3127_v49 }
 0x91b   : > { %1753 = vst [vmem:[%s570_s22] sm:$0xff] %v1751_v62 }
 0x91c   : > { %v1734_v26 = vpop.f32.mrf.mxu0 }
 0x91d   : > { %v1735_v14 = vadd.f32 %v2422_v22, %v1734_v26  ;;  %v1748_v32 = vpop.f32.mrf.mxu1 }
 0x91f   : > { %v1749_v27 = vadd.f32 %v1748_v32, %v1735_v14 }
 0x921   : > { %v1752_v28 = vadd.f32 %v1749_v27, %v3131_v34 }
 0x923   : > { %1754 = vst [vmem:[%s570_s22 + $0x8] sm:$0xff] %v1752_v28 }
 0x924   : > { %2740 = shalt.err (!%p2737_p9)
}
 0x925   : > { %s2814_s18 = smov 128   ;;  %s2815_s22 = smov 8  }
 0x926   : > { %2303 = dma.vmem_to_hbm [thread:$0]  (%p2985_p13), %s1769_s1, 256, %s1771_s17, %s1756_s15, %s2814_s18, %s2814_s18, %s2815_s22  }
 0x927 PF: > { %s1785_s13 = sand.u32 1, %s2783_s25   ;;  %p3358_p10 = scmp.ge.s32.totalorder %s2795_s28, 2 }
 0x928   : > { %s1786_s29 = scalar_lea.sflag [#allocation4], %s1785_s13 }
 0x929   : > { %p2332_p11 = pnand %p3358_p10, %p2990_p5 }
 0x92b   : > { %p2333_p0 = pneg %p2332_p11 }
 0x92d   : > { %2778 = dma.done.wait (%p2333_p0), %s1786_s29, 256  }
 0x92e   : > { %2780 = vsyncadd (%p2333_p0), %s1786_s29, 4294967040  ;;  %p30_p2 = scmp.ge.s32.totalorder %s2965_s12, 4   ;;  %s3359_s25 = smov %s2787_s26 }
 0x92f   : > { %s3360_s26 = smov %s2791_s27  ;;  %s3361_s27 = smov %s2977_s10 }
 0x930   : > { %s3362_s28 = smov %s2965_s12  ;;  %32 = sbr.rel (!%p30_p2) target bundleno = 17 (0x11), region = 145 }
 0x935   :  { %1792 = vsyncpa [#allocation3], 1 }
 0x936   :  { %1794 = vsyncpa [#allocation3 + $0x1], 1 }
 0x937   :  { %1795 = vsyncpa [#allocation6], 1 }
 0x938   :  { %1796 = vsyncpa [#allocation9], 1 }
 0x939   :  { %1797 = vsyncpa [#allocation12], 1 }
 0x93a   :  { %1798 = vsyncpa [#allocation15], 1 }
 0x93b   :  { %1799 = vsyncpa [#allocation4], 1 }
 0x93c   :  { %1801 = vsyncpa [#allocation4 + $0x1], 1 }

</bundles_post_ra>
